<compile_context>
chip_gen: v5e
topology: v5e:2x2
jax: 0.10.0
libtpu: 0.0.40
codegen_flags: <defaults>
</compile_context>

<pallas_src>
import jax
import jax.numpy as jnp
from jax.experimental import pallas as pl
from jax.experimental.pallas import tpu as pltpu


def _round_up(x, m):
    return (x + m - 1) // m * m


def mlp2_kernel(x_ref, w1_ref, b1_ref, w2_ref, b2_ref, w3_ref, b3_ref, out_ref):
    x = x_ref[...]                                                  # (TB, d_in) bf16

    # layer_input: Linear(d_in, d_in) + ReLU   (bf16 matmul, f32 accumulate/elementwise)
    h = jnp.dot(x, w1_ref[...], preferred_element_type=jnp.float32)
    h = jnp.maximum(h + b1_ref[...], 0.0)

    # layer_second: Linear(d_in, d_hidden_pad), dropout (identity in eval), ReLU
    h = jnp.dot(h.astype(jnp.bfloat16), w2_ref[...],
                preferred_element_type=jnp.float32)
    h = jnp.maximum(h + b2_ref[...], 0.0)

    # layer_hidden: Linear(d_hidden_pad, d_out_pad)
    out_ref[...] = (
        jnp.dot(h.astype(jnp.bfloat16), w3_ref[...],
                preferred_element_type=jnp.float32)
        + b3_ref[...]
    )


def mlp2_forward(x_nchw, params, *, tile_b=256):
    """x_nchw: (N, C, H, W) float32.  params: dict of (in,out) weights + (1,out) biases."""
    n, c, h, w = x_nchw.shape
    d_in = c * h * w
    x2d = x_nchw.reshape(n, d_in)                                   # glue reshape

    d_hidden = params["w2"].shape[1]
    d_out = params["w3"].shape[1]

    # Pad hidden / output feature dims to the 128-lane width (lane-dense stores,
    # full MXU output columns).  Zero padding is exact.
    d_hp = _round_up(d_hidden, 128)
    d_op = _round_up(d_out, 128)

    w1 = params["w1"].astype(jnp.bfloat16)
    b1 = params["b1"].astype(jnp.float32)
    w2 = jnp.pad(params["w2"], ((0, 0), (0, d_hp - d_hidden))).astype(jnp.bfloat16)
    b2 = jnp.pad(params["b2"], ((0, 0), (0, d_hp - d_hidden))).astype(jnp.float32)
    w3 = jnp.pad(params["w3"], ((0, d_hp - d_hidden), (0, d_op - d_out))).astype(jnp.bfloat16)
    b3 = jnp.pad(params["b3"], ((0, 0), (0, d_op - d_out))).astype(jnp.float32)

    # Batch tiling: pad the batch to a multiple of the tile (tile itself is a
    # multiple of 8 sublanes).  Weights stay VMEM-resident across grid steps.
    tb = min(tile_b, max(8, _round_up(n, 8)))
    n_pad = _round_up(n, tb)
    x2d = jnp.pad(x2d, ((0, n_pad - n), (0, 0))).astype(jnp.bfloat16)

    grid = (n_pad // tb,)

    flops = 2 * n_pad * d_in * (d_in + d_hp) + 2 * n_pad * d_hp * d_op
    bytes_accessed = (
        x2d.size * 2                      # bf16 input
        + (w1.size + w2.size + w3.size) * 2   # bf16 weights
        + (b1.size + b2.size + b3.size) * 4   # f32 biases
        + n_pad * d_op * 4                # f32 output
    )
    cost = pl.CostEstimate(flops=flops, transcendentals=0,
                           bytes_accessed=bytes_accessed)

    out = pl.pallas_call(
        mlp2_kernel,
        out_shape=jax.ShapeDtypeStruct((n_pad, d_op), jnp.float32),
        grid=grid,
        in_specs=[
            pl.BlockSpec((tb, d_in), lambda i: (i, 0)),     # x tile (pipelined)
            pl.BlockSpec((d_in, d_in), lambda i: (0, 0)),   # w1 (resident)
            pl.BlockSpec((1, d_in), lambda i: (0, 0)),      # b1 (resident)
            pl.BlockSpec((d_in, d_hp), lambda i: (0, 0)),   # w2 (resident)
            pl.BlockSpec((1, d_hp), lambda i: (0, 0)),      # b2 (resident)
            pl.BlockSpec((d_hp, d_op), lambda i: (0, 0)),   # w3 (resident)
            pl.BlockSpec((1, d_op), lambda i: (0, 0)),      # b3 (resident)
        ],
        out_specs=pl.BlockSpec((tb, d_op), lambda i: (i, 0)),
        compiler_params=pltpu.CompilerParams(
            dimension_semantics=("parallel",),
        ),
        cost_estimate=cost,
    )(x2d, w1, b1, w2, b2, w3, b3)

    return out[:n, :d_out]


def init_params(key, d_in, d_hidden, d_out):
    """Deterministic PyTorch-Linear-style init (uniform ±1/sqrt(fan_in)).
    Weights stored as (in, out) — i.e. transposed vs. torch's (out, in)."""
    ks = jax.random.split(key, 6)

    def lin(kw, kb, fan_in, fan_out):
        bound = 1.0 / jnp.sqrt(fan_in)
        w = jax.random.uniform(kw, (fan_in, fan_out), jnp.float32, -bound, bound)
        b = jax.random.uniform(kb, (1, fan_out), jnp.float32, -bound, bound)
        return w, b

    w1, b1 = lin(ks[0], ks[1], d_in, d_in)
    w2, b2 = lin(ks[2], ks[3], d_in, d_hidden)
    w3, b3 = lin(ks[4], ks[5], d_hidden, d_out)
    return {"w1": w1, "b1": b1, "w2": w2, "b2": b2, "w3": w3, "b3": b3}


def _ref_forward(x_nchw, p):
    """Reference with the same bf16-input / f32-accumulate numerics as the kernel."""
    n = x_nchw.shape[0]
    x = x_nchw.reshape(n, -1)
    bf = jnp.bfloat16
    h = jnp.dot(x.astype(bf), p["w1"].astype(bf),
                preferred_element_type=jnp.float32) + p["b1"]
    h = jnp.maximum(h, 0.0)
    h = jnp.dot(h.astype(bf), p["w2"].astype(bf),
                preferred_element_type=jnp.float32) + p["b2"]
    h = jnp.maximum(h, 0.0)
    return jnp.dot(h.astype(bf), p["w3"].astype(bf),
                   preferred_element_type=jnp.float32) + p["b3"]


if __name__ == "__main__":
    key = jax.random.PRNGKey(0)
    k_x, k_p = jax.random.split(key)

    # small shapes: batch=2, channels=4, spatial=16 -> dim_in = 4*16*16 = 1024
    N, C, H, W = 2, 4, 16, 16
    dim_in = C * H * W
    dim_hidden, dim_out = 32, 10

    x = jax.random.normal(k_x, (N, C, H, W), jnp.float32)
    params = init_params(k_p, dim_in, dim_hidden, dim_out)

    out = mlp2_forward(x, params)
    out = jax.block_until_ready(out)

    ref = _ref_forward(x, params)
    assert out.shape == (N, dim_out)
    assert jnp.allclose(out, ref, atol=5e-2, rtol=5e-2), (
        f"max abs err = {jnp.max(jnp.abs(out - ref))}")

    print("KERNEL_OK")
</pallas_src>

<mosaic_0001>
module attributes {stable_mosaic.version = 11 : i64} {
  func.func @mlp2_kernel(%arg0: i32, %arg1: memref<8x1024xbf16, #tpu.memory_space<vmem>>, %arg2: memref<1024x1024xbf16, #tpu.memory_space<vmem>>, %arg3: memref<1x1024xf32, #tpu.memory_space<vmem>>, %arg4: memref<1024x128xbf16, #tpu.memory_space<vmem>>, %arg5: memref<1x128xf32, #tpu.memory_space<vmem>>, %arg6: memref<128x128xbf16, #tpu.memory_space<vmem>>, %arg7: memref<1x128xf32, #tpu.memory_space<vmem>>, %arg8: memref<8x128xf32, #tpu.memory_space<vmem>>) attributes {dimension_semantics = [#tpu.dimension_semantics<parallel>], iteration_bounds = array<i64: 1>, scalar_prefetch = 0 : i64, scratch_operands = 0 : i64, tpu.core_type = #tpu.core_type<tc>, window_params = [{transform_indices = @transform_0, window_bounds = array<i64: 8, 1024>}, {pipeline_mode = #tpu.pipeline_mode<synchronous>, transform_indices = @transform_1, window_bounds = array<i64: 1024, 1024>}, {pipeline_mode = #tpu.pipeline_mode<synchronous>, transform_indices = @transform_2, window_bounds = array<i64: 1, 1024>}, {pipeline_mode = #tpu.pipeline_mode<synchronous>, transform_indices = @transform_3, window_bounds = array<i64: 1024, 128>}, {pipeline_mode = #tpu.pipeline_mode<synchronous>, transform_indices = @transform_4, window_bounds = array<i64: 1, 128>}, {pipeline_mode = #tpu.pipeline_mode<synchronous>, transform_indices = @transform_5, window_bounds = array<i64: 128, 128>}, {pipeline_mode = #tpu.pipeline_mode<synchronous>, transform_indices = @transform_6, window_bounds = array<i64: 1, 128>}, {transform_indices = @transform_7, window_bounds = array<i64: 8, 128>}]} {
    %c0 = arith.constant 0 : index
    %c0_0 = arith.constant 0 : index
    %0 = vector.load %arg1[%c0, %c0_0] : memref<8x1024xbf16, #tpu.memory_space<vmem>>, vector<8x1024xbf16>
    %c0_1 = arith.constant 0 : index
    %c0_2 = arith.constant 0 : index
    %1 = vector.load %arg2[%c0_1, %c0_2] : memref<1024x1024xbf16, #tpu.memory_space<vmem>>, vector<1024x1024xbf16>
    %cst = arith.constant dense<0.000000e+00> : vector<8x1024xf32>
    %2 = tpu.matmul %0, %1, %cst {dimension_numbers = #tpu.dot_dimension_numbers<[1], [0], [0], [1], [0, 0, 1, 1], [], []>} : vector<8x1024xbf16>, vector<1024x1024xbf16>, vector<8x1024xf32> -> vector<8x1024xf32>
    %c0_3 = arith.constant 0 : index
    %c0_4 = arith.constant 0 : index
    %3 = vector.load %arg3[%c0_3, %c0_4] : memref<1x1024xf32, #tpu.memory_space<vmem>>, vector<1x1024xf32>
    %4 = vector.broadcast %3 : vector<1x1024xf32> to vector<8x1024xf32>
    %5 = arith.addf %2, %4 : vector<8x1024xf32>
    %cst_5 = arith.constant 0.000000e+00 : f32
    %6 = vector.broadcast %cst_5 : f32 to vector<8x1024xf32>
    %7 = arith.maximumf %5, %6 : vector<8x1024xf32>
    %8 = arith.truncf %7 : vector<8x1024xf32> to vector<8x1024xbf16>
    %c0_6 = arith.constant 0 : index
    %c0_7 = arith.constant 0 : index
    %9 = vector.load %arg4[%c0_6, %c0_7] : memref<1024x128xbf16, #tpu.memory_space<vmem>>, vector<1024x128xbf16>
    %cst_8 = arith.constant dense<0.000000e+00> : vector<8x128xf32>
    %10 = tpu.matmul %8, %9, %cst_8 {dimension_numbers = #tpu.dot_dimension_numbers<[1], [0], [0], [1], [0, 0, 1, 1], [], []>} : vector<8x1024xbf16>, vector<1024x128xbf16>, vector<8x128xf32> -> vector<8x128xf32>
    %c0_9 = arith.constant 0 : index
    %c0_10 = arith.constant 0 : index
    %11 = vector.load %arg5[%c0_9, %c0_10] : memref<1x128xf32, #tpu.memory_space<vmem>>, vector<1x128xf32>
    %12 = vector.broadcast %11 : vector<1x128xf32> to vector<8x128xf32>
    %13 = arith.addf %10, %12 : vector<8x128xf32>
    %cst_11 = arith.constant 0.000000e+00 : f32
    %14 = vector.broadcast %cst_11 : f32 to vector<8x128xf32>
    %15 = arith.maximumf %13, %14 : vector<8x128xf32>
    %16 = arith.truncf %15 : vector<8x128xf32> to vector<8x128xbf16>
    %c0_12 = arith.constant 0 : index
    %c0_13 = arith.constant 0 : index
    %17 = vector.load %arg6[%c0_12, %c0_13] : memref<128x128xbf16, #tpu.memory_space<vmem>>, vector<128x128xbf16>
    %cst_14 = arith.constant dense<0.000000e+00> : vector<8x128xf32>
    %18 = tpu.matmul %16, %17, %cst_14 {dimension_numbers = #tpu.dot_dimension_numbers<[1], [0], [0], [1], [0, 0, 1, 1], [], []>} : vector<8x128xbf16>, vector<128x128xbf16>, vector<8x128xf32> -> vector<8x128xf32>
    %c0_15 = arith.constant 0 : index
    %c0_16 = arith.constant 0 : index
    %19 = vector.load %arg7[%c0_15, %c0_16] : memref<1x128xf32, #tpu.memory_space<vmem>>, vector<1x128xf32>
    %20 = vector.broadcast %19 : vector<1x128xf32> to vector<8x128xf32>
    %21 = arith.addf %18, %20 : vector<8x128xf32>
    %c0_17 = arith.constant 0 : index
    %c0_18 = arith.constant 0 : index
    %22 = vector.load %arg8[%c0_17, %c0_18] : memref<8x128xf32, #tpu.memory_space<vmem>>, vector<8x128xf32>
    tpu.vector_store %arg8[%c0_17, %c0_18], %21 {strides = array<i32>} : memref<8x128xf32, #tpu.memory_space<vmem>>, vector<8x128xf32>,
    return
  }
  func.func @transform_0(%arg0: i32) -> (i32, i32) {
    %c0_i32 = arith.constant 0 : i32
    %c0_i32_0 = arith.constant 0 : i32
    return %arg0, %c0_i32 : i32, i32
  }
  func.func @transform_1(%arg0: i32) -> (i32, i32) {
    %c0_i32 = arith.constant 0 : i32
    %c0_i32_0 = arith.constant 0 : i32
    %c0_i32_1 = arith.constant 0 : i32
    return %c0_i32, %c0_i32_0 : i32, i32
  }
  func.func @transform_2(%arg0: i32) -> (i32, i32) {
    %c0_i32 = arith.constant 0 : i32
    %c0_i32_0 = arith.constant 0 : i32
    %c0_i32_1 = arith.constant 0 : i32
    return %c0_i32, %c0_i32_0 : i32, i32
  }
  func.func @transform_3(%arg0: i32) -> (i32, i32) {
    %c0_i32 = arith.constant 0 : i32
    %c0_i32_0 = arith.constant 0 : i32
    %c0_i32_1 = arith.constant 0 : i32
    return %c0_i32, %c0_i32_0 : i32, i32
  }
  func.func @transform_4(%arg0: i32) -> (i32, i32) {
    %c0_i32 = arith.constant 0 : i32
    %c0_i32_0 = arith.constant 0 : i32
    %c0_i32_1 = arith.constant 0 : i32
    return %c0_i32, %c0_i32_0 : i32, i32
  }
  func.func @transform_5(%arg0: i32) -> (i32, i32) {
    %c0_i32 = arith.constant 0 : i32
    %c0_i32_0 = arith.constant 0 : i32
    %c0_i32_1 = arith.constant 0 : i32
    return %c0_i32, %c0_i32_0 : i32, i32
  }
  func.func @transform_6(%arg0: i32) -> (i32, i32) {
    %c0_i32 = arith.constant 0 : i32
    %c0_i32_0 = arith.constant 0 : i32
    %c0_i32_1 = arith.constant 0 : i32
    return %c0_i32, %c0_i32_0 : i32, i32
  }
  func.func @transform_7(%arg0: i32) -> (i32, i32) {
    %c0_i32 = arith.constant 0 : i32
    %c0_i32_0 = arith.constant 0 : i32
    return %arg0, %c0_i32 : i32, i32
  }
}

</mosaic_0001>

<bundles_post_ra>
// kernel: tpu_custom_call.1
= control target key start
LH: loop header
LB: loop body
LE: loop exit
PB: predicated region body
PF: predicated region fallthrough
CT: control target
= control target key end

     0   :  { %12 = vsyncpa [#allocation3], 0  ;;  %s8187_s0 = inlined_call_operand.hbm [shape: bf16[8,1024], index: 0, kind: input, shape index: {}]   ;;  %s8188_s1 = inlined_call_operand.hbm [shape: bf16[1024,1024], index: 1, kind: input, shape index: {}]   ;;  %s8189_s2 = inlined_call_operand.hbm [shape: f32[1,1024], index: 2, kind: input, shape index: {}]   ;;  %s8190_s3 = inlined_call_operand.hbm [shape: bf16[1024,128], index: 3, kind: input, shape index: {}]   ;;  %s8191_s4 = inlined_call_operand.hbm [shape: f32[1,128], index: 4, kind: input, shape index: {}]   ;;  %s8192_s5 = inlined_call_operand.hbm [shape: bf16[128,128], index: 5, kind: input, shape index: {}]   ;;  %s8193_s6 = inlined_call_operand.hbm [shape: f32[1,128], index: 6, kind: input, shape index: {}]   ;;  %s8194_s7 = inlined_call_operand.hbm [shape: f32[8,128], index: 7, kind: output, shape index: {}]  }
   0x1   :  { %13 = vsyncpa [#allocation6], 0 }
   0x2   :  { %14 = vsyncpa [#allocation9], 0 }
   0x3   :  { %15 = vsyncpa [#allocation12], 0  ;;  %s32_s26 = sshll.u32 %s8188_s1, 4  ;;  %s33_s26 = int_to_ptr.hbm [resolvable:$true] %s32_s26 }
   0x4   :  { %16 = vsyncpa [#allocation4], 0  ;;  %s7961_s27 = smov [#allocation5]   ;;  %s56_s8 = sshll.u32 %s8190_s3, 4  ;;  %s57_s8 = int_to_ptr.hbm [resolvable:$true] %s56_s8 }
   0x5   :  { %s34_s28 = sshll.u32 %s7961_s27, 4  ;;  %s7962_s9 = smov 512   ;;  %s35_s28 = int_to_ptr.vmem [resolvable:$true] %s34_s28 }
   0x6   :  { %s7963_s10 = smov 32   ;;  %s7964_s11 = smov [#allocation8]  }
   0x7   :  { %40 = dma.hbm_to_vmem [thread:$0]  %s33_s26, 65536, %s35_s28, [#allocation6], %s7962_s9, %s7962_s9, %s7963_s10  }
   0x8   :  { %s58_s12 = sshll.u32 %s7964_s11, 4  ;;  %s7965_s13 = smov 64   ;;  %s59_s12 = int_to_ptr.vmem [resolvable:$true] %s58_s12 }
   0x9   :  { %s7966_s14 = smov 4   ;;  %s80_s16 = sshll.u32 %s8192_s5, 4  ;;  %s81_s16 = int_to_ptr.hbm [resolvable:$true] %s80_s16 }
   0xa   :  { %64 = dma.hbm_to_vmem [thread:$0]  %s57_s8, 8192, %s59_s12, [#allocation9], %s7965_s13, %s7965_s13, %s7966_s14  }
   0xb   :  { %s7967_s17 = smov [#allocation11]   ;;  %s22_s20 = sshll.u32 %s8187_s0, 4  ;;  %s23_s20 = int_to_ptr.hbm [resolvable:$true] %s22_s20 }
   0xc   :  { %s82_s18 = sshll.u32 %s7967_s17, 4  ;;  %s7968_s21 = smov [#allocation2]   ;;  %s83_s18 = int_to_ptr.vmem [resolvable:$true] %s82_s18 }
   0xd   :  { %88 = dma.hbm_to_vmem [thread:$0]  %s81_s16, 1024, %s83_s18, [#allocation12], %s7965_s13, %s7965_s13, %s7966_s14  }
   0xe   :  { %s24_s22 = sshll.u32 %s7968_s21, 4  ;;  %s46_s25 = sshll.u32 %s8189_s2, 4  ;;  %s25_s22 = int_to_ptr.vmem [resolvable:$true] %s24_s22  ;;  %s47_s25 = int_to_ptr.hbm [resolvable:$true] %s46_s25 }
   0xf   :  { %27 = dma.hbm_to_vmem [thread:$0]  %s23_s20, 512, %s25_s22, [#allocation3]  }
  0x10   :  { %s70_s27 = sshll.u32 %s8191_s4, 4  ;;  %s7969_s28 = smov [#allocation7]   ;;  %s71_s27 = int_to_ptr.hbm [resolvable:$true] %s70_s27 }
  0x11   :  { %s48_s29 = sshll.u32 %s7969_s28, 4  ;;  %s7970_s0 = smov [#allocation10]   ;;  %s49_s29 = int_to_ptr.vmem [resolvable:$true] %s48_s29 }
  0x12   :  { %51 = dma.hbm_to_vmem [thread:$0]  %s47_s25, 128, %s49_s29, [#allocation6]  }
  0x13   :  { %s72_s30 = sshll.u32 %s7970_s0, 4  ;;  %s94_s10 = sshll.u32 %s8193_s6, 4  ;;  %s73_s30 = int_to_ptr.vmem [resolvable:$true] %s72_s30  ;;  %s95_s10 = int_to_ptr.hbm [resolvable:$true] %s94_s10 }
  0x14   :  { %75 = dma.hbm_to_vmem [thread:$0]  %s71_s27, 16, %s73_s30, [#allocation9]  }
  0x15   :  { %s7971_s2 = smov [#allocation13]  }
  0x16   :  { %s96_s11 = sshll.u32 %s7971_s2, 4  ;;  %s97_s11 = int_to_ptr.vmem [resolvable:$true] %s96_s11 }
  0x17   :  { %99 = dma.hbm_to_vmem [thread:$0]  %s95_s10, 16, %s97_s11, [#allocation12]  }
  0x18   :  { %7951 = dma.done.wait [#allocation3], 512  }
  0x19   :  { %7952 = vsyncadd [#allocation3], 4294966784 }
  0x1a   :  { %7953 = dma.done.wait [#allocation6], 65664  }
  0x1b   :  { %7954 = vsyncadd [#allocation6], 4294901632 }
  0x1c   :  { %7955 = dma.done.wait [#allocation9], 8208  }
  0x1d   :  { %7956 = vsyncadd [#allocation9], 4294959088 }
  0x1e   :  { %7957 = dma.done.wait [#allocation12], 1040  }
  0x1f   :  { %7958 = vsyncadd [#allocation12], 4294966256  ;;  %v5048_v0 = vld [vmem:[#allocation5 + $0x1c0] sm:$0xf]  ;;  %s7972_s4 = smov [#allocation14]   ;;  %s4809_s14 = sshll.u32 %s8194_s7, 4  ;;  %s4810_s14 = int_to_ptr.hbm [resolvable:$true] %s4809_s14 }
  0x20   :  { %v7218_v1 = vld [vmem:[#allocation5 + $0x1dc] sm:$0xf0]  ;;  %s4807_s6 = sshll.u32 %s7972_s4, 4  ;;  %s4808_s6 = int_to_ptr.vmem [resolvable:$true] %s4807_s6 }
  0x21   :  { %v5304_v2 = vld [vmem:[#allocation5 + $0x3c0] sm:$0xf]  ;;  %v5049_v3 = vor.u32 %v7218_v1, %v5048_v0 }
  0x22   :  { %v7282_v4 = vld [vmem:[#allocation5 + $0x3dc] sm:$0xf0] }
  0x23   :  { %v5560_v5 = vld [vmem:[#allocation5 + $0x5c0] sm:$0xf]  ;;  %v5305_v7 = vor.u32 %v7282_v4, %v5304_v2  ;;  %3250 = vmatpush.bf16.msra.mxu0 %v5049_v3 }
  0x24   :  { %v7346_v6 = vld [vmem:[#allocation5 + $0x5dc] sm:$0xf0] }
  0x25   :  { %v5561_v8 = vor.u32 %v7346_v6, %v5560_v5  ;;  %v5816_v9 = vld [vmem:[#allocation5 + $0x7c0] sm:$0xf]  ;;  %3263 = vmatpush.bf16.msra.mxu1 %v5305_v7 }
  0x26   :  { %v7410_v10 = vld [vmem:[#allocation5 + $0x7dc] sm:$0xf0] }
  0x27   :  { %v5016_v11 = vld [vmem:[#allocation5 + $0x180] sm:$0xf]  ;;  %v5817_v12 = vor.u32 %v7410_v10, %v5816_v9  ;;  %3276 = vmatpush.bf16.msra.mxu2 %v5561_v8 }
  0x28   :  { %v7210_v13 = vld [vmem:[#allocation5 + $0x19c] sm:$0xf0] }
  0x29   :  { %v5272_v14 = vld [vmem:[#allocation5 + $0x380] sm:$0xf]  ;;  %v5017_v16 = vor.u32 %v7210_v13, %v5016_v11  ;;  %3289 = vmatpush.bf16.msra.mxu3 %v5817_v12 }
  0x2a   :  { %v7274_v15 = vld [vmem:[#allocation5 + $0x39c] sm:$0xf0] }
  0x2b   :  { %v5273_v17 = vor.u32 %v7274_v15, %v5272_v14  ;;  %v5528_v18 = vld [vmem:[#allocation5 + $0x580] sm:$0xf]  ;;  %3251 = vmatpush.bf16.msra.mxu0 %v5017_v16 }
  0x2c   :  { %v7338_v19 = vld [vmem:[#allocation5 + $0x59c] sm:$0xf0] }
  0x2d   :  { %v5784_v20 = vld [vmem:[#allocation5 + $0x780] sm:$0xf]  ;;  %v5529_v21 = vor.u32 %v7338_v19, %v5528_v18  ;;  %3264 = vmatpush.bf16.msra.mxu1 %v5273_v17 }
  0x2e   :  { %v7402_v22 = vld [vmem:[#allocation5 + $0x79c] sm:$0xf0] }
  0x2f   :  { %v4984_v23 = vld [vmem:[#allocation5 + $0x140] sm:$0xf]  ;;  %v5785_v25 = vor.u32 %v7402_v22, %v5784_v20  ;;  %3277 = vmatpush.bf16.msra.mxu2 %v5529_v21 }
  0x30   :  { %v7202_v24 = vld [vmem:[#allocation5 + $0x15c] sm:$0xf0] }
  0x31   :  { %v5240_v26 = vld [vmem:[#allocation5 + $0x340] sm:$0xf]  ;;  %v4985_v29 = vor.u32 %v7202_v24, %v4984_v23  ;;  %3290 = vmatpush.bf16.msra.mxu3 %v5785_v25 }
  0x32   :  { %v7266_v27 = vld [vmem:[#allocation5 + $0x35c] sm:$0xf0] }
  0x33   :  { %v5496_v28 = vld [vmem:[#allocation5 + $0x540] sm:$0xf]  ;;  %v5241_v33 = vor.u32 %v7266_v27, %v5240_v26  ;;  %3252 = vmatpush.bf16.msra.mxu0 %v4985_v29 }
  0x34   :  { %v7330_v30 = vld [vmem:[#allocation5 + $0x55c] sm:$0xf0] }
  0x35   :  { %v5752_v31 = vld [vmem:[#allocation5 + $0x740] sm:$0xf]  ;;  %v5497_v34 = vor.u32 %v7330_v30, %v5496_v28  ;;  %3265 = vmatpush.bf16.msra.mxu1 %v5241_v33 }
  0x36   :  { %v7394_v32 = vld [vmem:[#allocation5 + $0x75c] sm:$0xf0] }
  0x37   :  { %v4952_v35 = vld [vmem:[#allocation5 + $0x100] sm:$0xf]  ;;  %v5753_v38 = vor.u32 %v7394_v32, %v5752_v31  ;;  %3278 = vmatpush.bf16.msra.mxu2 %v5497_v34 }
  0x38   :  { %v7194_v36 = vld [vmem:[#allocation5 + $0x11c] sm:$0xf0] }
  0x39   :  { %v5208_v37 = vld [vmem:[#allocation5 + $0x300] sm:$0xf]  ;;  %v4953_v44 = vor.u32 %v7194_v36, %v4952_v35  ;;  %3291 = vmatpush.bf16.msra.mxu3 %v5753_v38 }
  0x3a   :  { %v7258_v39 = vld [vmem:[#allocation5 + $0x31c] sm:$0xf0] }
  0x3b   :  { %v5464_v40 = vld [vmem:[#allocation5 + $0x500] sm:$0xf]  ;;  %v5209_v45 = vor.u32 %v7258_v39, %v5208_v37  ;;  %3253 = vmatpush.bf16.msra.mxu0 %v4953_v44 }
  0x3c   :  { %v7322_v41 = vld [vmem:[#allocation5 + $0x51c] sm:$0xf0] }
  0x3d   :  { %v5720_v42 = vld [vmem:[#allocation5 + $0x700] sm:$0xf]  ;;  %v5465_v46 = vor.u32 %v7322_v41, %v5464_v40  ;;  %3266 = vmatpush.bf16.msra.mxu1 %v5209_v45 }
  0x3e   :  { %v7386_v43 = vld [vmem:[#allocation5 + $0x71c] sm:$0xf0] }
  0x3f   :  { %v4920_v47 = vld [vmem:[#allocation5 + $0xc0] sm:$0xf]  ;;  %v5721_v50 = vor.u32 %v7386_v43, %v5720_v42  ;;  %3279 = vmatpush.bf16.msra.mxu2 %v5465_v46 }
  0x40   :  { %v7186_v48 = vld [vmem:[#allocation5 + $0xdc] sm:$0xf0] }
  0x41   :  { %v5176_v49 = vld [vmem:[#allocation5 + $0x2c0] sm:$0xf]  ;;  %v4921_v56 = vor.u32 %v7186_v48, %v4920_v47  ;;  %3292 = vmatpush.bf16.msra.mxu3 %v5721_v50 }
  0x42   :  { %v7250_v51 = vld [vmem:[#allocation5 + $0x2dc] sm:$0xf0] }
  0x43   :  { %v5432_v52 = vld [vmem:[#allocation5 + $0x4c0] sm:$0xf]  ;;  %v5177_v57 = vor.u32 %v7250_v51, %v5176_v49  ;;  %3254 = vmatpush.bf16.msra.mxu0 %v4921_v56 }
  0x44   :  { %v7314_v53 = vld [vmem:[#allocation5 + $0x4dc] sm:$0xf0] }
  0x45   :  { %v5688_v54 = vld [vmem:[#allocation5 + $0x6c0] sm:$0xf]  ;;  %v5433_v58 = vor.u32 %v7314_v53, %v5432_v52  ;;  %3267 = vmatpush.bf16.msra.mxu1 %v5177_v57 }
  0x46   :  { %v7378_v55 = vld [vmem:[#allocation5 + $0x6dc] sm:$0xf0] }
  0x47   :  { %v4888_v59 = vld [vmem:[#allocation5 + $0x80] sm:$0xf]  ;;  %v5689_v62 = vor.u32 %v7378_v55, %v5688_v54  ;;  %3280 = vmatpush.bf16.msra.mxu2 %v5433_v58 }
  0x48   :  { %v7178_v60 = vld [vmem:[#allocation5 + $0x9c] sm:$0xf0] }
  0x49   :  { %v5144_v61 = vld [vmem:[#allocation5 + $0x280] sm:$0xf]  ;;  %v4889_v4 = vor.u32 %v7178_v60, %v4888_v59  ;;  %3293 = vmatpush.bf16.msra.mxu3 %v5689_v62 }
  0x4a   :  { %v7242_v63 = vld [vmem:[#allocation5 + $0x29c] sm:$0xf0] }
  0x4b   :  { %v5400_v0 = vld [vmem:[#allocation5 + $0x480] sm:$0xf]  ;;  %v5145_v5 = vor.u32 %v7242_v63, %v5144_v61  ;;  %3255 = vmatpush.bf16.msra.mxu0 %v4889_v4 }
  0x4c   :  { %v7306_v1 = vld [vmem:[#allocation5 + $0x49c] sm:$0xf0] }
  0x4d   :  { %v5656_v2 = vld [vmem:[#allocation5 + $0x680] sm:$0xf]  ;;  %v5401_v6 = vor.u32 %v7306_v1, %v5400_v0  ;;  %3268 = vmatpush.bf16.msra.mxu1 %v5145_v5 }
  0x4e   :  { %v7370_v3 = vld [vmem:[#allocation5 + $0x69c] sm:$0xf0] }
  0x4f   :  { %v4856_v7 = vld [vmem:[#allocation5 + $0x40] sm:$0xf]  ;;  %v5657_v10 = vor.u32 %v7370_v3, %v5656_v2  ;;  %3281 = vmatpush.bf16.msra.mxu2 %v5401_v6  ;;  %v129_v2 = vld [vmem:[#allocation2 + $0x8] sm:$0xff] }
  0x50   :  { %v7170_v8 = vld [vmem:[#allocation5 + $0x5c] sm:$0xf0] }
  0x51   :  { %v5112_v9 = vld [vmem:[#allocation5 + $0x240] sm:$0xf]  ;;  %v4857_v16 = vor.u32 %v7170_v8, %v4856_v7  ;;  %3294 = vmatpush.bf16.msra.mxu3 %v5657_v10  ;;  %v668_v8 = vunpack.c.l.b16 %v129_v2  ;;  %v669_v10 = vunpack.c.h.b16 %v129_v2 }
  0x52   :  { %v7234_v11 = vld [vmem:[#allocation5 + $0x25c] sm:$0xf0] }
  0x53   :  { %v5368_v12 = vld [vmem:[#allocation5 + $0x440] sm:$0xf]  ;;  %v5113_v19 = vor.u32 %v7234_v11, %v5112_v9  ;;  %3256 = vmatpush.bf16.msra.mxu0 %v4857_v16 }
  0x54   :  { %v7298_v13 = vld [vmem:[#allocation5 + $0x45c] sm:$0xf0] }
  0x55   :  { %v5624_v14 = vld [vmem:[#allocation5 + $0x640] sm:$0xf]  ;;  %v5369_v20 = vor.u32 %v7298_v13, %v5368_v12  ;;  %3269 = vmatpush.bf16.msra.mxu1 %v5113_v19 }
  0x56   :  { %v7362_v15 = vld [vmem:[#allocation5 + $0x65c] sm:$0xf0] }
  0x57   :  { %v4824_v17 = vld [vmem:[#allocation5] sm:$0xf]  ;;  %v5625_v24 = vor.u32 %v7362_v15, %v5624_v14  ;;  %3282 = vmatpush.bf16.msra.mxu2 %v5369_v20  ;;  %v8038_v20 = vpack.c.b16 %v669_v10, %v669_v10  ;;  %v7278_v10 = vld [vmem:[#allocation5 + $0x3c4] sm:$0xf] }
  0x58   :  { %v7162_v18 = vld [vmem:[#allocation5 + $0x1c] sm:$0xf0] }
  0x59   :  { %v5080_v21 = vld [vmem:[#allocation5 + $0x200] sm:$0xf]  ;;  %v4825_v31 = vor.u32 %v7162_v18, %v4824_v17  ;;  %3295 = vmatpush.bf16.msra.mxu3 %v5625_v24  ;;  %v8034_v18 = vpack.c.b16 %v668_v8, %v668_v8  ;;  %v7214_v8 = vld [vmem:[#allocation5 + $0x1c4] sm:$0xf] }
  0x5a   :  { %v7226_v22 = vld [vmem:[#allocation5 + $0x21c] sm:$0xf0] }
  0x5b   :  { %v5336_v23 = vld [vmem:[#allocation5 + $0x400] sm:$0xf]  ;;  %v5081_v35 = vor.u32 %v7226_v22, %v5080_v21  ;;  %3257 = vmatpush.bf16.msra.mxu0 %v4825_v31 }
  0x5c   :  { %v7290_v25 = vld [vmem:[#allocation5 + $0x41c] sm:$0xf0] }
  0x5d   :  { %v5592_v26 = vld [vmem:[#allocation5 + $0x600] sm:$0xf]  ;;  %v5337_v36 = vor.u32 %v7290_v25, %v5336_v23  ;;  %3270 = vmatpush.bf16.msra.mxu1 %v5081_v35 }
  0x5e   :  { %v7354_v27 = vld [vmem:[#allocation5 + $0x61c] sm:$0xf0] }
  0x5f   :  { %v6072_v28 = vld [vmem:[#allocation5 + $0x9c0] sm:$0xf]  ;;  %v5593_v39 = vor.u32 %v7354_v27, %v5592_v26  ;;  %3283 = vmatpush.bf16.msra.mxu2 %v5337_v36 }
  0x60   :  { %v7474_v29 = vld [vmem:[#allocation5 + $0x9dc] sm:$0xf0] }
  0x61   :  { %v6328_v30 = vld [vmem:[#allocation5 + $0xbc0] sm:$0xf]  ;;  %v6073_v40 = vor.u32 %v7474_v29, %v6072_v28  ;;  %3296 = vmatpush.bf16.msra.mxu3 %v5593_v39 }
  0x62   :  { %v7538_v32 = vld [vmem:[#allocation5 + $0xbdc] sm:$0xf0]  ;;  %3284 = vmatmul.bf16.vlgmr.msra.gmra.mxu2 %v8034_v18 }
  0x63   :  { %v6584_v33 = vld [vmem:[#allocation5 + $0xdc0] sm:$0xf]  ;;  %v6329_v41 = vor.u32 %v7538_v32, %v6328_v30  ;;  %3302 = vmatpush.bf16.msrb.mxu0 %v6073_v40 }
  0x64   :  { %v7602_v34 = vld [vmem:[#allocation5 + $0xddc] sm:$0xf0]  ;;  %3297 = vmatmul.bf16.vlgmr.msra.gmra.mxu3 %v8038_v20 }
  0x65   :  { %v6840_v37 = vld [vmem:[#allocation5 + $0xfc0] sm:$0xf]  ;;  %v6585_v42 = vor.u32 %v7602_v34, %v6584_v33  ;;  %3315 = vmatpush.bf16.msrb.mxu1 %v6329_v41 }
  0x66   :  { %v7666_v38 = vld [vmem:[#allocation5 + $0xfdc] sm:$0xf0] }
  0x67   :  { %v6040_v43 = vld [vmem:[#allocation5 + $0x980] sm:$0xf]  ;;  %v6841_v46 = vor.u32 %v7666_v38, %v6840_v37  ;;  %3328 = vmatpush.bf16.msrb.mxu2 %v6585_v42 }
  0x68   :  { %v7466_v44 = vld [vmem:[#allocation5 + $0x99c] sm:$0xf0] }
  0x69   :  { %v6296_v45 = vld [vmem:[#allocation5 + $0xb80] sm:$0xf]  ;;  %v6041_v52 = vor.u32 %v7466_v44, %v6040_v43  ;;  %3341 = vmatpush.bf16.msrb.mxu3 %v6841_v46 }
  0x6a   :  { %v7530_v47 = vld [vmem:[#allocation5 + $0xb9c] sm:$0xf0] }
  0x6b   :  { %v6552_v48 = vld [vmem:[#allocation5 + $0xd80] sm:$0xf]  ;;  %v6297_v54 = vor.u32 %v7530_v47, %v6296_v45  ;;  %3303 = vmatpush.bf16.msrb.mxu0 %v6041_v52 }
  0x6c   :  { %v7594_v49 = vld [vmem:[#allocation5 + $0xd9c] sm:$0xf0] }
  0x6d   :  { %v6808_v50 = vld [vmem:[#allocation5 + $0xf80] sm:$0xf]  ;;  %v6553_v55 = vor.u32 %v7594_v49, %v6552_v48  ;;  %3316 = vmatpush.bf16.msrb.mxu1 %v6297_v54 }
  0x6e   :  { %v7658_v51 = vld [vmem:[#allocation5 + $0xf9c] sm:$0xf0] }
  0x6f   :  { %v6008_v53 = vld [vmem:[#allocation5 + $0x940] sm:$0xf]  ;;  %v6809_v59 = vor.u32 %v7658_v51, %v6808_v50  ;;  %3329 = vmatpush.bf16.msrb.mxu2 %v6553_v55 }
  0x70   :  { %v7458_v56 = vld [vmem:[#allocation5 + $0x95c] sm:$0xf0] }
  0x71   :  { %v6264_v57 = vld [vmem:[#allocation5 + $0xb40] sm:$0xf]  ;;  %v6009_v0 = vor.u32 %v7458_v56, %v6008_v53  ;;  %3342 = vmatpush.bf16.msrb.mxu3 %v6809_v59 }
  0x72   :  { %v7522_v58 = vld [vmem:[#allocation5 + $0xb5c] sm:$0xf0] }
  0x73   :  { %v6520_v60 = vld [vmem:[#allocation5 + $0xd40] sm:$0xf]  ;;  %v6265_v1 = vor.u32 %v7522_v58, %v6264_v57  ;;  %3304 = vmatpush.bf16.msrb.mxu0 %v6009_v0 }
  0x74   :  { %v7586_v61 = vld [vmem:[#allocation5 + $0xd5c] sm:$0xf0] }
  0x75   :  { %v6776_v62 = vld [vmem:[#allocation5 + $0xf40] sm:$0xf]  ;;  %v6521_v4 = vor.u32 %v7586_v61, %v6520_v60  ;;  %3317 = vmatpush.bf16.msrb.mxu1 %v6265_v1 }
  0x76   :  { %v7650_v63 = vld [vmem:[#allocation5 + $0xf5c] sm:$0xf0] }
  0x77   :  { %v128_v3 = vld [vmem:[#allocation2] sm:$0xff]  ;;  %v6777_v11 = vor.u32 %v7650_v63, %v6776_v62  ;;  %3330 = vmatpush.bf16.msrb.mxu2 %v6521_v4 }
  0x78   :  { %v5976_v5 = vld [vmem:[#allocation5 + $0x900] sm:$0xf]  ;;  %v666_v9 = vunpack.c.l.b16 %v128_v3  ;;  %v667_v15 = vunpack.c.h.b16 %v128_v3  ;;  %v131_v3 = vld [vmem:[#allocation2 + $0x18] sm:$0xff] }
  0x79   :  { %v7450_v6 = vld [vmem:[#allocation5 + $0x91c] sm:$0xf0]  ;;  %3343 = vmatpush.bf16.msrb.mxu3 %v6777_v11 }
  0x7a   :  { %v6232_v7 = vld [vmem:[#allocation5 + $0xb00] sm:$0xf]  ;;  %v8036_v19 = vpack.c.b16 %v666_v9, %v666_v9  ;;  %v5977_v21 = vor.u32 %v7450_v6, %v5976_v5  ;;  %v8040_v22 = vpack.c.b16 %v667_v15, %v667_v15  ;;  %v5050_v9 = vld [vmem:[#allocation5 + $0x1e0] sm:$0xf0]  ;;  %v672_v15 = vunpack.c.l.b16 %v131_v3 }
  0x7b   :  { %v7514_v12 = vld [vmem:[#allocation5 + $0xb1c] sm:$0xf0] }
  0x7c   :  { %v6488_v13 = vld [vmem:[#allocation5 + $0xd00] sm:$0xf]  ;;  %v6233_v23 = vor.u32 %v7514_v12, %v6232_v7  ;;  %3258 = vmatmul.bf16.vlgmr.msra.gmra.mxu0 %v8036_v19  ;;  %3271 = vmatmul.bf16.vlgmr.msra.gmra.mxu1 %v8040_v22  ;;  %v130_v7 = vld [vmem:[#allocation2 + $0x10] sm:$0xff]  ;;  %v5306_v12 = vld [vmem:[#allocation5 + $0x3e0] sm:$0xf0] }
  0x7d   :  { %v7578_v14 = vld [vmem:[#allocation5 + $0xd1c] sm:$0xf0]  ;;  %3305 = vmatpush.bf16.msrb.mxu0 %v5977_v21  ;;  %v7406_v21 = vld [vmem:[#allocation5 + $0x7c4] sm:$0xf] }
  0x7e   :  { %v6744_v16 = vld [vmem:[#allocation5 + $0xf00] sm:$0xf]  ;;  %v6489_v24 = vor.u32 %v7578_v14, %v6488_v13  ;;  %3318 = vmatpush.bf16.msrb.mxu1 %v6233_v23  ;;  %v7342_v13 = vld [vmem:[#allocation5 + $0x5c4] sm:$0xf] }
  0x7f   :  { %v7642_v17 = vld [vmem:[#allocation5 + $0xf1c] sm:$0xf0]  ;;  %v5562_v14 = vld [vmem:[#allocation5 + $0x5e0] sm:$0xf0] }
  0x80   :  { %v5944_v25 = vld [vmem:[#allocation5 + $0x8c0] sm:$0xf]  ;;  %v6745_v28 = vor.u32 %v7642_v17, %v6744_v16  ;;  %3331 = vmatpush.bf16.msrb.mxu2 %v6489_v24  ;;  %v5818_v23 = vld [vmem:[#allocation5 + $0x7e0] sm:$0xf0]  ;;  %v670_v24 = vunpack.c.l.b16 %v130_v7 }
  0x81   :  { %v7442_v26 = vld [vmem:[#allocation5 + $0x8dc] sm:$0xf0] }
  0x82   :  { %v6200_v27 = vld [vmem:[#allocation5 + $0xac0] sm:$0xf]  ;;  %v5945_v34 = vor.u32 %v7442_v26, %v5944_v25  ;;  %3344 = vmatpush.bf16.msrb.mxu3 %v6745_v28  ;;  %v673_v25 = vunpack.c.h.b16 %v131_v3  ;;  %v671_v28 = vunpack.c.h.b16 %v130_v7  ;;  %v5722_v3 = vld [vmem:[#allocation5 + $0x720] sm:$0xf0] }
  0x83   :  { %v7506_v29 = vld [vmem:[#allocation5 + $0xadc] sm:$0xf0]  ;;  %v7182_v7 = vld [vmem:[#allocation5 + $0xc4] sm:$0xf] }
  0x84   :  { %v6456_v30 = vld [vmem:[#allocation5 + $0xcc0] sm:$0xf]  ;;  %v6201_v35 = vor.u32 %v7506_v29, %v6200_v27  ;;  %3306 = vmatpush.bf16.msrb.mxu0 %v5945_v34  ;;  %v5053_v27 = vor.u32 %v7214_v8, %v5050_v9  ;;  %v5309_v29 = vor.u32 %v7278_v10, %v5306_v12  ;;  %v5821_v34 = vor.u32 %v7406_v21, %v5818_v23  ;;  %v4922_v8 = vld [vmem:[#allocation5 + $0xe0] sm:$0xf0] }
  0x85   :  { %v7570_v31 = vld [vmem:[#allocation5 + $0xcdc] sm:$0xf0]  ;;  %v7246_v9 = vld [vmem:[#allocation5 + $0x2c4] sm:$0xf] }
  0x86   :  { %v6712_v32 = vld [vmem:[#allocation5 + $0xec0] sm:$0xf]  ;;  %v6457_v36 = vor.u32 %v7570_v31, %v6456_v30  ;;  %3319 = vmatpush.bf16.msrb.mxu1 %v6201_v35  ;;  %v5565_v30 = vor.u32 %v7342_v13, %v5562_v14  ;;  %v7206_v31 = vld [vmem:[#allocation5 + $0x184] sm:$0xf] }
  0x87   :  { %v7634_v33 = vld [vmem:[#allocation5 + $0xedc] sm:$0xf0]  ;;  %v5274_v35 = vld [vmem:[#allocation5 + $0x3a0] sm:$0xf0] }
  0x88   :  { %v5912_v37 = vld [vmem:[#allocation5 + $0x880] sm:$0xf]  ;;  %v6713_v40 = vor.u32 %v7634_v33, %v6712_v32  ;;  %3332 = vmatpush.bf16.msrb.mxu2 %v6457_v36  ;;  %v5018_v32 = vld [vmem:[#allocation5 + $0x1a0] sm:$0xf0] }
  0x89   :  { %v7434_v38 = vld [vmem:[#allocation5 + $0x89c] sm:$0xf0]  ;;  %v7270_v33 = vld [vmem:[#allocation5 + $0x384] sm:$0xf] }
  0x8a   :  { %v6168_v39 = vld [vmem:[#allocation5 + $0xa80] sm:$0xf]  ;;  %v5913_v46 = vor.u32 %v7434_v38, %v5912_v37  ;;  %3345 = vmatpush.bf16.msrb.mxu3 %v6713_v40  ;;  %v7334_v36 = vld [vmem:[#allocation5 + $0x584] sm:$0xf]  ;;  %v8046_v38 = vpack.c.b16 %v672_v15, %v672_v15 }
  0x8b   :  { %v7498_v41 = vld [vmem:[#allocation5 + $0xa9c] sm:$0xf0]  ;;  %v5530_v37 = vld [vmem:[#allocation5 + $0x5a0] sm:$0xf0] }
  0x8c   :  { %v6424_v42 = vld [vmem:[#allocation5 + $0xc80] sm:$0xf]  ;;  %v6169_v47 = vor.u32 %v7498_v41, %v6168_v39  ;;  %3307 = vmatpush.bf16.msrb.mxu0 %v5913_v46  ;;  %v7398_v39 = vld [vmem:[#allocation5 + $0x784] sm:$0xf]  ;;  %v8048_v41 = vpack.c.b16 %v670_v24, %v670_v24  ;;  %v5533_v46 = vor.u32 %v7334_v36, %v5530_v37 }
  0x8d   :  { %v7562_v43 = vld [vmem:[#allocation5 + $0xc9c] sm:$0xf0]  ;;  %v5786_v40 = vld [vmem:[#allocation5 + $0x7a0] sm:$0xf0] }
  0x8e   :  { %v6680_v44 = vld [vmem:[#allocation5 + $0xe80] sm:$0xf]  ;;  %v6425_v48 = vor.u32 %v7562_v43, %v6424_v42  ;;  %3320 = vmatpush.bf16.msrb.mxu1 %v6169_v47  ;;  %v8050_v42 = vpack.c.b16 %v673_v25, %v673_v25  ;;  %v5021_v43 = vor.u32 %v7206_v31, %v5018_v32  ;;  %v7198_v47 = vld [vmem:[#allocation5 + $0x144] sm:$0xf] }
  0x8f   :  { %v7626_v45 = vld [vmem:[#allocation5 + $0xe9c] sm:$0xf0]  ;;  %v7310_v12 = vld [vmem:[#allocation5 + $0x4c4] sm:$0xf] }
  0x90   :  { %v5880_v49 = vld [vmem:[#allocation5 + $0x840] sm:$0xf]  ;;  %v6681_v52 = vor.u32 %v7626_v45, %v6680_v44  ;;  %3333 = vmatpush.bf16.msrb.mxu2 %v6425_v48  ;;  %v8052_v44 = vpack.c.b16 %v671_v28, %v671_v28  ;;  %v5277_v45 = vor.u32 %v7270_v33, %v5274_v35  ;;  %v4986_v48 = vld [vmem:[#allocation5 + $0x160] sm:$0xf0] }
  0x91   :  { %v7426_v50 = vld [vmem:[#allocation5 + $0x85c] sm:$0xf0]  ;;  %v5434_v13 = vld [vmem:[#allocation5 + $0x4e0] sm:$0xf0] }
  0x92   :  { %v6136_v51 = vld [vmem:[#allocation5 + $0xa40] sm:$0xf]  ;;  %v5881_v59 = vor.u32 %v7426_v50, %v5880_v49  ;;  %3346 = vmatpush.bf16.msrb.mxu3 %v6681_v52  ;;  %v7262_v49 = vld [vmem:[#allocation5 + $0x344] sm:$0xf]  ;;  %v5789_v50 = vor.u32 %v7398_v39, %v5786_v40  ;;  %v5437_v21 = vor.u32 %v7310_v12, %v5434_v13 }
  0x93   :  { %v7490_v53 = vld [vmem:[#allocation5 + $0xa5c] sm:$0xf0]  ;;  %v7326_v52 = vld [vmem:[#allocation5 + $0x544] sm:$0xf] }
  0x94   :  { %v6392_v54 = vld [vmem:[#allocation5 + $0xc40] sm:$0xf]  ;;  %v6137_v63 = vor.u32 %v7490_v53, %v6136_v51  ;;  %3308 = vmatpush.bf16.msrb.mxu0 %v5881_v59  ;;  %v5242_v51 = vld [vmem:[#allocation5 + $0x360] sm:$0xf0] }
  0x95   :  { %v7554_v55 = vld [vmem:[#allocation5 + $0xc5c] sm:$0xf0]  ;;  %v5498_v53 = vld [vmem:[#allocation5 + $0x560] sm:$0xf0] }
  0x96   :  { %v6648_v56 = vld [vmem:[#allocation5 + $0xe40] sm:$0xf]  ;;  %v6393_v0 = vor.u32 %v7554_v55, %v6392_v54  ;;  %3321 = vmatpush.bf16.msrb.mxu1 %v6137_v63  ;;  %v7390_v54 = vld [vmem:[#allocation5 + $0x744] sm:$0xf] }
  0x97   :  { %v7618_v57 = vld [vmem:[#allocation5 + $0xe5c] sm:$0xf0]  ;;  %v5754_v55 = vld [vmem:[#allocation5 + $0x760] sm:$0xf0] }
  0x98   :  { %v5848_v58 = vld [vmem:[#allocation5 + $0x800] sm:$0xf]  ;;  %v6649_v4 = vor.u32 %v7618_v57, %v6648_v56  ;;  %3334 = vmatpush.bf16.msrb.mxu2 %v6393_v0  ;;  %v4989_v56 = vor.u32 %v7198_v47, %v4986_v48  ;;  %v5245_v57 = vor.u32 %v7262_v49, %v5242_v51  ;;  %v7190_v59 = vld [vmem:[#allocation5 + $0x104] sm:$0xf] }
  0x99   :  { %v7418_v60 = vld [vmem:[#allocation5 + $0x81c] sm:$0xf0]  ;;  %v5210_v63 = vld [vmem:[#allocation5 + $0x320] sm:$0xf0] }
  0x9a   :  { %v6104_v61 = vld [vmem:[#allocation5 + $0xa00] sm:$0xf]  ;;  %v5849_v11 = vor.u32 %v7418_v60, %v5848_v58  ;;  %3347 = vmatpush.bf16.msrb.mxu3 %v6649_v4  ;;  %v5501_v58 = vor.u32 %v7326_v52, %v5498_v53  ;;  %v4954_v60 = vld [vmem:[#allocation5 + $0x120] sm:$0xf0] }
  0x9b   :  { %v7482_v62 = vld [vmem:[#allocation5 + $0xa1c] sm:$0xf0]  ;;  %v7318_v0 = vld [vmem:[#allocation5 + $0x504] sm:$0xf]  ;;  %v4957_v4 = vor.u32 %v7190_v59, %v4954_v60 }
  0x9c   :  { %v6360_v1 = vld [vmem:[#allocation5 + $0xc00] sm:$0xf]  ;;  %v6105_v16 = vor.u32 %v7482_v62, %v6104_v61  ;;  %3309 = vmatpush.bf16.msrb.mxu0 %v5849_v11  ;;  %v7254_v61 = vld [vmem:[#allocation5 + $0x304] sm:$0xf]  ;;  %v5757_v62 = vor.u32 %v7390_v54, %v5754_v55 }
  0x9d   :  { %v7546_v2 = vld [vmem:[#allocation5 + $0xc1c] sm:$0xf0]  ;;  %v5178_v11 = vld [vmem:[#allocation5 + $0x2e0] sm:$0xf0] }
  0x9e   :  { %v6616_v5 = vld [vmem:[#allocation5 + $0xe00] sm:$0xf]  ;;  %v6361_v17 = vor.u32 %v7546_v2, %v6360_v1  ;;  %3322 = vmatpush.bf16.msrb.mxu1 %v6105_v16  ;;  %v5466_v1 = vld [vmem:[#allocation5 + $0x520] sm:$0xf0]  ;;  %v4925_v16 = vor.u32 %v7182_v7, %v4922_v8 }
  0x9f   :  { %v7610_v6 = vld [vmem:[#allocation5 + $0xe1c] sm:$0xf0]  ;;  %3310 = vmatmul.bf16.vlgmr.msrb.gmra.mxu0 %v8048_v41  ;;  %v7382_v2 = vld [vmem:[#allocation5 + $0x704] sm:$0xf] }
  0xa0   :  { %v6617_v26 = vor.u32 %v7610_v6, %v6616_v5  ;;  %3335 = vmatpush.bf16.msrb.mxu2 %v6361_v17  ;;  %3354 = vmatpush.bf16.msra.mxu0 %v5053_v27  ;;  %v5213_v5 = vor.u32 %v7254_v61, %v5210_v63  ;;  %v5469_v6 = vor.u32 %v7318_v0, %v5466_v1  ;;  %v7374_v14 = vld [vmem:[#allocation5 + $0x6c4] sm:$0xf] }
  0xa1   :  { %3323 = vmatmul.bf16.vlgmr.msrb.gmra.mxu1 %v8052_v44  ;;  %v5725_v10 = vor.u32 %v7382_v2, %v5722_v3  ;;  %v5690_v15 = vld [vmem:[#allocation5 + $0x6e0] sm:$0xf0]  ;;  %v5181_v17 = vor.u32 %v7246_v9, %v5178_v11 }
  0xa2   :  { %3348 = vmatpush.bf16.msrb.mxu3 %v6617_v26  ;;  %3367 = vmatpush.bf16.msra.mxu1 %v5309_v29  ;;  %v7174_v23 = vld [vmem:[#allocation5 + $0x84] sm:$0xf]  ;;  %v5693_v26 = vor.u32 %v7374_v14, %v5690_v15 }
  0xa3   :  { %3336 = vmatmul.bf16.vlgmr.msrb.gmra.mxu2 %v8046_v38  ;;  %v4890_v24 = vld [vmem:[#allocation5 + $0xa0] sm:$0xf0] }
  0xa4   :  { %3380 = vmatpush.bf16.msra.mxu2 %v5565_v30  ;;  %3355 = vmatpush.bf16.msra.mxu0 %v5021_v43  ;;  %v7238_v25 = vld [vmem:[#allocation5 + $0x284] sm:$0xf]  ;;  %v4893_v32 = vor.u32 %v7174_v23, %v4890_v24 }
  0xa5   :  { %3349 = vmatmul.bf16.vlgmr.msrb.gmra.mxu3 %v8050_v42  ;;  %v5146_v27 = vld [vmem:[#allocation5 + $0x2a0] sm:$0xf0] }
  0xa6   :  { %3393 = vmatpush.bf16.msra.mxu3 %v5821_v34  ;;  %3368 = vmatpush.bf16.msra.mxu1 %v5277_v45  ;;  %v7302_v28 = vld [vmem:[#allocation5 + $0x484] sm:$0xf]  ;;  %v5149_v33 = vor.u32 %v7238_v25, %v5146_v27 }
  0xa7   :  { %v5402_v29 = vld [vmem:[#allocation5 + $0x4a0] sm:$0xf0] }
  0xa8   :  { %3381 = vmatpush.bf16.msra.mxu2 %v5533_v46  ;;  %3356 = vmatpush.bf16.msra.mxu0 %v4989_v56  ;;  %v7366_v30 = vld [vmem:[#allocation5 + $0x684] sm:$0xf]  ;;  %v5405_v34 = vor.u32 %v7302_v28, %v5402_v29 }
  0xa9   :  { %v5658_v31 = vld [vmem:[#allocation5 + $0x6a0] sm:$0xf0] }
  0xaa   :  { %3394 = vmatpush.bf16.msra.mxu3 %v5789_v50  ;;  %3369 = vmatpush.bf16.msra.mxu1 %v5245_v57  ;;  %v7166_v35 = vld [vmem:[#allocation5 + $0x44] sm:$0xf]  ;;  %v5661_v39 = vor.u32 %v7366_v30, %v5658_v31 }
  0xab   :  { %v4858_v36 = vld [vmem:[#allocation5 + $0x60] sm:$0xf0] }
  0xac   :  { %3382 = vmatpush.bf16.msra.mxu2 %v5501_v58  ;;  %3357 = vmatpush.bf16.msra.mxu0 %v4957_v4  ;;  %v7230_v37 = vld [vmem:[#allocation5 + $0x244] sm:$0xf]  ;;  %v4861_v48 = vor.u32 %v7166_v35, %v4858_v36 }
  0xad   :  { %v5114_v40 = vld [vmem:[#allocation5 + $0x260] sm:$0xf0] }
  0xae   :  { %3395 = vmatpush.bf16.msra.mxu3 %v5757_v62  ;;  %3370 = vmatpush.bf16.msra.mxu1 %v5213_v5  ;;  %v7294_v43 = vld [vmem:[#allocation5 + $0x444] sm:$0xf]  ;;  %v5117_v51 = vor.u32 %v7230_v37, %v5114_v40 }
  0xaf   :  { %v5370_v45 = vld [vmem:[#allocation5 + $0x460] sm:$0xf0] }
  0xb0   :  { %3383 = vmatpush.bf16.msra.mxu2 %v5469_v6  ;;  %3358 = vmatpush.bf16.msra.mxu0 %v4925_v16  ;;  %v7358_v46 = vld [vmem:[#allocation5 + $0x644] sm:$0xf]  ;;  %v5373_v52 = vor.u32 %v7294_v43, %v5370_v45 }
  0xb1   :  { %v5626_v47 = vld [vmem:[#allocation5 + $0x660] sm:$0xf0] }
  0xb2   :  { %3396 = vmatpush.bf16.msra.mxu3 %v5725_v10  ;;  %3371 = vmatpush.bf16.msra.mxu1 %v5181_v17  ;;  %v7158_v49 = vld [vmem:[#allocation5 + $0x4] sm:$0xf]  ;;  %v5629_v56 = vor.u32 %v7358_v46, %v5626_v47 }
  0xb3   :  { %v4826_v50 = vld [vmem:[#allocation5 + $0x20] sm:$0xf0] }
  0xb4   :  { %3384 = vmatpush.bf16.msra.mxu2 %v5437_v21  ;;  %3359 = vmatpush.bf16.msra.mxu0 %v4893_v32  ;;  %v7222_v53 = vld [vmem:[#allocation5 + $0x204] sm:$0xf]  ;;  %v4829_v63 = vor.u32 %v7158_v49, %v4826_v50 }
  0xb5   :  { %v5082_v54 = vld [vmem:[#allocation5 + $0x220] sm:$0xf0] }
  0xb6   :  { %3397 = vmatpush.bf16.msra.mxu3 %v5693_v26  ;;  %3372 = vmatpush.bf16.msra.mxu1 %v5149_v33  ;;  %v7286_v55 = vld [vmem:[#allocation5 + $0x404] sm:$0xf]  ;;  %v5085_v3 = vor.u32 %v7222_v53, %v5082_v54 }
  0xb7   :  { %v5338_v57 = vld [vmem:[#allocation5 + $0x420] sm:$0xf0] }
  0xb8   :  { %3385 = vmatpush.bf16.msra.mxu2 %v5405_v34  ;;  %v7350_v58 = vld [vmem:[#allocation5 + $0x604] sm:$0xf]  ;;  %3360 = vmatpush.bf16.msra.mxu0 %v4861_v48  ;;  %v5341_v4 = vor.u32 %v7286_v55, %v5338_v57 }
  0xb9   :  { %v5594_v59 = vld [vmem:[#allocation5 + $0x620] sm:$0xf0] }
  0xba   :  { %3398 = vmatpush.bf16.msra.mxu3 %v5661_v39  ;;  %v7470_v60 = vld [vmem:[#allocation5 + $0x9c4] sm:$0xf]  ;;  %3373 = vmatpush.bf16.msra.mxu1 %v5117_v51  ;;  %v5597_v7 = vor.u32 %v7350_v58, %v5594_v59 }
  0xbb   :  { %v6074_v61 = vld [vmem:[#allocation5 + $0x9e0] sm:$0xf0] }
  0xbc   :  { %v7534_v62 = vld [vmem:[#allocation5 + $0xbc4] sm:$0xf]  ;;  %3386 = vmatpush.bf16.msra.mxu2 %v5373_v52  ;;  %v6077_v8 = vor.u32 %v7470_v60, %v6074_v61  ;;  %3361 = vmatpush.bf16.msra.mxu0 %v4829_v63 }
  0xbd   :  { %v6330_v0 = vld [vmem:[#allocation5 + $0xbe0] sm:$0xf0] }
  0xbe   :  { %v7598_v1 = vld [vmem:[#allocation5 + $0xdc4] sm:$0xf]  ;;  %3399 = vmatpush.bf16.msra.mxu3 %v5629_v56  ;;  %v6333_v9 = vor.u32 %v7534_v62, %v6330_v0  ;;  %3374 = vmatpush.bf16.msra.mxu1 %v5085_v3 }
  0xbf   :  { %v6586_v2 = vld [vmem:[#allocation5 + $0xde0] sm:$0xf0]  ;;  %3362 = vmatmul.bf16.vlgmr.msra.gmra.mxu0 %v8036_v19 }
  0xc0   :  { %v7662_v5 = vld [vmem:[#allocation5 + $0xfc4] sm:$0xf]  ;;  %v6589_v10 = vor.u32 %v7598_v1, %v6586_v2  ;;  %3387 = vmatpush.bf16.msra.mxu2 %v5341_v4  ;;  %3406 = vmatpush.bf16.msrb.mxu0 %v6077_v8 }
  0xc1   :  { %v6842_v6 = vld [vmem:[#allocation5 + $0xfe0] sm:$0xf0]  ;;  %3375 = vmatmul.bf16.vlgmr.msra.gmra.mxu1 %v8040_v22 }
  0xc2   :  { %v7462_v11 = vld [vmem:[#allocation5 + $0x984] sm:$0xf]  ;;  %v6845_v14 = vor.u32 %v7662_v5, %v6842_v6  ;;  %3400 = vmatpush.bf16.msra.mxu3 %v5597_v7  ;;  %3419 = vmatpush.bf16.msrb.mxu1 %v6333_v9 }
  0xc3   :  { %v6042_v12 = vld [vmem:[#allocation5 + $0x9a0] sm:$0xf0]  ;;  %3388 = vmatmul.bf16.vlgmr.msra.gmra.mxu2 %v8034_v18 }
  0xc4   :  { %v7526_v13 = vld [vmem:[#allocation5 + $0xb84] sm:$0xf]  ;;  %v6045_v24 = vor.u32 %v7462_v11, %v6042_v12  ;;  %3432 = vmatpush.bf16.msrb.mxu2 %v6589_v10 }
  0xc5   :  { %v6298_v15 = vld [vmem:[#allocation5 + $0xba0] sm:$0xf0]  ;;  %3401 = vmatmul.bf16.vlgmr.msra.gmra.mxu3 %v8038_v20 }
  0xc6   :  { %v7590_v16 = vld [vmem:[#allocation5 + $0xd84] sm:$0xf]  ;;  %v6301_v25 = vor.u32 %v7526_v13, %v6298_v15  ;;  %3445 = vmatpush.bf16.msrb.mxu3 %v6845_v14  ;;  %3407 = vmatpush.bf16.msrb.mxu0 %v6045_v24 }
  0xc7   :  { %v6554_v17 = vld [vmem:[#allocation5 + $0xda0] sm:$0xf0] }
  0xc8   :  { %v7654_v21 = vld [vmem:[#allocation5 + $0xf84] sm:$0xf]  ;;  %v6557_v26 = vor.u32 %v7590_v16, %v6554_v17  ;;  %3420 = vmatpush.bf16.msrb.mxu1 %v6301_v25 }
  0xc9   :  { %v6810_v23 = vld [vmem:[#allocation5 + $0xfa0] sm:$0xf0] }
  0xca   :  { %v7454_v27 = vld [vmem:[#allocation5 + $0x944] sm:$0xf]  ;;  %v6813_v30 = vor.u32 %v7654_v21, %v6810_v23  ;;  %3433 = vmatpush.bf16.msrb.mxu2 %v6557_v26 }
  0xcb   :  { %v6010_v28 = vld [vmem:[#allocation5 + $0x960] sm:$0xf0] }
  0xcc   :  { %v7518_v29 = vld [vmem:[#allocation5 + $0xb44] sm:$0xf]  ;;  %v6013_v36 = vor.u32 %v7454_v27, %v6010_v28  ;;  %3446 = vmatpush.bf16.msrb.mxu3 %v6813_v30 }
  0xcd   :  { %v6266_v31 = vld [vmem:[#allocation5 + $0xb60] sm:$0xf0] }
  0xce   :  { %v7582_v32 = vld [vmem:[#allocation5 + $0xd44] sm:$0xf]  ;;  %v6269_v37 = vor.u32 %v7518_v29, %v6266_v31  ;;  %3408 = vmatpush.bf16.msrb.mxu0 %v6013_v36 }
  0xcf   :  { %v6522_v33 = vld [vmem:[#allocation5 + $0xd60] sm:$0xf0] }
  0xd0   :  { %v7646_v34 = vld [vmem:[#allocation5 + $0xf44] sm:$0xf]  ;;  %v6525_v39 = vor.u32 %v7582_v32, %v6522_v33  ;;  %3421 = vmatpush.bf16.msrb.mxu1 %v6269_v37 }
  0xd1   :  { %v6778_v35 = vld [vmem:[#allocation5 + $0xf60] sm:$0xf0] }
  0xd2   :  { %v7446_v40 = vld [vmem:[#allocation5 + $0x904] sm:$0xf]  ;;  %v6781_v46 = vor.u32 %v7646_v34, %v6778_v35  ;;  %3434 = vmatpush.bf16.msrb.mxu2 %v6525_v39 }
  0xd3   :  { %v5978_v43 = vld [vmem:[#allocation5 + $0x920] sm:$0xf0] }
  0xd4   :  { %v7510_v45 = vld [vmem:[#allocation5 + $0xb04] sm:$0xf]  ;;  %v5981_v52 = vor.u32 %v7446_v40, %v5978_v43  ;;  %3447 = vmatpush.bf16.msrb.mxu3 %v6781_v46  ;;  %v5056_v43 = vld [vmem:[#allocation5 + $0x1c8] sm:$0xf] }
  0xd5   :  { %v6234_v47 = vld [vmem:[#allocation5 + $0xb20] sm:$0xf0]  ;;  %v5312_v46 = vld [vmem:[#allocation5 + $0x3c8] sm:$0xf] }
  0xd6   :  { %v7574_v48 = vld [vmem:[#allocation5 + $0xd04] sm:$0xf]  ;;  %v6237_v53 = vor.u32 %v7510_v45, %v6234_v47  ;;  %3409 = vmatpush.bf16.msrb.mxu0 %v5981_v52  ;;  %v7219_v45 = vld [vmem:[#allocation5 + $0x1e4] sm:$0xf0] }
  0xd7   :  { %v6490_v49 = vld [vmem:[#allocation5 + $0xd20] sm:$0xf0] }
  0xd8   :  { %v7638_v50 = vld [vmem:[#allocation5 + $0xf04] sm:$0xf]  ;;  %v6493_v54 = vor.u32 %v7574_v48, %v6490_v49  ;;  %3422 = vmatpush.bf16.msrb.mxu1 %v6237_v53  ;;  %v7283_v48 = vld [vmem:[#allocation5 + $0x3e4] sm:$0xf0] }
  0xd9   :  { %v6746_v51 = vld [vmem:[#allocation5 + $0xf20] sm:$0xf0]  ;;  %v5568_v49 = vld [vmem:[#allocation5 + $0x5c8] sm:$0xf] }
  0xda   :  { %v7438_v55 = vld [vmem:[#allocation5 + $0x8c4] sm:$0xf]  ;;  %v6749_v58 = vor.u32 %v7638_v50, %v6746_v51  ;;  %3435 = vmatpush.bf16.msrb.mxu2 %v6493_v54  ;;  %v7347_v50 = vld [vmem:[#allocation5 + $0x5e4] sm:$0xf0] }
  0xdb   :  { %v5946_v56 = vld [vmem:[#allocation5 + $0x8e0] sm:$0xf0]  ;;  %v5824_v53 = vld [vmem:[#allocation5 + $0x7c8] sm:$0xf] }
  0xdc   :  { %v7502_v57 = vld [vmem:[#allocation5 + $0xac4] sm:$0xf]  ;;  %v5949_v0 = vor.u32 %v7438_v55, %v5946_v56  ;;  %3448 = vmatpush.bf16.msrb.mxu3 %v6749_v58  ;;  %v7411_v54 = vld [vmem:[#allocation5 + $0x7e4] sm:$0xf0]  ;;  %v5057_v56 = vor.u32 %v7219_v45, %v5056_v43  ;;  %v5569_v58 = vor.u32 %v7347_v50, %v5568_v49 }
  0xdd   :  { %v6202_v59 = vld [vmem:[#allocation5 + $0xae0] sm:$0xf0]  ;;  %v5440_v43 = vld [vmem:[#allocation5 + $0x4c8] sm:$0xf] }
  0xde   :  { %v7566_v60 = vld [vmem:[#allocation5 + $0xcc4] sm:$0xf]  ;;  %v6205_v1 = vor.u32 %v7502_v57, %v6202_v59  ;;  %3410 = vmatpush.bf16.msrb.mxu0 %v5949_v0  ;;  %v5313_v57 = vor.u32 %v7283_v48, %v5312_v46  ;;  %v5024_v59 = vld [vmem:[#allocation5 + $0x188] sm:$0xf] }
  0xdf   :  { %v6458_v61 = vld [vmem:[#allocation5 + $0xce0] sm:$0xf0]  ;;  %v5536_v0 = vld [vmem:[#allocation5 + $0x588] sm:$0xf] }
  0xe0   :  { %v7630_v62 = vld [vmem:[#allocation5 + $0xec4] sm:$0xf]  ;;  %v6461_v2 = vor.u32 %v7566_v60, %v6458_v61  ;;  %3423 = vmatpush.bf16.msrb.mxu1 %v6205_v1  ;;  %v7211_v60 = vld [vmem:[#allocation5 + $0x1a4] sm:$0xf0] }
  0xe1   :  { %v6714_v63 = vld [vmem:[#allocation5 + $0xee0] sm:$0xf0]  ;;  %v5280_v61 = vld [vmem:[#allocation5 + $0x388] sm:$0xf] }
  0xe2   :  { %v7430_v3 = vld [vmem:[#allocation5 + $0x884] sm:$0xf]  ;;  %v6717_v6 = vor.u32 %v7630_v62, %v6714_v63  ;;  %3436 = vmatpush.bf16.msrb.mxu2 %v6461_v2  ;;  %v5825_v62 = vor.u32 %v7411_v54, %v5824_v53  ;;  %v7275_v63 = vld [vmem:[#allocation5 + $0x3a4] sm:$0xf0] }
  0xe3   :  { %v5914_v4 = vld [vmem:[#allocation5 + $0x8a0] sm:$0xf0]  ;;  %v7339_v1 = vld [vmem:[#allocation5 + $0x5a4] sm:$0xf0] }
  0xe4   :  { %v7494_v5 = vld [vmem:[#allocation5 + $0xa84] sm:$0xf]  ;;  %v5917_v12 = vor.u32 %v7430_v3, %v5914_v4  ;;  %3449 = vmatpush.bf16.msrb.mxu3 %v6717_v6  ;;  %v5792_v2 = vld [vmem:[#allocation5 + $0x788] sm:$0xf]  ;;  %v5025_v4 = vor.u32 %v7211_v60, %v5024_v59  ;;  %v5537_v6 = vor.u32 %v7339_v1, %v5536_v0 }
  0xe5   :  { %v6170_v7 = vld [vmem:[#allocation5 + $0xaa0] sm:$0xf0]  ;;  %v7403_v3 = vld [vmem:[#allocation5 + $0x7a4] sm:$0xf0] }
  0xe6   :  { %v7558_v8 = vld [vmem:[#allocation5 + $0xc84] sm:$0xf]  ;;  %v6173_v13 = vor.u32 %v7494_v5, %v6170_v7  ;;  %3411 = vmatpush.bf16.msrb.mxu0 %v5917_v12  ;;  %v5281_v5 = vor.u32 %v7275_v63, %v5280_v61  ;;  %v4992_v7 = vld [vmem:[#allocation5 + $0x148] sm:$0xf] }
  0xe7   :  { %v6426_v9 = vld [vmem:[#allocation5 + $0xca0] sm:$0xf0]  ;;  %v5504_v12 = vld [vmem:[#allocation5 + $0x548] sm:$0xf] }
  0xe8   :  { %v7622_v10 = vld [vmem:[#allocation5 + $0xe84] sm:$0xf]  ;;  %v6429_v14 = vor.u32 %v7558_v8, %v6426_v9  ;;  %3424 = vmatpush.bf16.msrb.mxu1 %v6173_v13  ;;  %v7203_v8 = vld [vmem:[#allocation5 + $0x164] sm:$0xf0] }
  0xe9   :  { %v6682_v11 = vld [vmem:[#allocation5 + $0xea0] sm:$0xf0]  ;;  %v5248_v9 = vld [vmem:[#allocation5 + $0x348] sm:$0xf] }
  0xea   :  { %v7422_v15 = vld [vmem:[#allocation5 + $0x844] sm:$0xf]  ;;  %v6685_v21 = vor.u32 %v7622_v10, %v6682_v11  ;;  %3437 = vmatpush.bf16.msrb.mxu2 %v6429_v14  ;;  %v5793_v10 = vor.u32 %v7403_v3, %v5792_v2  ;;  %v7267_v11 = vld [vmem:[#allocation5 + $0x364] sm:$0xf0] }
  0xeb   :  { %v5882_v16 = vld [vmem:[#allocation5 + $0x860] sm:$0xf0]  ;;  %v7331_v13 = vld [vmem:[#allocation5 + $0x564] sm:$0xf0] }
  0xec   :  { %v7486_v17 = vld [vmem:[#allocation5 + $0xa44] sm:$0xf]  ;;  %v5885_v28 = vor.u32 %v7422_v15, %v5882_v16  ;;  %3450 = vmatpush.bf16.msrb.mxu3 %v6685_v21  ;;  %v5760_v14 = vld [vmem:[#allocation5 + $0x748] sm:$0xf]  ;;  %v4993_v16 = vor.u32 %v7203_v8, %v4992_v7  ;;  %v5505_v21 = vor.u32 %v7331_v13, %v5504_v12 }
  0xed   :  { %v6138_v23 = vld [vmem:[#allocation5 + $0xa60] sm:$0xf0]  ;;  %v7395_v15 = vld [vmem:[#allocation5 + $0x764] sm:$0xf0] }
  0xee   :  { %v7550_v24 = vld [vmem:[#allocation5 + $0xc44] sm:$0xf]  ;;  %v6141_v31 = vor.u32 %v7486_v17, %v6138_v23  ;;  %3412 = vmatpush.bf16.msrb.mxu0 %v5885_v28  ;;  %v5249_v17 = vor.u32 %v7267_v11, %v5248_v9  ;;  %v4960_v23 = vld [vmem:[#allocation5 + $0x108] sm:$0xf] }
  0xef   :  { %v6394_v25 = vld [vmem:[#allocation5 + $0xc60] sm:$0xf0]  ;;  %v5472_v28 = vld [vmem:[#allocation5 + $0x508] sm:$0xf] }
  0xf0   :  { %v7614_v26 = vld [vmem:[#allocation5 + $0xe44] sm:$0xf]  ;;  %v6397_v32 = vor.u32 %v7550_v24, %v6394_v25  ;;  %3425 = vmatpush.bf16.msrb.mxu1 %v6141_v31  ;;  %v7195_v24 = vld [vmem:[#allocation5 + $0x124] sm:$0xf0] }
  0xf1   :  { %v6650_v27 = vld [vmem:[#allocation5 + $0xe60] sm:$0xf0]  ;;  %v5216_v25 = vld [vmem:[#allocation5 + $0x308] sm:$0xf] }
  0xf2   :  { %v7414_v29 = vld [vmem:[#allocation5 + $0x804] sm:$0xf]  ;;  %v6653_v36 = vor.u32 %v7614_v26, %v6650_v27  ;;  %3438 = vmatpush.bf16.msrb.mxu2 %v6397_v32  ;;  %v5761_v26 = vor.u32 %v7395_v15, %v5760_v14  ;;  %v7259_v27 = vld [vmem:[#allocation5 + $0x324] sm:$0xf0]  ;;  %v4961_v32 = vor.u32 %v7195_v24, %v4960_v23 }
  0xf3   :  { %v5850_v30 = vld [vmem:[#allocation5 + $0x820] sm:$0xf0]  ;;  %v7387_v31 = vld [vmem:[#allocation5 + $0x724] sm:$0xf0] }
  0xf4   :  { %v7478_v33 = vld [vmem:[#allocation5 + $0xa04] sm:$0xf]  ;;  %v5853_v47 = vor.u32 %v7414_v29, %v5850_v30  ;;  %3451 = vmatpush.bf16.msrb.mxu3 %v6653_v36  ;;  %v7323_v29 = vld [vmem:[#allocation5 + $0x524] sm:$0xf0] }
  0xf5   :  { %v6106_v34 = vld [vmem:[#allocation5 + $0xa20] sm:$0xf0]  ;;  %v5728_v30 = vld [vmem:[#allocation5 + $0x708] sm:$0xf] }
  0xf6   :  { %v7542_v35 = vld [vmem:[#allocation5 + $0xc04] sm:$0xf]  ;;  %v6109_v51 = vor.u32 %v7478_v33, %v6106_v34  ;;  %3413 = vmatpush.bf16.msrb.mxu0 %v5853_v47  ;;  %v5217_v33 = vor.u32 %v7259_v27, %v5216_v25  ;;  %v5473_v34 = vor.u32 %v7323_v29, %v5472_v28  ;;  %v7187_v36 = vld [vmem:[#allocation5 + $0xe4] sm:$0xf0] }
  0xf7   :  { %v6362_v37 = vld [vmem:[#allocation5 + $0xc20] sm:$0xf0]  ;;  %v7315_v45 = vld [vmem:[#allocation5 + $0x4e4] sm:$0xf0] }
  0xf8   :  { %v7606_v39 = vld [vmem:[#allocation5 + $0xe04] sm:$0xf]  ;;  %v6365_v52 = vor.u32 %v7542_v35, %v6362_v37  ;;  %3426 = vmatpush.bf16.msrb.mxu1 %v6109_v51  ;;  %v4928_v35 = vld [vmem:[#allocation5 + $0xc8] sm:$0xf]  ;;  %v5441_v50 = vor.u32 %v7315_v45, %v5440_v43 }
  0xf9   :  { %v6618_v40 = vld [vmem:[#allocation5 + $0xe20] sm:$0xf0]  ;;  %3414 = vmatmul.bf16.vlgmr.msrb.gmra.mxu0 %v8048_v41  ;;  %v5184_v37 = vld [vmem:[#allocation5 + $0x2c8] sm:$0xf]  ;;  %v4929_v48 = vor.u32 %v7187_v36, %v4928_v35 }
  0xfa   :  { %v6621_v55 = vor.u32 %v7606_v39, %v6618_v40  ;;  %3439 = vmatpush.bf16.msrb.mxu2 %v6365_v52  ;;  %3458 = vmatpush.bf16.msra.mxu0 %v5057_v56  ;;  %v5729_v39 = vor.u32 %v7387_v31, %v5728_v30  ;;  %v7251_v40 = vld [vmem:[#allocation5 + $0x2e4] sm:$0xf0] }
  0xfb   :  { %3427 = vmatmul.bf16.vlgmr.msrb.gmra.mxu1 %v8052_v44  ;;  %v5696_v46 = vld [vmem:[#allocation5 + $0x6c8] sm:$0xf]  ;;  %v5185_v49 = vor.u32 %v7251_v40, %v5184_v37 }
  0xfc   :  { %3452 = vmatpush.bf16.msrb.mxu3 %v6621_v55  ;;  %3471 = vmatpush.bf16.msra.mxu1 %v5313_v57  ;;  %v7379_v47 = vld [vmem:[#allocation5 + $0x6e4] sm:$0xf0] }
  0xfd   :  { %3440 = vmatmul.bf16.vlgmr.msrb.gmra.mxu2 %v8046_v38  ;;  %v4896_v51 = vld [vmem:[#allocation5 + $0x88] sm:$0xf]  ;;  %v5697_v54 = vor.u32 %v7379_v47, %v5696_v46 }
  0xfe   :  { %3484 = vmatpush.bf16.msra.mxu2 %v5569_v58  ;;  %3459 = vmatpush.bf16.msra.mxu0 %v5025_v4  ;;  %v7179_v52 = vld [vmem:[#allocation5 + $0xa4] sm:$0xf0] }
  0xff   :  { %3453 = vmatmul.bf16.vlgmr.msrb.gmra.mxu3 %v8050_v42  ;;  %v5152_v53 = vld [vmem:[#allocation5 + $0x288] sm:$0xf]  ;;  %v4897_v60 = vor.u32 %v7179_v52, %v4896_v51 }
 0x100   :  { %3497 = vmatpush.bf16.msra.mxu3 %v5825_v62  ;;  %3472 = vmatpush.bf16.msra.mxu1 %v5281_v5  ;;  %v7243_v55 = vld [vmem:[#allocation5 + $0x2a4] sm:$0xf0] }
 0x101   :  { %v5408_v56 = vld [vmem:[#allocation5 + $0x488] sm:$0xf]  ;;  %v5153_v61 = vor.u32 %v7243_v55, %v5152_v53 }
 0x102   :  { %3485 = vmatpush.bf16.msra.mxu2 %v5537_v6  ;;  %3460 = vmatpush.bf16.msra.mxu0 %v4993_v16  ;;  %v7307_v57 = vld [vmem:[#allocation5 + $0x4a4] sm:$0xf0] }
 0x103   :  { %v5664_v58 = vld [vmem:[#allocation5 + $0x688] sm:$0xf]  ;;  %v5409_v62 = vor.u32 %v7307_v57, %v5408_v56 }
 0x104   :  { %3498 = vmatpush.bf16.msra.mxu3 %v5793_v10  ;;  %3473 = vmatpush.bf16.msra.mxu1 %v5249_v17  ;;  %v7371_v59 = vld [vmem:[#allocation5 + $0x6a4] sm:$0xf0] }
 0x105   :  { %v4864_v63 = vld [vmem:[#allocation5 + $0x48] sm:$0xf]  ;;  %v5665_v2 = vor.u32 %v7371_v59, %v5664_v58 }
 0x106   :  { %3486 = vmatpush.bf16.msra.mxu2 %v5505_v21  ;;  %3461 = vmatpush.bf16.msra.mxu0 %v4961_v32  ;;  %v7171_v0 = vld [vmem:[#allocation5 + $0x64] sm:$0xf0] }
 0x107   :  { %v5120_v1 = vld [vmem:[#allocation5 + $0x248] sm:$0xf]  ;;  %v4865_v8 = vor.u32 %v7171_v0, %v4864_v63 }
 0x108   :  { %3499 = vmatpush.bf16.msra.mxu3 %v5761_v26  ;;  %3474 = vmatpush.bf16.msra.mxu1 %v5217_v33  ;;  %v7235_v3 = vld [vmem:[#allocation5 + $0x264] sm:$0xf0] }
 0x109   :  { %v5376_v4 = vld [vmem:[#allocation5 + $0x448] sm:$0xf]  ;;  %v5121_v11 = vor.u32 %v7235_v3, %v5120_v1 }
 0x10a   :  { %3487 = vmatpush.bf16.msra.mxu2 %v5473_v34  ;;  %3462 = vmatpush.bf16.msra.mxu0 %v4929_v48  ;;  %v7299_v5 = vld [vmem:[#allocation5 + $0x464] sm:$0xf0] }
 0x10b   :  { %v5632_v6 = vld [vmem:[#allocation5 + $0x648] sm:$0xf]  ;;  %v5377_v12 = vor.u32 %v7299_v5, %v5376_v4 }
 0x10c   :  { %3500 = vmatpush.bf16.msra.mxu3 %v5729_v39  ;;  %3475 = vmatpush.bf16.msra.mxu1 %v5185_v49  ;;  %v7363_v7 = vld [vmem:[#allocation5 + $0x664] sm:$0xf0] }
 0x10d   :  { %v4832_v9 = vld [vmem:[#allocation5 + $0x8] sm:$0xf]  ;;  %v5633_v16 = vor.u32 %v7363_v7, %v5632_v6 }
 0x10e   :  { %3488 = vmatpush.bf16.msra.mxu2 %v5441_v50  ;;  %3463 = vmatpush.bf16.msra.mxu0 %v4897_v60  ;;  %v7163_v10 = vld [vmem:[#allocation5 + $0x24] sm:$0xf0] }
 0x10f   :  { %v5088_v13 = vld [vmem:[#allocation5 + $0x208] sm:$0xf]  ;;  %v4833_v27 = vor.u32 %v7163_v10, %v4832_v9 }
 0x110   :  { %3501 = vmatpush.bf16.msra.mxu3 %v5697_v54  ;;  %3476 = vmatpush.bf16.msra.mxu1 %v5153_v61  ;;  %v7227_v14 = vld [vmem:[#allocation5 + $0x224] sm:$0xf0] }
 0x111   :  { %v5344_v15 = vld [vmem:[#allocation5 + $0x408] sm:$0xf]  ;;  %v5089_v31 = vor.u32 %v7227_v14, %v5088_v13 }
 0x112   :  { %3489 = vmatpush.bf16.msra.mxu2 %v5409_v62  ;;  %v7291_v17 = vld [vmem:[#allocation5 + $0x424] sm:$0xf0]  ;;  %3464 = vmatpush.bf16.msra.mxu0 %v4865_v8 }
 0x113   :  { %v5600_v21 = vld [vmem:[#allocation5 + $0x608] sm:$0xf]  ;;  %v5345_v32 = vor.u32 %v7291_v17, %v5344_v15 }
 0x114   :  { %3502 = vmatpush.bf16.msra.mxu3 %v5665_v2  ;;  %v7355_v23 = vld [vmem:[#allocation5 + $0x624] sm:$0xf0]  ;;  %3477 = vmatpush.bf16.msra.mxu1 %v5121_v11 }
 0x115   :  { %v6080_v24 = vld [vmem:[#allocation5 + $0x9c8] sm:$0xf]  ;;  %v5601_v35 = vor.u32 %v7355_v23, %v5600_v21 }
 0x116   :  { %v7475_v25 = vld [vmem:[#allocation5 + $0x9e4] sm:$0xf0]  ;;  %3490 = vmatpush.bf16.msra.mxu2 %v5377_v12  ;;  %3465 = vmatpush.bf16.msra.mxu0 %v4833_v27 }
 0x117   :  { %v6336_v26 = vld [vmem:[#allocation5 + $0xbc8] sm:$0xf]  ;;  %v6081_v36 = vor.u32 %v7475_v25, %v6080_v24 }
 0x118   :  { %v7539_v28 = vld [vmem:[#allocation5 + $0xbe4] sm:$0xf0]  ;;  %3503 = vmatpush.bf16.msra.mxu3 %v5633_v16  ;;  %3478 = vmatpush.bf16.msra.mxu1 %v5089_v31 }
 0x119   :  { %v6592_v29 = vld [vmem:[#allocation5 + $0xdc8] sm:$0xf]  ;;  %v6337_v37 = vor.u32 %v7539_v28, %v6336_v26  ;;  %3466 = vmatmul.bf16.vlgmr.msra.gmra.mxu0 %v8036_v19  ;;  %v8070_v26 = vld [vmem:[#allocation7] sm:$0xff] }
 0x11a   :  { %v7603_v30 = vld [vmem:[#allocation5 + $0xde4] sm:$0xf0]  ;;  %3491 = vmatpush.bf16.msra.mxu2 %v5345_v32  ;;  %3510 = vmatpush.bf16.msrb.mxu0 %v6081_v36 }
 0x11b   :  { %v6848_v33 = vld [vmem:[#allocation5 + $0xfc8] sm:$0xf]  ;;  %v6593_v39 = vor.u32 %v7603_v30, %v6592_v29  ;;  %3479 = vmatmul.bf16.vlgmr.msra.gmra.mxu1 %v8040_v22 }
 0x11c   :  { %v7667_v34 = vld [vmem:[#allocation5 + $0xfe4] sm:$0xf0]  ;;  %3504 = vmatpush.bf16.msra.mxu3 %v5601_v35  ;;  %3523 = vmatpush.bf16.msrb.mxu1 %v6337_v37  ;;  %v646_v35 = vperm.slane %v8070_v26, 0 }
 0x11d   :  { %v6048_v40 = vld [vmem:[#allocation5 + $0x988] sm:$0xf]  ;;  %v6849_v46 = vor.u32 %v7667_v34, %v6848_v33  ;;  %3492 = vmatmul.bf16.vlgmr.msra.gmra.mxu2 %v8034_v18 }
 0x11e   :  { %v7467_v43 = vld [vmem:[#allocation5 + $0x9a4] sm:$0xf0]  ;;  %3536 = vmatpush.bf16.msrb.mxu2 %v6593_v39 }
 0x11f   :  { %v6304_v45 = vld [vmem:[#allocation5 + $0xb88] sm:$0xf]  ;;  %v6049_v52 = vor.u32 %v7467_v43, %v6048_v40  ;;  %3505 = vmatmul.bf16.vlgmr.msra.gmra.mxu3 %v8038_v20 }
 0x120   :  { %v7531_v47 = vld [vmem:[#allocation5 + $0xba4] sm:$0xf0]  ;;  %3549 = vmatpush.bf16.msrb.mxu3 %v6849_v46 }
 0x121   :  { %v6560_v48 = vld [vmem:[#allocation5 + $0xd88] sm:$0xf]  ;;  %v6305_v53 = vor.u32 %v7531_v47, %v6304_v45  ;;  %3511 = vmatpush.bf16.msrb.mxu0 %v6049_v52  ;;  %v3259_v47 = vpop.f32.mrf.mxu0 }
 0x122   :  { %v7595_v49 = vld [vmem:[#allocation5 + $0xda4] sm:$0xf0] }
 0x123   :  { %v6816_v50 = vld [vmem:[#allocation5 + $0xf88] sm:$0xf]  ;;  %v6561_v54 = vor.u32 %v7595_v49, %v6560_v48  ;;  %3524 = vmatpush.bf16.msrb.mxu1 %v6305_v53  ;;  %v3260_v53 = vadd.f32 %v3259_v47, %v646_v35  ;;  %v7399_v47 = vld [vmem:[#allocation5 + $0x78c] sm:$0xf] }
 0x124   :  { %v7659_v51 = vld [vmem:[#allocation5 + $0xfa4] sm:$0xf0] }
 0x125   :  { %v6016_v55 = vld [vmem:[#allocation5 + $0x948] sm:$0xf]  ;;  %v6817_v58 = vor.u32 %v7659_v51, %v6816_v50  ;;  %3537 = vmatpush.bf16.msrb.mxu2 %v6561_v54  ;;  %v3272_v54 = vpop.f32.mrf.mxu1 }
 0x126   :  { %v7459_v56 = vld [vmem:[#allocation5 + $0x964] sm:$0xf0] }
 0x127   :  { %v6272_v57 = vld [vmem:[#allocation5 + $0xb48] sm:$0xf]  ;;  %v6017_v0 = vor.u32 %v7459_v56, %v6016_v55  ;;  %3550 = vmatpush.bf16.msrb.mxu3 %v6817_v58 }
 0x128   :  { %v7523_v59 = vld [vmem:[#allocation5 + $0xb64] sm:$0xf0] }
 0x129   :  { %v6528_v60 = vld [vmem:[#allocation5 + $0xd48] sm:$0xf]  ;;  %v6273_v1 = vor.u32 %v7523_v59, %v6272_v57  ;;  %3512 = vmatpush.bf16.msrb.mxu0 %v6017_v0 }
 0x12a   :  { %v7587_v61 = vld [vmem:[#allocation5 + $0xd64] sm:$0xf0] }
 0x12b   :  { %v6784_v62 = vld [vmem:[#allocation5 + $0xf48] sm:$0xf]  ;;  %v6529_v2 = vor.u32 %v7587_v61, %v6528_v60  ;;  %3525 = vmatpush.bf16.msrb.mxu1 %v6273_v1  ;;  %v3273_v61 = vadd.f32 %v3272_v54, %v3260_v53  ;;  %v7199_v54 = vld [vmem:[#allocation5 + $0x14c] sm:$0xf] }
 0x12c   :  { %v7651_v63 = vld [vmem:[#allocation5 + $0xf64] sm:$0xf0] }
 0x12d   :  { %v5984_v3 = vld [vmem:[#allocation5 + $0x908] sm:$0xf]  ;;  %v6785_v6 = vor.u32 %v7651_v63, %v6784_v62  ;;  %3538 = vmatpush.bf16.msrb.mxu2 %v6529_v2 }
 0x12e   :  { %v7451_v4 = vld [vmem:[#allocation5 + $0x924] sm:$0xf0] }
 0x12f   :  { %v6240_v5 = vld [vmem:[#allocation5 + $0xb08] sm:$0xf]  ;;  %v5985_v12 = vor.u32 %v7451_v4, %v5984_v3  ;;  %3551 = vmatpush.bf16.msrb.mxu3 %v6785_v6  ;;  %v3285_v6 = vpop.f32.mrf.mxu2 }
 0x130   :  { %v7515_v7 = vld [vmem:[#allocation5 + $0xb24] sm:$0xf0] }
 0x131   :  { %v6496_v8 = vld [vmem:[#allocation5 + $0xd08] sm:$0xf]  ;;  %v6241_v14 = vor.u32 %v7515_v7, %v6240_v5  ;;  %3513 = vmatpush.bf16.msrb.mxu0 %v5985_v12  ;;  %v3298_v12 = vpop.f32.mrf.mxu3 }
 0x132   :  { %v7579_v9 = vld [vmem:[#allocation5 + $0xd24] sm:$0xf0] }
 0x133   :  { %v6752_v10 = vld [vmem:[#allocation5 + $0xf08] sm:$0xf]  ;;  %v6497_v15 = vor.u32 %v7579_v9, %v6496_v8  ;;  %3526 = vmatpush.bf16.msrb.mxu1 %v6241_v14  ;;  %v5058_v14 = vld [vmem:[#allocation5 + $0x1e8] sm:$0xf0] }
 0x134   :  { %v7643_v11 = vld [vmem:[#allocation5 + $0xf24] sm:$0xf0] }
 0x135   :  { %v5952_v13 = vld [vmem:[#allocation5 + $0x8c8] sm:$0xf]  ;;  %v6753_v23 = vor.u32 %v7643_v11, %v6752_v10  ;;  %3539 = vmatpush.bf16.msrb.mxu2 %v6497_v15  ;;  %v3286_v11 = vadd.f32 %v3285_v6, %v3273_v61  ;;  %v7279_v15 = vld [vmem:[#allocation5 + $0x3cc] sm:$0xf] }
 0x136   :  { %v7443_v16 = vld [vmem:[#allocation5 + $0x8e4] sm:$0xf0]  ;;  %v7391_v61 = vld [vmem:[#allocation5 + $0x74c] sm:$0xf] }
 0x137   :  { %v6208_v17 = vld [vmem:[#allocation5 + $0xac8] sm:$0xf]  ;;  %v5953_v29 = vor.u32 %v7443_v16, %v5952_v13  ;;  %3552 = vmatpush.bf16.msrb.mxu3 %v6753_v23  ;;  %v7215_v13 = vld [vmem:[#allocation5 + $0x1cc] sm:$0xf] }
 0x138   :  { %v7507_v21 = vld [vmem:[#allocation5 + $0xae4] sm:$0xf0]  ;;  %v5570_v23 = vld [vmem:[#allocation5 + $0x5e8] sm:$0xf0] }
 0x139   :  { %v6464_v24 = vld [vmem:[#allocation5 + $0xcc8] sm:$0xf]  ;;  %v6209_v31 = vor.u32 %v7507_v21, %v6208_v17  ;;  %3514 = vmatpush.bf16.msrb.mxu0 %v5953_v29  ;;  %v5314_v17 = vld [vmem:[#allocation5 + $0x3e8] sm:$0xf0] }
 0x13a   :  { %v7571_v25 = vld [vmem:[#allocation5 + $0xce4] sm:$0xf0]  ;;  %v7343_v21 = vld [vmem:[#allocation5 + $0x5cc] sm:$0xf] }
 0x13b   :  { %v6720_v27 = vld [vmem:[#allocation5 + $0xec8] sm:$0xf]  ;;  %v6465_v32 = vor.u32 %v7571_v25, %v6464_v24  ;;  %3527 = vmatpush.bf16.msrb.mxu1 %v6209_v31  ;;  %v8073_v24 = vadd.f32 %v3298_v12, %v3286_v11  ;;  %v3261_v25 = vpop.f32.mrf.mxu0  ;;  %v7407_v29 = vld [vmem:[#allocation5 + $0x7cc] sm:$0xf]  ;;  %v3274_v31 = vpop.f32.mrf.mxu1  ;;  %v5573_v35 = vor.u32 %v7343_v21, %v5570_v23 }
 0x13c   :  { %v7635_v28 = vld [vmem:[#allocation5 + $0xee4] sm:$0xf0]  ;;  %v5218_v6 = vld [vmem:[#allocation5 + $0x328] sm:$0xf0] }
 0x13d   :  { %v5920_v30 = vld [vmem:[#allocation5 + $0x888] sm:$0xf]  ;;  %v6721_v36 = vor.u32 %v7635_v28, %v6720_v27  ;;  %3540 = vmatpush.bf16.msrb.mxu2 %v6465_v32  ;;  %v5698_v31 = vld [vmem:[#allocation5 + $0x6e8] sm:$0xf0] }
 0x13e   :  { %v7435_v33 = vld [vmem:[#allocation5 + $0x8a4] sm:$0xf0] }
 0x13f   :  { %v6176_v34 = vld [vmem:[#allocation5 + $0xa88] sm:$0xf]  ;;  %v5921_v46 = vor.u32 %v7435_v33, %v5920_v30  ;;  %3553 = vmatpush.bf16.msrb.mxu3 %v6721_v36  ;;  %v5826_v30 = vld [vmem:[#allocation5 + $0x7e8] sm:$0xf0]  ;;  %v5061_v33 = vor.u32 %v7215_v13, %v5058_v14 }
 0x140   :  { %v7499_v37 = vld [vmem:[#allocation5 + $0xaa4] sm:$0xf0]  ;;  %v7207_v36 = vld [vmem:[#allocation5 + $0x18c] sm:$0xf] }
 0x141   :  { %v6432_v39 = vld [vmem:[#allocation5 + $0xc88] sm:$0xf]  ;;  %v6177_v48 = vor.u32 %v7499_v37, %v6176_v34  ;;  %3515 = vmatpush.bf16.msrb.mxu0 %v5921_v46  ;;  %v5317_v34 = vor.u32 %v7279_v15, %v5314_v17  ;;  %v5026_v37 = vld [vmem:[#allocation5 + $0x1a8] sm:$0xf0] }
 0x142   :  { %v7563_v40 = vld [vmem:[#allocation5 + $0xca4] sm:$0xf0]  ;;  %v5538_v46 = vld [vmem:[#allocation5 + $0x5a8] sm:$0xf0] }
 0x143   :  { %v6688_v43 = vld [vmem:[#allocation5 + $0xe88] sm:$0xf]  ;;  %v6433_v49 = vor.u32 %v7563_v40, %v6432_v39  ;;  %3528 = vmatpush.bf16.msrb.mxu1 %v6177_v48  ;;  %v7271_v39 = vld [vmem:[#allocation5 + $0x38c] sm:$0xf]  ;;  %v5829_v40 = vor.u32 %v7407_v29, %v5826_v30  ;;  %v3311_v12 = vpop.f32.mrf.mxu0  ;;  %v3324_v23 = vpop.f32.mrf.mxu1 }
 0x144   :  { %v7627_v45 = vld [vmem:[#allocation5 + $0xea4] sm:$0xf0]  ;;  %v5794_v48 = vld [vmem:[#allocation5 + $0x7a8] sm:$0xf0]  ;;  %v3312_v21 = vadd.f32 %v3311_v12, %v8073_v24 }
 0x145   :  { %v5888_v50 = vld [vmem:[#allocation5 + $0x848] sm:$0xf]  ;;  %v6689_v55 = vor.u32 %v7627_v45, %v6688_v43  ;;  %3541 = vmatpush.bf16.msrb.mxu2 %v6433_v49  ;;  %v5282_v43 = vld [vmem:[#allocation5 + $0x3a8] sm:$0xf0]  ;;  %v3287_v49 = vpop.f32.mrf.mxu2 }
 0x146   :  { %v7427_v51 = vld [vmem:[#allocation5 + $0x864] sm:$0xf0]  ;;  %v7335_v45 = vld [vmem:[#allocation5 + $0x58c] sm:$0xf] }
 0x147   :  { %v6144_v52 = vld [vmem:[#allocation5 + $0xa48] sm:$0xf]  ;;  %v5889_v62 = vor.u32 %v7427_v51, %v5888_v50  ;;  %3554 = vmatpush.bf16.msrb.mxu3 %v6689_v55  ;;  %v5029_v50 = vor.u32 %v7207_v36, %v5026_v37  ;;  %v3300_v51 = vpop.f32.mrf.mxu3  ;;  %v5541_v53 = vor.u32 %v7335_v45, %v5538_v46  ;;  %v4994_v55 = vld [vmem:[#allocation5 + $0x168] sm:$0xf0] }
 0x148   :  { %v7491_v56 = vld [vmem:[#allocation5 + $0xa64] sm:$0xf0]  ;;  %v7183_v15 = vld [vmem:[#allocation5 + $0xcc] sm:$0xf] }
 0x149   :  { %v6400_v57 = vld [vmem:[#allocation5 + $0xc48] sm:$0xf]  ;;  %v6145_v1 = vor.u32 %v7491_v56, %v6144_v52  ;;  %3516 = vmatpush.bf16.msrb.mxu0 %v5889_v62  ;;  %v5285_v52 = vor.u32 %v7271_v39, %v5282_v43  ;;  %v7263_v56 = vld [vmem:[#allocation5 + $0x34c] sm:$0xf] }
 0x14a   :  { %v7555_v58 = vld [vmem:[#allocation5 + $0xc64] sm:$0xf0]  ;;  %v5762_v62 = vld [vmem:[#allocation5 + $0x768] sm:$0xf0] }
 0x14b   :  { %v6656_v59 = vld [vmem:[#allocation5 + $0xe48] sm:$0xf]  ;;  %v6401_v2 = vor.u32 %v7555_v58, %v6400_v57  ;;  %3529 = vmatpush.bf16.msrb.mxu1 %v6145_v1  ;;  %v5797_v57 = vor.u32 %v7399_v47, %v5794_v48  ;;  %v5250_v58 = vld [vmem:[#allocation5 + $0x368] sm:$0xf0] }
 0x14c   :  { %v7619_v60 = vld [vmem:[#allocation5 + $0xe64] sm:$0xf0]  ;;  %v7247_v17 = vld [vmem:[#allocation5 + $0x2cc] sm:$0xf] }
 0x14d   :  { %v5856_v63 = vld [vmem:[#allocation5 + $0x808] sm:$0xf]  ;;  %v6657_v7 = vor.u32 %v7619_v60, %v6656_v59  ;;  %3542 = vmatpush.bf16.msrb.mxu2 %v6401_v2  ;;  %v7327_v59 = vld [vmem:[#allocation5 + $0x54c] sm:$0xf] }
 0x14e   :  { %v7419_v0 = vld [vmem:[#allocation5 + $0x824] sm:$0xf0]  ;;  %v5506_v60 = vld [vmem:[#allocation5 + $0x568] sm:$0xf0] }
 0x14f   :  { %v6112_v3 = vld [vmem:[#allocation5 + $0xa08] sm:$0xf]  ;;  %v5857_v16 = vor.u32 %v7419_v0, %v5856_v63  ;;  %3555 = vmatpush.bf16.msrb.mxu3 %v6657_v7  ;;  %v4997_v63 = vor.u32 %v7199_v54, %v4994_v55  ;;  %v5253_v0 = vor.u32 %v7263_v56, %v5250_v58  ;;  %v5509_v1 = vor.u32 %v7327_v59, %v5506_v60  ;;  %v7191_v2 = vld [vmem:[#allocation5 + $0x10c] sm:$0xf]  ;;  %v3350_v48 = vpop.f32.mrf.mxu3  ;;  %v3326_v59 = vpop.f32.mrf.mxu1 }
 0x150   :  { %v7483_v4 = vld [vmem:[#allocation5 + $0xa24] sm:$0xf0]  ;;  %v7319_v7 = vld [vmem:[#allocation5 + $0x50c] sm:$0xf] }
 0x151   :  { %v6368_v5 = vld [vmem:[#allocation5 + $0xc08] sm:$0xf]  ;;  %v6113_v27 = vor.u32 %v7483_v4, %v6112_v3  ;;  %3517 = vmatpush.bf16.msrb.mxu0 %v5857_v16  ;;  %v4962_v3 = vld [vmem:[#allocation5 + $0x128] sm:$0xf0] }
 0x152   :  { %v7547_v8 = vld [vmem:[#allocation5 + $0xc24] sm:$0xf0]  ;;  %v7255_v4 = vld [vmem:[#allocation5 + $0x30c] sm:$0xf]  ;;  %v4965_v11 = vor.u32 %v7191_v2, %v4962_v3 }
 0x153   :  { %v6624_v9 = vld [vmem:[#allocation5 + $0xe08] sm:$0xf]  ;;  %v6369_v28 = vor.u32 %v7547_v8, %v6368_v5  ;;  %3530 = vmatpush.bf16.msrb.mxu1 %v6113_v27  ;;  %v5765_v5 = vor.u32 %v7391_v61, %v5762_v62  ;;  %v5474_v8 = vld [vmem:[#allocation5 + $0x528] sm:$0xf0]  ;;  %v5221_v13 = vor.u32 %v7255_v4, %v5218_v6 }
 0x154   :  { %v7611_v10 = vld [vmem:[#allocation5 + $0xe24] sm:$0xf0]  ;;  %3518 = vmatmul.bf16.vlgmr.msrb.gmra.mxu0 %v8048_v41  ;;  %v5477_v14 = vor.u32 %v7319_v7, %v5474_v8  ;;  %v4930_v16 = vld [vmem:[#allocation5 + $0xe8] sm:$0xf0] }
 0x155   :  { %v6625_v32 = vor.u32 %v7611_v10, %v6624_v9  ;;  %3543 = vmatpush.bf16.msrb.mxu2 %v6369_v28  ;;  %3562 = vmatpush.bf16.msra.mxu0 %v5061_v33  ;;  %v7383_v9 = vld [vmem:[#allocation5 + $0x70c] sm:$0xf]  ;;  %v4933_v33 = vor.u32 %v7183_v15, %v4930_v16 }
 0x156   :  { %3531 = vmatmul.bf16.vlgmr.msrb.gmra.mxu1 %v8052_v44  ;;  %v5730_v10 = vld [vmem:[#allocation5 + $0x728] sm:$0xf0] }
 0x157   :  { %3556 = vmatpush.bf16.msrb.mxu3 %v6625_v32  ;;  %3575 = vmatpush.bf16.msra.mxu1 %v5317_v34  ;;  %v5733_v25 = vor.u32 %v7383_v9, %v5730_v10  ;;  %v5186_v27 = vld [vmem:[#allocation5 + $0x2e8] sm:$0xf0]  ;;  %v3325_v32 = vadd.f32 %v3324_v23, %v3312_v21  ;;  %v3352_v15 = vpop.f32.mrf.mxu3 }
 0x158   :  { %3544 = vmatmul.bf16.vlgmr.msrb.gmra.mxu2 %v8046_v38  ;;  %v7311_v28 = vld [vmem:[#allocation5 + $0x4cc] sm:$0xf]  ;;  %v5189_v34 = vor.u32 %v7247_v17, %v5186_v27 }
 0x159   :  { %3588 = vmatpush.bf16.msra.mxu2 %v5573_v35  ;;  %3563 = vmatpush.bf16.msra.mxu0 %v5029_v50  ;;  %v5442_v29 = vld [vmem:[#allocation5 + $0x4e8] sm:$0xf0] }
 0x15a   :  { %3557 = vmatmul.bf16.vlgmr.msrb.gmra.mxu3 %v8050_v42  ;;  %v7375_v30 = vld [vmem:[#allocation5 + $0x6cc] sm:$0xf]  ;;  %v5445_v35 = vor.u32 %v7311_v28, %v5442_v29 }
 0x15b   :  { %3601 = vmatpush.bf16.msra.mxu3 %v5829_v40  ;;  %3576 = vmatpush.bf16.msra.mxu1 %v5285_v52  ;;  %v7175_v36 = vld [vmem:[#allocation5 + $0x8c] sm:$0xf]  ;;  %v3337_v40 = vpop.f32.mrf.mxu2  ;;  %v5701_v24 = vor.u32 %v7375_v30, %v5698_v31 }
 0x15c   :  { %v4898_v37 = vld [vmem:[#allocation5 + $0xa8] sm:$0xf0]  ;;  %v3338_v47 = vadd.f32 %v3337_v40, %v3325_v32 }
 0x15d   :  { %3589 = vmatpush.bf16.msra.mxu2 %v5541_v53  ;;  %3564 = vmatpush.bf16.msra.mxu0 %v4997_v63  ;;  %v7239_v39 = vld [vmem:[#allocation5 + $0x28c] sm:$0xf]  ;;  %v4901_v51 = vor.u32 %v7175_v36, %v4898_v37  ;;  %v3313_v53 = vpop.f32.mrf.mxu0 }
 0x15e   :  { %v5154_v43 = vld [vmem:[#allocation5 + $0x2a8] sm:$0xf0]  ;;  %v8080_v52 = vadd.f32 %v3350_v48, %v3338_v47 }
 0x15f   :  { %3602 = vmatpush.bf16.msra.mxu3 %v5797_v57  ;;  %3577 = vmatpush.bf16.msra.mxu1 %v5253_v0  ;;  %v7303_v45 = vld [vmem:[#allocation5 + $0x48c] sm:$0xf]  ;;  %v5157_v54 = vor.u32 %v7239_v39, %v5154_v43 }
 0x160   :  { %v5410_v46 = vld [vmem:[#allocation5 + $0x4a8] sm:$0xf0] }
 0x161   :  { %3590 = vmatpush.bf16.msra.mxu2 %v5509_v1  ;;  %3565 = vmatpush.bf16.msra.mxu0 %v4965_v11  ;;  %v7367_v49 = vld [vmem:[#allocation5 + $0x68c] sm:$0xf]  ;;  %v5413_v55 = vor.u32 %v7303_v45, %v5410_v46 }
 0x162   :  { %v5666_v50 = vld [vmem:[#allocation5 + $0x6a8] sm:$0xf0] }
 0x163   :  { %3603 = vmatpush.bf16.msra.mxu3 %v5765_v5  ;;  %3578 = vmatpush.bf16.msra.mxu1 %v5221_v13  ;;  %v7167_v56 = vld [vmem:[#allocation5 + $0x4c] sm:$0xf]  ;;  %v5669_v60 = vor.u32 %v7367_v49, %v5666_v50  ;;  %v3339_v10 = vpop.f32.mrf.mxu2 }
 0x164   :  { %v4866_v57 = vld [vmem:[#allocation5 + $0x68] sm:$0xf0] }
 0x165   :  { %3591 = vmatpush.bf16.msra.mxu2 %v5477_v14  ;;  %3566 = vmatpush.bf16.msra.mxu0 %v4933_v33  ;;  %v7231_v58 = vld [vmem:[#allocation5 + $0x24c] sm:$0xf]  ;;  %v4869_v2 = vor.u32 %v7167_v56, %v4866_v57 }
 0x166   :  { %v5122_v61 = vld [vmem:[#allocation5 + $0x268] sm:$0xf0] }
 0x167   :  { %3604 = vmatpush.bf16.msra.mxu3 %v5733_v25  ;;  %3579 = vmatpush.bf16.msra.mxu1 %v5189_v34  ;;  %v7295_v62 = vld [vmem:[#allocation5 + $0x44c] sm:$0xf]  ;;  %v5125_v5 = vor.u32 %v7231_v58, %v5122_v61 }
 0x168   :  { %v5378_v63 = vld [vmem:[#allocation5 + $0x468] sm:$0xf0] }
 0x169   :  { %3592 = vmatpush.bf16.msra.mxu2 %v5445_v35  ;;  %v7359_v0 = vld [vmem:[#allocation5 + $0x64c] sm:$0xf]  ;;  %3567 = vmatpush.bf16.msra.mxu0 %v4901_v51  ;;  %v5381_v6 = vor.u32 %v7295_v62, %v5378_v63 }
 0x16a   :  { %v5634_v1 = vld [vmem:[#allocation5 + $0x668] sm:$0xf0] }
 0x16b   :  { %3605 = vmatpush.bf16.msra.mxu3 %v5701_v24  ;;  %v7159_v3 = vld [vmem:[#allocation5 + $0xc] sm:$0xf]  ;;  %3580 = vmatpush.bf16.msra.mxu1 %v5157_v54  ;;  %v5637_v11 = vor.u32 %v7359_v0, %v5634_v1 }
 0x16c   :  { %v4834_v4 = vld [vmem:[#allocation5 + $0x28] sm:$0xf0] }
 0x16d   :  { %3593 = vmatpush.bf16.msra.mxu2 %v5413_v55  ;;  %v7223_v7 = vld [vmem:[#allocation5 + $0x20c] sm:$0xf]  ;;  %3568 = vmatpush.bf16.msra.mxu0 %v4869_v2  ;;  %v4837_v23 = vor.u32 %v7159_v3, %v4834_v4  ;;  %v647_v4 = vperm.slane %v8070_v26, 1 }
 0x16e   :  { %v5090_v8 = vld [vmem:[#allocation5 + $0x228] sm:$0xf0] }
 0x16f   :  { %v7287_v9 = vld [vmem:[#allocation5 + $0x40c] sm:$0xf]  ;;  %3606 = vmatpush.bf16.msra.mxu3 %v5669_v60  ;;  %3581 = vmatpush.bf16.msra.mxu1 %v5125_v5  ;;  %v5093_v29 = vor.u32 %v7223_v7, %v5090_v8 }
 0x170   :  { %v5346_v12 = vld [vmem:[#allocation5 + $0x428] sm:$0xf0] }
 0x171   :  { %v7351_v13 = vld [vmem:[#allocation5 + $0x60c] sm:$0xf]  ;;  %3594 = vmatpush.bf16.msra.mxu2 %v5381_v6  ;;  %v5349_v30 = vor.u32 %v7287_v9, %v5346_v12  ;;  %3569 = vmatpush.bf16.msra.mxu0 %v4837_v23  ;;  %v3363_v12 = vpop.f32.mrf.mxu0  ;;  %v3376_v23 = vpop.f32.mrf.mxu1 }
 0x172   :  { %v5602_v14 = vld [vmem:[#allocation5 + $0x628] sm:$0xf0] }
 0x173   :  { %v7471_v16 = vld [vmem:[#allocation5 + $0x9cc] sm:$0xf]  ;;  %3607 = vmatpush.bf16.msra.mxu3 %v5637_v11  ;;  %v5605_v33 = vor.u32 %v7351_v13, %v5602_v14  ;;  %3582 = vmatpush.bf16.msra.mxu1 %v5093_v29 }
 0x174   :  { %v6082_v17 = vld [vmem:[#allocation5 + $0x9e8] sm:$0xf0]  ;;  %3570 = vmatmul.bf16.vlgmr.msra.gmra.mxu0 %v8036_v19 }
 0x175   :  { %v7535_v21 = vld [vmem:[#allocation5 + $0xbcc] sm:$0xf]  ;;  %v6085_v34 = vor.u32 %v7471_v16, %v6082_v17  ;;  %3595 = vmatpush.bf16.msra.mxu2 %v5349_v30 }
 0x176   :  { %v6338_v25 = vld [vmem:[#allocation5 + $0xbe8] sm:$0xf0]  ;;  %3583 = vmatmul.bf16.vlgmr.msra.gmra.mxu1 %v8040_v22 }
 0x177   :  { %v7599_v27 = vld [vmem:[#allocation5 + $0xdcc] sm:$0xf]  ;;  %v6341_v35 = vor.u32 %v7535_v21, %v6338_v25  ;;  %3608 = vmatpush.bf16.msra.mxu3 %v5605_v33  ;;  %3614 = vmatpush.bf16.msrb.mxu0 %v6085_v34  ;;  %v3364_v21 = vadd.f32 %v3363_v12, %v647_v4 }
 0x178   :  { %v6594_v28 = vld [vmem:[#allocation5 + $0xde8] sm:$0xf0]  ;;  %3596 = vmatmul.bf16.vlgmr.msra.gmra.mxu2 %v8034_v18 }
 0x179   :  { %v7663_v31 = vld [vmem:[#allocation5 + $0xfcc] sm:$0xf]  ;;  %v6597_v36 = vor.u32 %v7599_v27, %v6594_v28  ;;  %3627 = vmatpush.bf16.msrb.mxu1 %v6341_v35 }
 0x17a   :  { %v6850_v32 = vld [vmem:[#allocation5 + $0xfe8] sm:$0xf0]  ;;  %3609 = vmatmul.bf16.vlgmr.msra.gmra.mxu3 %v8038_v20 }
 0x17b   :  { %v7463_v37 = vld [vmem:[#allocation5 + $0x98c] sm:$0xf]  ;;  %v6853_v24 = vor.u32 %v7663_v31, %v6850_v32  ;;  %3640 = vmatpush.bf16.msrb.mxu2 %v6597_v36  ;;  %v3377_v31 = vadd.f32 %v3376_v23, %v3364_v21  ;;  %v5320_v21 = vld [vmem:[#allocation5 + $0x3d0] sm:$0xf] }
 0x17c   :  { %v6050_v39 = vld [vmem:[#allocation5 + $0x9a8] sm:$0xf0] }
 0x17d   :  { %v7527_v40 = vld [vmem:[#allocation5 + $0xb8c] sm:$0xf]  ;;  %v6053_v49 = vor.u32 %v7463_v37, %v6050_v39  ;;  %3653 = vmatpush.bf16.msrb.mxu3 %v6853_v24  ;;  %v3389_v39 = vpop.f32.mrf.mxu2 }
 0x17e   :  { %v6306_v43 = vld [vmem:[#allocation5 + $0xba8] sm:$0xf0] }
 0x17f   :  { %v7591_v45 = vld [vmem:[#allocation5 + $0xd8c] sm:$0xf]  ;;  %v6309_v50 = vor.u32 %v7527_v40, %v6306_v43  ;;  %3615 = vmatpush.bf16.msrb.mxu0 %v6053_v49 }
 0x180   :  { %v6562_v46 = vld [vmem:[#allocation5 + $0xda8] sm:$0xf0] }
 0x181   :  { %v7655_v47 = vld [vmem:[#allocation5 + $0xf8c] sm:$0xf]  ;;  %v6565_v51 = vor.u32 %v7591_v45, %v6562_v46  ;;  %3628 = vmatpush.bf16.msrb.mxu1 %v6309_v50  ;;  %v3390_v46 = vadd.f32 %v3389_v39, %v3377_v31  ;;  %v7412_v31 = vld [vmem:[#allocation5 + $0x7ec] sm:$0xf0] }
 0x182   :  { %v6818_v48 = vld [vmem:[#allocation5 + $0xfa8] sm:$0xf0]  ;;  %v5288_v39 = vld [vmem:[#allocation5 + $0x390] sm:$0xf] }
 0x183   :  { %v7455_v53 = vld [vmem:[#allocation5 + $0x94c] sm:$0xf]  ;;  %v6821_v56 = vor.u32 %v7655_v47, %v6818_v48  ;;  %3641 = vmatpush.bf16.msrb.mxu2 %v6565_v51  ;;  %v3402_v47 = vpop.f32.mrf.mxu3 }
 0x184   :  { %v6018_v54 = vld [vmem:[#allocation5 + $0x968] sm:$0xf0]  ;;  %v8087_v51 = vadd.f32 %v3402_v47, %v3390_v46  ;;  %v5800_v46 = vld [vmem:[#allocation5 + $0x790] sm:$0xf] }
 0x185   :  { %v7519_v55 = vld [vmem:[#allocation5 + $0xb4c] sm:$0xf]  ;;  %v6021_v62 = vor.u32 %v7455_v53, %v6018_v54  ;;  %3654 = vmatpush.bf16.msrb.mxu3 %v6821_v56  ;;  %v3365_v53 = vpop.f32.mrf.mxu0  ;;  %v7404_v47 = vld [vmem:[#allocation5 + $0x7ac] sm:$0xf0] }
 0x186   :  { %v6274_v57 = vld [vmem:[#allocation5 + $0xb68] sm:$0xf0]  ;;  %v5000_v53 = vld [vmem:[#allocation5 + $0x150] sm:$0xf] }
 0x187   :  { %v7583_v58 = vld [vmem:[#allocation5 + $0xd4c] sm:$0xf]  ;;  %v6277_v0 = vor.u32 %v7519_v55, %v6274_v57  ;;  %3616 = vmatpush.bf16.msrb.mxu0 %v6021_v62 }
 0x188   :  { %v6530_v59 = vld [vmem:[#allocation5 + $0xd68] sm:$0xf0] }
 0x189   :  { %v7647_v60 = vld [vmem:[#allocation5 + $0xf4c] sm:$0xf]  ;;  %v6533_v1 = vor.u32 %v7583_v58, %v6530_v59  ;;  %3629 = vmatpush.bf16.msrb.mxu1 %v6277_v0  ;;  %v3378_v59 = vpop.f32.mrf.mxu1 }
 0x18a   :  { %v6786_v61 = vld [vmem:[#allocation5 + $0xf68] sm:$0xf0]  ;;  %v7332_v59 = vld [vmem:[#allocation5 + $0x56c] sm:$0xf0] }
 0x18b   :  { %v7447_v63 = vld [vmem:[#allocation5 + $0x90c] sm:$0xf]  ;;  %v6789_v5 = vor.u32 %v7647_v60, %v6786_v61  ;;  %3642 = vmatpush.bf16.msrb.mxu2 %v6533_v1 }
 0x18c   :  { %v5986_v2 = vld [vmem:[#allocation5 + $0x928] sm:$0xf0] }
 0x18d   :  { %v7511_v3 = vld [vmem:[#allocation5 + $0xb0c] sm:$0xf]  ;;  %v5989_v11 = vor.u32 %v7447_v63, %v5986_v2  ;;  %3655 = vmatpush.bf16.msrb.mxu3 %v6789_v5 }
 0x18e   :  { %v6242_v6 = vld [vmem:[#allocation5 + $0xb28] sm:$0xf0] }
 0x18f   :  { %v7575_v7 = vld [vmem:[#allocation5 + $0xd0c] sm:$0xf]  ;;  %v6245_v13 = vor.u32 %v7511_v3, %v6242_v6  ;;  %3617 = vmatpush.bf16.msrb.mxu0 %v5989_v11 }
 0x190   :  { %v6498_v8 = vld [vmem:[#allocation5 + $0xd28] sm:$0xf0] }
 0x191   :  { %v7639_v9 = vld [vmem:[#allocation5 + $0xf0c] sm:$0xf]  ;;  %v6501_v14 = vor.u32 %v7575_v7, %v6498_v8  ;;  %3630 = vmatpush.bf16.msrb.mxu1 %v6245_v13 }
 0x192   :  { %v6754_v10 = vld [vmem:[#allocation5 + $0xf28] sm:$0xf0] }
 0x193   :  { %v7439_v15 = vld [vmem:[#allocation5 + $0x8cc] sm:$0xf]  ;;  %v6757_v26 = vor.u32 %v7639_v9, %v6754_v10  ;;  %3643 = vmatpush.bf16.msrb.mxu2 %v6501_v14  ;;  %v3391_v10 = vpop.f32.mrf.mxu2 }
 0x194   :  { %v5954_v16 = vld [vmem:[#allocation5 + $0x8e8] sm:$0xf0] }
 0x195   :  { %v7503_v17 = vld [vmem:[#allocation5 + $0xacc] sm:$0xf]  ;;  %v5957_v32 = vor.u32 %v7439_v15, %v5954_v16  ;;  %3656 = vmatpush.bf16.msrb.mxu3 %v6757_v26  ;;  %v3404_v15 = vpop.f32.mrf.mxu3  ;;  %v5064_v16 = vld [vmem:[#allocation5 + $0x1d0] sm:$0xf] }
 0x196   :  { %v6210_v25 = vld [vmem:[#allocation5 + $0xae8] sm:$0xf0]  ;;  %v7284_v26 = vld [vmem:[#allocation5 + $0x3ec] sm:$0xf0] }
 0x197   :  { %v7567_v27 = vld [vmem:[#allocation5 + $0xccc] sm:$0xf]  ;;  %v6213_v33 = vor.u32 %v7503_v17, %v6210_v25  ;;  %3618 = vmatpush.bf16.msrb.mxu0 %v5957_v32  ;;  %v7220_v17 = vld [vmem:[#allocation5 + $0x1ec] sm:$0xf0] }
 0x198   :  { %v6466_v28 = vld [vmem:[#allocation5 + $0xce8] sm:$0xf0]  ;;  %v5576_v25 = vld [vmem:[#allocation5 + $0x5d0] sm:$0xf] }
 0x199   :  { %v7631_v29 = vld [vmem:[#allocation5 + $0xecc] sm:$0xf]  ;;  %v6469_v34 = vor.u32 %v7567_v27, %v6466_v28  ;;  %3631 = vmatpush.bf16.msrb.mxu1 %v6213_v33  ;;  %v7348_v27 = vld [vmem:[#allocation5 + $0x5ec] sm:$0xf0]  ;;  %v5065_v33 = vor.u32 %v7220_v17, %v5064_v16 }
 0x19a   :  { %v6722_v30 = vld [vmem:[#allocation5 + $0xee8] sm:$0xf0]  ;;  %v7188_v15 = vld [vmem:[#allocation5 + $0xec] sm:$0xf0] }
 0x19b   :  { %v7431_v35 = vld [vmem:[#allocation5 + $0x88c] sm:$0xf]  ;;  %v6725_v40 = vor.u32 %v7631_v29, %v6722_v30  ;;  %3644 = vmatpush.bf16.msrb.mxu2 %v6469_v34  ;;  %v5832_v30 = vld [vmem:[#allocation5 + $0x7d0] sm:$0xf]  ;;  %v5321_v34 = vor.u32 %v7284_v26, %v5320_v21  ;;  %v3428_v21 = vpop.f32.mrf.mxu1 }
 0x19c   :  { %v5922_v36 = vld [vmem:[#allocation5 + $0x8a8] sm:$0xf0]  ;;  %v5192_v16 = vld [vmem:[#allocation5 + $0x2d0] sm:$0xf] }
 0x19d   :  { %v7495_v37 = vld [vmem:[#allocation5 + $0xa8c] sm:$0xf]  ;;  %v5925_v50 = vor.u32 %v7431_v35, %v5922_v36  ;;  %3657 = vmatpush.bf16.msrb.mxu3 %v6725_v40  ;;  %v5577_v35 = vor.u32 %v7348_v27, %v5576_v25  ;;  %v5032_v36 = vld [vmem:[#allocation5 + $0x190] sm:$0xf]  ;;  %v5833_v40 = vor.u32 %v7412_v31, %v5832_v30 }
 0x19e   :  { %v6178_v24 = vld [vmem:[#allocation5 + $0xaa8] sm:$0xf0]  ;;  %v7252_v26 = vld [vmem:[#allocation5 + $0x2ec] sm:$0xf0] }
 0x19f   :  { %v7559_v43 = vld [vmem:[#allocation5 + $0xc8c] sm:$0xf]  ;;  %v6181_v54 = vor.u32 %v7495_v37, %v6178_v24  ;;  %3619 = vmatpush.bf16.msrb.mxu0 %v5925_v50  ;;  %v7212_v37 = vld [vmem:[#allocation5 + $0x1ac] sm:$0xf0] }
 0x1a0   :  { %v6434_v45 = vld [vmem:[#allocation5 + $0xca8] sm:$0xf0]  ;;  %v7276_v24 = vld [vmem:[#allocation5 + $0x3ac] sm:$0xf0] }
 0x1a1   :  { %v7623_v48 = vld [vmem:[#allocation5 + $0xe8c] sm:$0xf]  ;;  %v6437_v55 = vor.u32 %v7559_v43, %v6434_v45  ;;  %3632 = vmatpush.bf16.msrb.mxu1 %v6181_v54  ;;  %v5544_v43 = vld [vmem:[#allocation5 + $0x590] sm:$0xf] }
 0x1a2   :  { %v6690_v49 = vld [vmem:[#allocation5 + $0xea8] sm:$0xf0]  ;;  %v7340_v45 = vld [vmem:[#allocation5 + $0x5ac] sm:$0xf0] }
 0x1a3   :  { %v7423_v56 = vld [vmem:[#allocation5 + $0x84c] sm:$0xf]  ;;  %v6693_v60 = vor.u32 %v7623_v48, %v6690_v49  ;;  %3645 = vmatpush.bf16.msrb.mxu2 %v6437_v55  ;;  %v5033_v48 = vor.u32 %v7212_v37, %v5032_v36  ;;  %v5289_v49 = vor.u32 %v7276_v24, %v5288_v39  ;;  %v5545_v50 = vor.u32 %v7340_v45, %v5544_v43  ;;  %v7204_v54 = vld [vmem:[#allocation5 + $0x16c] sm:$0xf0]  ;;  %v3441_v37 = vpop.f32.mrf.mxu2  ;;  %v3454_v45 = vpop.f32.mrf.mxu3 }
 0x1a4   :  { %v5890_v57 = vld [vmem:[#allocation5 + $0x868] sm:$0xf0]  ;;  %v5256_v55 = vld [vmem:[#allocation5 + $0x350] sm:$0xf] }
 0x1a5   :  { %v7487_v58 = vld [vmem:[#allocation5 + $0xa4c] sm:$0xf]  ;;  %v5893_v2 = vor.u32 %v7423_v56, %v5890_v57  ;;  %3658 = vmatpush.bf16.msrb.mxu3 %v6693_v60  ;;  %v5801_v56 = vor.u32 %v7404_v47, %v5800_v46  ;;  %v7268_v57 = vld [vmem:[#allocation5 + $0x36c] sm:$0xf0] }
 0x1a6   :  { %v6146_v61 = vld [vmem:[#allocation5 + $0xa68] sm:$0xf0]  ;;  %v5768_v60 = vld [vmem:[#allocation5 + $0x750] sm:$0xf] }
 0x1a7   :  { %v7551_v62 = vld [vmem:[#allocation5 + $0xc4c] sm:$0xf]  ;;  %v6149_v5 = vor.u32 %v7487_v58, %v6146_v61  ;;  %3620 = vmatpush.bf16.msrb.mxu0 %v5893_v2  ;;  %v5512_v58 = vld [vmem:[#allocation5 + $0x550] sm:$0xf] }
 0x1a8   :  { %v6402_v63 = vld [vmem:[#allocation5 + $0xc68] sm:$0xf0]  ;;  %v7396_v61 = vld [vmem:[#allocation5 + $0x76c] sm:$0xf0] }
 0x1a9   :  { %v7615_v0 = vld [vmem:[#allocation5 + $0xe4c] sm:$0xf]  ;;  %v6405_v6 = vor.u32 %v7551_v62, %v6402_v63  ;;  %3633 = vmatpush.bf16.msrb.mxu1 %v6149_v5  ;;  %v5001_v62 = vor.u32 %v7204_v54, %v5000_v53  ;;  %v5257_v63 = vor.u32 %v7268_v57, %v5256_v55  ;;  %v7196_v2 = vld [vmem:[#allocation5 + $0x12c] sm:$0xf0] }
 0x1aa   :  { %v6658_v1 = vld [vmem:[#allocation5 + $0xe68] sm:$0xf0]  ;;  %v7260_v5 = vld [vmem:[#allocation5 + $0x32c] sm:$0xf0] }
 0x1ab   :  { %v7415_v3 = vld [vmem:[#allocation5 + $0x80c] sm:$0xf]  ;;  %v6661_v11 = vor.u32 %v7615_v0, %v6658_v1  ;;  %3646 = vmatpush.bf16.msrb.mxu2 %v6405_v6  ;;  %v5513_v0 = vor.u32 %v7332_v59, %v5512_v58  ;;  %v4968_v1 = vld [vmem:[#allocation5 + $0x110] sm:$0xf]  ;;  %v3430_v58 = vpop.f32.mrf.mxu1 }
 0x1ac   :  { %v5858_v4 = vld [vmem:[#allocation5 + $0x828] sm:$0xf0]  ;;  %v5480_v6 = vld [vmem:[#allocation5 + $0x510] sm:$0xf]  ;;  %v4969_v10 = vor.u32 %v7196_v2, %v4968_v1 }
 0x1ad   :  { %v7479_v7 = vld [vmem:[#allocation5 + $0xa0c] sm:$0xf]  ;;  %v5861_v23 = vor.u32 %v7415_v3, %v5858_v4  ;;  %3659 = vmatpush.bf16.msrb.mxu3 %v6661_v11  ;;  %v5224_v3 = vld [vmem:[#allocation5 + $0x310] sm:$0xf]  ;;  %v5769_v4 = vor.u32 %v7396_v61, %v5768_v60  ;;  %v3415_v11 = vpop.f32.mrf.mxu0 }
 0x1ae   :  { %v6114_v8 = vld [vmem:[#allocation5 + $0xa28] sm:$0xf0]  ;;  %v3416_v17 = vadd.f32 %v3415_v11, %v8087_v51  ;;  %v5448_v25 = vld [vmem:[#allocation5 + $0x4d0] sm:$0xf] }
 0x1af   :  { %v7543_v9 = vld [vmem:[#allocation5 + $0xc0c] sm:$0xf]  ;;  %v6117_v28 = vor.u32 %v7479_v7, %v6114_v8  ;;  %3621 = vmatpush.bf16.msrb.mxu0 %v5861_v23  ;;  %v7324_v7 = vld [vmem:[#allocation5 + $0x52c] sm:$0xf0] }
 0x1b0   :  { %v6370_v12 = vld [vmem:[#allocation5 + $0xc28] sm:$0xf0]  ;;  %v5736_v8 = vld [vmem:[#allocation5 + $0x710] sm:$0xf]  ;;  %v3429_v30 = vadd.f32 %v3428_v21, %v3416_v17 }
 0x1b1   :  { %v7607_v13 = vld [vmem:[#allocation5 + $0xe0c] sm:$0xf]  ;;  %v6373_v29 = vor.u32 %v7543_v9, %v6370_v12  ;;  %3634 = vmatpush.bf16.msrb.mxu1 %v6117_v28  ;;  %v7388_v9 = vld [vmem:[#allocation5 + $0x72c] sm:$0xf0]  ;;  %v5225_v12 = vor.u32 %v7260_v5, %v5224_v3 }
 0x1b2   :  { %v6626_v14 = vld [vmem:[#allocation5 + $0xe28] sm:$0xf0]  ;;  %3622 = vmatmul.bf16.vlgmr.msrb.gmra.mxu0 %v8048_v41  ;;  %v5737_v23 = vor.u32 %v7388_v9, %v5736_v8  ;;  %v7316_v27 = vld [vmem:[#allocation5 + $0x4ec] sm:$0xf0]  ;;  %v3442_v43 = vadd.f32 %v3441_v37, %v3429_v30  ;;  %v3443_v9 = vpop.f32.mrf.mxu2 }
 0x1b3   :  { %v6629_v32 = vor.u32 %v7607_v13, %v6626_v14  ;;  %3647 = vmatpush.bf16.msrb.mxu2 %v6373_v29  ;;  %3666 = vmatpush.bf16.msra.mxu0 %v5065_v33  ;;  %v5481_v13 = vor.u32 %v7324_v7, %v5480_v6  ;;  %v4936_v14 = vld [vmem:[#allocation5 + $0xd0] sm:$0xf]  ;;  %v5449_v33 = vor.u32 %v7316_v27, %v5448_v25 }
 0x1b4   :  { %3635 = vmatmul.bf16.vlgmr.msrb.gmra.mxu1 %v8052_v44  ;;  %v5704_v28 = vld [vmem:[#allocation5 + $0x6d0] sm:$0xf]  ;;  %v4937_v31 = vor.u32 %v7188_v15, %v4936_v14  ;;  %v3456_v14 = vpop.f32.mrf.mxu3 }
 0x1b5   :  { %3660 = vmatpush.bf16.msrb.mxu3 %v6629_v32  ;;  %3679 = vmatpush.bf16.msra.mxu1 %v5321_v34  ;;  %v7380_v29 = vld [vmem:[#allocation5 + $0x6ec] sm:$0xf0]  ;;  %v5193_v32 = vor.u32 %v7252_v26, %v5192_v16 }
 0x1b6   :  { %3648 = vmatmul.bf16.vlgmr.msrb.gmra.mxu2 %v8046_v38  ;;  %v4904_v34 = vld [vmem:[#allocation5 + $0x90] sm:$0xf]  ;;  %v5705_v51 = vor.u32 %v7380_v29, %v5704_v28 }
 0x1b7   :  { %3692 = vmatpush.bf16.msra.mxu2 %v5577_v35  ;;  %3667 = vmatpush.bf16.msra.mxu0 %v5033_v48  ;;  %v7180_v35 = vld [vmem:[#allocation5 + $0xac] sm:$0xf0] }
 0x1b8   :  { %3661 = vmatmul.bf16.vlgmr.msrb.gmra.mxu3 %v8050_v42  ;;  %v5160_v36 = vld [vmem:[#allocation5 + $0x290] sm:$0xf]  ;;  %v4905_v48 = vor.u32 %v7180_v35, %v4904_v34 }
 0x1b9   :  { %3705 = vmatpush.bf16.msra.mxu3 %v5833_v40  ;;  %3680 = vmatpush.bf16.msra.mxu1 %v5289_v49  ;;  %v7244_v39 = vld [vmem:[#allocation5 + $0x2ac] sm:$0xf0]  ;;  %v8094_v49 = vadd.f32 %v3454_v45, %v3442_v43 }
 0x1ba   :  { %v5416_v40 = vld [vmem:[#allocation5 + $0x490] sm:$0xf]  ;;  %v5161_v53 = vor.u32 %v7244_v39, %v5160_v36 }
 0x1bb   :  { %3693 = vmatpush.bf16.msra.mxu2 %v5545_v50  ;;  %3668 = vmatpush.bf16.msra.mxu0 %v5001_v62  ;;  %v7308_v24 = vld [vmem:[#allocation5 + $0x4ac] sm:$0xf0]  ;;  %v3417_v50 = vpop.f32.mrf.mxu0 }
 0x1bc   :  { %v5672_v46 = vld [vmem:[#allocation5 + $0x690] sm:$0xf]  ;;  %v5417_v54 = vor.u32 %v7308_v24, %v5416_v40 }
 0x1bd   :  { %3706 = vmatpush.bf16.msra.mxu3 %v5801_v56  ;;  %3681 = vmatpush.bf16.msra.mxu1 %v5257_v63  ;;  %v7372_v47 = vld [vmem:[#allocation5 + $0x6ac] sm:$0xf0] }
 0x1be   :  { %v4872_v55 = vld [vmem:[#allocation5 + $0x50] sm:$0xf]  ;;  %v5673_v59 = vor.u32 %v7372_v47, %v5672_v46 }
 0x1bf   :  { %3694 = vmatpush.bf16.msra.mxu2 %v5513_v0  ;;  %3669 = vmatpush.bf16.msra.mxu0 %v4969_v10  ;;  %v7172_v56 = vld [vmem:[#allocation5 + $0x6c] sm:$0xf0] }
 0x1c0   :  { %v5128_v57 = vld [vmem:[#allocation5 + $0x250] sm:$0xf]  ;;  %v4873_v1 = vor.u32 %v7172_v56, %v4872_v55 }
 0x1c1   :  { %3707 = vmatpush.bf16.msra.mxu3 %v5769_v4  ;;  %3682 = vmatpush.bf16.msra.mxu1 %v5225_v12  ;;  %v7236_v60 = vld [vmem:[#allocation5 + $0x26c] sm:$0xf0] }
 0x1c2   :  { %v5384_v61 = vld [vmem:[#allocation5 + $0x450] sm:$0xf]  ;;  %v5129_v4 = vor.u32 %v7236_v60, %v5128_v57 }
 0x1c3   :  { %3695 = vmatpush.bf16.msra.mxu2 %v5481_v13  ;;  %3670 = vmatpush.bf16.msra.mxu0 %v4937_v31  ;;  %v7300_v62 = vld [vmem:[#allocation5 + $0x46c] sm:$0xf0] }
 0x1c4   :  { %v5640_v63 = vld [vmem:[#allocation5 + $0x650] sm:$0xf]  ;;  %v5385_v5 = vor.u32 %v7300_v62, %v5384_v61 }
 0x1c5   :  { %3708 = vmatpush.bf16.msra.mxu3 %v5737_v23  ;;  %3683 = vmatpush.bf16.msra.mxu1 %v5193_v32  ;;  %v7364_v0 = vld [vmem:[#allocation5 + $0x66c] sm:$0xf0] }
 0x1c6   :  { %v4840_v2 = vld [vmem:[#allocation5 + $0x10] sm:$0xf]  ;;  %v5641_v10 = vor.u32 %v7364_v0, %v5640_v63 }
 0x1c7   :  { %3696 = vmatpush.bf16.msra.mxu2 %v5449_v33  ;;  %3671 = vmatpush.bf16.msra.mxu0 %v4905_v48  ;;  %v7164_v3 = vld [vmem:[#allocation5 + $0x2c] sm:$0xf0] }
 0x1c8   :  { %v5096_v6 = vld [vmem:[#allocation5 + $0x210] sm:$0xf]  ;;  %v4841_v21 = vor.u32 %v7164_v3, %v4840_v2  ;;  %v8100_v3 = vld [vmem:[#allocation7] sm:$0xff] }
 0x1c9   :  { %3709 = vmatpush.bf16.msra.mxu3 %v5705_v51  ;;  %3684 = vmatpush.bf16.msra.mxu1 %v5161_v53  ;;  %v7228_v7 = vld [vmem:[#allocation5 + $0x22c] sm:$0xf0] }
 0x1ca   :  { %v5352_v8 = vld [vmem:[#allocation5 + $0x410] sm:$0xf]  ;;  %v5097_v27 = vor.u32 %v7228_v7, %v5096_v6 }
 0x1cb   :  { %3697 = vmatpush.bf16.msra.mxu2 %v5417_v54  ;;  %v7292_v11 = vld [vmem:[#allocation5 + $0x42c] sm:$0xf0]  ;;  %3672 = vmatpush.bf16.msra.mxu0 %v4873_v1 }
 0x1cc   :  { %v5608_v12 = vld [vmem:[#allocation5 + $0x610] sm:$0xf]  ;;  %v5353_v28 = vor.u32 %v7292_v11, %v5352_v8 }
 0x1cd   :  { %3710 = vmatpush.bf16.msra.mxu3 %v5673_v59  ;;  %v7356_v13 = vld [vmem:[#allocation5 + $0x62c] sm:$0xf0]  ;;  %3685 = vmatpush.bf16.msra.mxu1 %v5129_v4  ;;  %v648_v4 = vperm.slane %v8100_v3, 2 }
 0x1ce   :  { %v6088_v15 = vld [vmem:[#allocation5 + $0x9d0] sm:$0xf]  ;;  %v5609_v31 = vor.u32 %v7356_v13, %v5608_v12  ;;  %v3467_v12 = vpop.f32.mrf.mxu0 }
 0x1cf   :  { %v7476_v16 = vld [vmem:[#allocation5 + $0x9ec] sm:$0xf0]  ;;  %3698 = vmatpush.bf16.msra.mxu2 %v5385_v5  ;;  %3673 = vmatpush.bf16.msra.mxu0 %v4841_v21  ;;  %v3468_v21 = vadd.f32 %v3467_v12, %v648_v4 }
 0x1d0   :  { %v6344_v17 = vld [vmem:[#allocation5 + $0xbd0] sm:$0xf]  ;;  %v6089_v32 = vor.u32 %v7476_v16, %v6088_v15 }
 0x1d1   :  { %v7540_v23 = vld [vmem:[#allocation5 + $0xbec] sm:$0xf0]  ;;  %3711 = vmatpush.bf16.msra.mxu3 %v5641_v10  ;;  %3686 = vmatpush.bf16.msra.mxu1 %v5097_v27 }
 0x1d2   :  { %v6600_v26 = vld [vmem:[#allocation5 + $0xdd0] sm:$0xf]  ;;  %v6345_v33 = vor.u32 %v7540_v23, %v6344_v17  ;;  %3674 = vmatmul.bf16.vlgmr.msra.gmra.mxu0 %v8036_v19  ;;  %v3480_v23 = vpop.f32.mrf.mxu1 }
 0x1d3   :  { %v7604_v25 = vld [vmem:[#allocation5 + $0xdec] sm:$0xf0]  ;;  %3699 = vmatpush.bf16.msra.mxu2 %v5353_v28  ;;  %3718 = vmatpush.bf16.msrb.mxu0 %v6089_v32 }
 0x1d4   :  { %v6856_v29 = vld [vmem:[#allocation5 + $0xfd0] sm:$0xf]  ;;  %v6601_v34 = vor.u32 %v7604_v25, %v6600_v26  ;;  %3687 = vmatmul.bf16.vlgmr.msra.gmra.mxu1 %v8040_v22 }
 0x1d5   :  { %v7668_v30 = vld [vmem:[#allocation5 + $0xfec] sm:$0xf0]  ;;  %3712 = vmatpush.bf16.msra.mxu3 %v5609_v31  ;;  %3731 = vmatpush.bf16.msrb.mxu1 %v6345_v33  ;;  %v3481_v31 = vadd.f32 %v3480_v23, %v3468_v21  ;;  %v7216_v21 = vld [vmem:[#allocation5 + $0x1d4] sm:$0xf] }
 0x1d6   :  { %v6056_v35 = vld [vmem:[#allocation5 + $0x990] sm:$0xf]  ;;  %v6857_v51 = vor.u32 %v7668_v30, %v6856_v29  ;;  %3700 = vmatmul.bf16.vlgmr.msra.gmra.mxu2 %v8034_v18  ;;  %v5066_v23 = vld [vmem:[#allocation5 + $0x1f0] sm:$0xf0] }
 0x1d7   :  { %v7468_v36 = vld [vmem:[#allocation5 + $0x9ac] sm:$0xf0]  ;;  %3744 = vmatpush.bf16.msrb.mxu2 %v6601_v34 }
 0x1d8   :  { %v6312_v37 = vld [vmem:[#allocation5 + $0xb90] sm:$0xf]  ;;  %v6057_v46 = vor.u32 %v7468_v36, %v6056_v35  ;;  %3713 = vmatmul.bf16.vlgmr.msra.gmra.mxu3 %v8038_v20 }
 0x1d9   :  { %v7532_v39 = vld [vmem:[#allocation5 + $0xbac] sm:$0xf0]  ;;  %3757 = vmatpush.bf16.msrb.mxu3 %v6857_v51  ;;  %v3493_v51 = vpop.f32.mrf.mxu2 }
 0x1da   :  { %v6568_v40 = vld [vmem:[#allocation5 + $0xd90] sm:$0xf]  ;;  %v6313_v47 = vor.u32 %v7532_v39, %v6312_v37  ;;  %3719 = vmatpush.bf16.msrb.mxu0 %v6057_v46  ;;  %v3506_v46 = vpop.f32.mrf.mxu3 }
 0x1db   :  { %v7596_v24 = vld [vmem:[#allocation5 + $0xdac] sm:$0xf0] }
 0x1dc   :  { %v6824_v43 = vld [vmem:[#allocation5 + $0xf90] sm:$0xf]  ;;  %v6569_v48 = vor.u32 %v7596_v24, %v6568_v40  ;;  %3732 = vmatpush.bf16.msrb.mxu1 %v6313_v47 }
 0x1dd   :  { %v7660_v45 = vld [vmem:[#allocation5 + $0xfac] sm:$0xf0] }
 0x1de   :  { %v6024_v50 = vld [vmem:[#allocation5 + $0x950] sm:$0xf]  ;;  %v6825_v55 = vor.u32 %v7660_v45, %v6824_v43  ;;  %3745 = vmatpush.bf16.msrb.mxu2 %v6569_v48  ;;  %v3494_v45 = vadd.f32 %v3493_v51, %v3481_v31  ;;  %v7208_v51 = vld [vmem:[#allocation5 + $0x194] sm:$0xf] }
 0x1df   :  { %v7460_v53 = vld [vmem:[#allocation5 + $0x96c] sm:$0xf0] }
 0x1e0   :  { %v6280_v54 = vld [vmem:[#allocation5 + $0xb50] sm:$0xf]  ;;  %v6025_v61 = vor.u32 %v7460_v53, %v6024_v50  ;;  %3758 = vmatpush.bf16.msrb.mxu3 %v6825_v55  ;;  %v8103_v53 = vadd.f32 %v3506_v46, %v3494_v45  ;;  %v7336_v45 = vld [vmem:[#allocation5 + $0x594] sm:$0xf] }
 0x1e1   :  { %v7524_v56 = vld [vmem:[#allocation5 + $0xb6c] sm:$0xf0]  ;;  %v3495_v12 = vpop.f32.mrf.mxu2  ;;  %v5546_v46 = vld [vmem:[#allocation5 + $0x5b0] sm:$0xf0] }
 0x1e2   :  { %v6536_v57 = vld [vmem:[#allocation5 + $0xd50] sm:$0xf]  ;;  %v6281_v63 = vor.u32 %v7524_v56, %v6280_v54  ;;  %3720 = vmatpush.bf16.msrb.mxu0 %v6025_v61  ;;  %v3469_v54 = vpop.f32.mrf.mxu0  ;;  %v7384_v12 = vld [vmem:[#allocation5 + $0x714] sm:$0xf] }
 0x1e3   :  { %v7588_v58 = vld [vmem:[#allocation5 + $0xd6c] sm:$0xf0] }
 0x1e4   :  { %v6792_v59 = vld [vmem:[#allocation5 + $0xf50] sm:$0xf]  ;;  %v6537_v0 = vor.u32 %v7588_v58, %v6536_v57  ;;  %3733 = vmatpush.bf16.msrb.mxu1 %v6281_v63 }
 0x1e5   :  { %v7652_v60 = vld [vmem:[#allocation5 + $0xf6c] sm:$0xf0] }
 0x1e6   :  { %v5992_v62 = vld [vmem:[#allocation5 + $0x910] sm:$0xf]  ;;  %v6793_v5 = vor.u32 %v7652_v60, %v6792_v59  ;;  %3746 = vmatpush.bf16.msrb.mxu2 %v6537_v0  ;;  %v3482_v60 = vpop.f32.mrf.mxu1 }
 0x1e7   :  { %v7452_v1 = vld [vmem:[#allocation5 + $0x92c] sm:$0xf0]  ;;  %v5258_v60 = vld [vmem:[#allocation5 + $0x370] sm:$0xf0] }
 0x1e8   :  { %v6248_v2 = vld [vmem:[#allocation5 + $0xb10] sm:$0xf]  ;;  %v5993_v11 = vor.u32 %v7452_v1, %v5992_v62  ;;  %3759 = vmatpush.bf16.msrb.mxu3 %v6793_v5 }
 0x1e9   :  { %v7516_v6 = vld [vmem:[#allocation5 + $0xb2c] sm:$0xf0] }
 0x1ea   :  { %v6504_v7 = vld [vmem:[#allocation5 + $0xd10] sm:$0xf]  ;;  %v6249_v13 = vor.u32 %v7516_v6, %v6248_v2  ;;  %3721 = vmatpush.bf16.msrb.mxu0 %v5993_v11 }
 0x1eb   :  { %v7580_v8 = vld [vmem:[#allocation5 + $0xd2c] sm:$0xf0] }
 0x1ec   :  { %v6760_v9 = vld [vmem:[#allocation5 + $0xf10] sm:$0xf]  ;;  %v6505_v14 = vor.u32 %v7580_v8, %v6504_v7  ;;  %3734 = vmatpush.bf16.msrb.mxu1 %v6249_v13 }
 0x1ed   :  { %v7644_v10 = vld [vmem:[#allocation5 + $0xf2c] sm:$0xf0] }
 0x1ee   :  { %v5960_v15 = vld [vmem:[#allocation5 + $0x8d0] sm:$0xf]  ;;  %v6761_v26 = vor.u32 %v7644_v10, %v6760_v9  ;;  %3747 = vmatpush.bf16.msrb.mxu2 %v6505_v14 }
 0x1ef   :  { %v7444_v16 = vld [vmem:[#allocation5 + $0x8ec] sm:$0xf0] }
 0x1f0   :  { %v6216_v17 = vld [vmem:[#allocation5 + $0xad0] sm:$0xf]  ;;  %v5961_v32 = vor.u32 %v7444_v16, %v5960_v15  ;;  %3760 = vmatpush.bf16.msrb.mxu3 %v6761_v26  ;;  %v7280_v26 = vld [vmem:[#allocation5 + $0x3d4] sm:$0xf] }
 0x1f1   :  { %v7508_v25 = vld [vmem:[#allocation5 + $0xaec] sm:$0xf0] }
 0x1f2   :  { %v6472_v27 = vld [vmem:[#allocation5 + $0xcd0] sm:$0xf]  ;;  %v6217_v33 = vor.u32 %v7508_v25, %v6216_v17  ;;  %3722 = vmatpush.bf16.msrb.mxu0 %v5961_v32  ;;  %v3508_v17 = vpop.f32.mrf.mxu3  ;;  %v7408_v32 = vld [vmem:[#allocation5 + $0x7d4] sm:$0xf] }
 0x1f3   :  { %v7572_v28 = vld [vmem:[#allocation5 + $0xcec] sm:$0xf0] }
 0x1f4   :  { %v6728_v29 = vld [vmem:[#allocation5 + $0xed0] sm:$0xf]  ;;  %v6473_v34 = vor.u32 %v7572_v28, %v6472_v27  ;;  %3735 = vmatpush.bf16.msrb.mxu1 %v6217_v33  ;;  %v5322_v27 = vld [vmem:[#allocation5 + $0x3f0] sm:$0xf0] }
 0x1f5   :  { %v7636_v30 = vld [vmem:[#allocation5 + $0xeec] sm:$0xf0]  ;;  %v7344_v28 = vld [vmem:[#allocation5 + $0x5d4] sm:$0xf] }
 0x1f6   :  { %v5928_v35 = vld [vmem:[#allocation5 + $0x890] sm:$0xf]  ;;  %v6729_v39 = vor.u32 %v7636_v30, %v6728_v29  ;;  %3748 = vmatpush.bf16.msrb.mxu2 %v6473_v34  ;;  %v5578_v29 = vld [vmem:[#allocation5 + $0x5f0] sm:$0xf0] }
 0x1f7   :  { %v7436_v36 = vld [vmem:[#allocation5 + $0x8ac] sm:$0xf0]  ;;  %v5834_v33 = vld [vmem:[#allocation5 + $0x7f0] sm:$0xf0] }
 0x1f8   :  { %v6184_v37 = vld [vmem:[#allocation5 + $0xa90] sm:$0xf]  ;;  %v5929_v50 = vor.u32 %v7436_v36, %v5928_v35  ;;  %3761 = vmatpush.bf16.msrb.mxu3 %v6729_v39  ;;  %v5069_v35 = vor.u32 %v7216_v21, %v5066_v23  ;;  %v5325_v36 = vor.u32 %v7280_v26, %v5322_v27  ;;  %v5034_v39 = vld [vmem:[#allocation5 + $0x1b0] sm:$0xf0]  ;;  %v3532_v27 = vpop.f32.mrf.mxu1 }
 0x1f9   :  { %v7500_v40 = vld [vmem:[#allocation5 + $0xaac] sm:$0xf0]  ;;  %v7184_v21 = vld [vmem:[#allocation5 + $0xd4] sm:$0xf] }
 0x1fa   :  { %v6440_v24 = vld [vmem:[#allocation5 + $0xc90] sm:$0xf]  ;;  %v6185_v55 = vor.u32 %v7500_v40, %v6184_v37  ;;  %3723 = vmatpush.bf16.msrb.mxu0 %v5929_v50  ;;  %v5581_v37 = vor.u32 %v7344_v28, %v5578_v29  ;;  %v7272_v40 = vld [vmem:[#allocation5 + $0x394] sm:$0xf]  ;;  %v5037_v50 = vor.u32 %v7208_v51, %v5034_v39 }
 0x1fb   :  { %v7564_v43 = vld [vmem:[#allocation5 + $0xcac] sm:$0xf0]  ;;  %v4938_v23 = vld [vmem:[#allocation5 + $0xf0] sm:$0xf0] }
 0x1fc   :  { %v6696_v47 = vld [vmem:[#allocation5 + $0xe90] sm:$0xf]  ;;  %v6441_v56 = vor.u32 %v7564_v43, %v6440_v24  ;;  %3736 = vmatpush.bf16.msrb.mxu1 %v6185_v55  ;;  %v5837_v24 = vor.u32 %v7408_v32, %v5834_v33  ;;  %v5290_v43 = vld [vmem:[#allocation5 + $0x3b0] sm:$0xf0]  ;;  %v5549_v55 = vor.u32 %v7336_v45, %v5546_v46 }
 0x1fd   :  { %v7628_v48 = vld [vmem:[#allocation5 + $0xeac] sm:$0xf0]  ;;  %v5293_v54 = vor.u32 %v7272_v40, %v5290_v43  ;;  %v7248_v26 = vld [vmem:[#allocation5 + $0x2d4] sm:$0xf] }
 0x1fe   :  { %v5896_v57 = vld [vmem:[#allocation5 + $0x850] sm:$0xf]  ;;  %v6697_v61 = vor.u32 %v7628_v48, %v6696_v47  ;;  %3749 = vmatpush.bf16.msrb.mxu2 %v6441_v56  ;;  %v7400_v47 = vld [vmem:[#allocation5 + $0x794] sm:$0xf] }
 0x1ff   :  { %v7428_v58 = vld [vmem:[#allocation5 + $0x86c] sm:$0xf0]  ;;  %v5802_v48 = vld [vmem:[#allocation5 + $0x7b0] sm:$0xf0] }
 0x200   :  { %v6152_v59 = vld [vmem:[#allocation5 + $0xa50] sm:$0xf]  ;;  %v5897_v4 = vor.u32 %v7428_v58, %v5896_v57  ;;  %3762 = vmatpush.bf16.msrb.mxu3 %v6697_v61  ;;  %v7200_v56 = vld [vmem:[#allocation5 + $0x154] sm:$0xf] }
 0x201   :  { %v7492_v62 = vld [vmem:[#allocation5 + $0xa6c] sm:$0xf0]  ;;  %v5002_v57 = vld [vmem:[#allocation5 + $0x170] sm:$0xf0] }
 0x202   :  { %v6408_v63 = vld [vmem:[#allocation5 + $0xc50] sm:$0xf]  ;;  %v6153_v7 = vor.u32 %v7492_v62, %v6152_v59  ;;  %3724 = vmatpush.bf16.msrb.mxu0 %v5897_v4  ;;  %v7264_v58 = vld [vmem:[#allocation5 + $0x354] sm:$0xf]  ;;  %v5805_v59 = vor.u32 %v7400_v47, %v5802_v48  ;;  %v3558_v48 = vpop.f32.mrf.mxu3 }
 0x203   :  { %v7556_v0 = vld [vmem:[#allocation5 + $0xc6c] sm:$0xf0]  ;;  %v7328_v61 = vld [vmem:[#allocation5 + $0x554] sm:$0xf] }
 0x204   :  { %v6664_v1 = vld [vmem:[#allocation5 + $0xe50] sm:$0xf]  ;;  %v6409_v8 = vor.u32 %v7556_v0, %v6408_v63  ;;  %3737 = vmatpush.bf16.msrb.mxu1 %v6153_v7  ;;  %v5514_v62 = vld [vmem:[#allocation5 + $0x570] sm:$0xf0] }
 0x205   :  { %v7620_v2 = vld [vmem:[#allocation5 + $0xe6c] sm:$0xf0]  ;;  %v7392_v63 = vld [vmem:[#allocation5 + $0x754] sm:$0xf]  ;;  %v5517_v4 = vor.u32 %v7328_v61, %v5514_v62 }
 0x206   :  { %v5864_v5 = vld [vmem:[#allocation5 + $0x810] sm:$0xf]  ;;  %v6665_v13 = vor.u32 %v7620_v2, %v6664_v1  ;;  %3750 = vmatpush.bf16.msrb.mxu2 %v6409_v8  ;;  %v5770_v0 = vld [vmem:[#allocation5 + $0x770] sm:$0xf0]  ;;  %v5005_v1 = vor.u32 %v7200_v56, %v5002_v57  ;;  %v5261_v2 = vor.u32 %v7264_v58, %v5258_v60 }
 0x207   :  { %v7420_v6 = vld [vmem:[#allocation5 + $0x82c] sm:$0xf0]  ;;  %v7256_v7 = vld [vmem:[#allocation5 + $0x314] sm:$0xf]  ;;  %v5773_v8 = vor.u32 %v7392_v63, %v5770_v0  ;;  %v3534_v63 = vpop.f32.mrf.mxu1 }
 0x208   :  { %v6120_v9 = vld [vmem:[#allocation5 + $0xa10] sm:$0xf]  ;;  %v5865_v25 = vor.u32 %v7420_v6, %v5864_v5  ;;  %3763 = vmatpush.bf16.msrb.mxu3 %v6665_v13  ;;  %v7192_v5 = vld [vmem:[#allocation5 + $0x114] sm:$0xf] }
 0x209   :  { %v7484_v10 = vld [vmem:[#allocation5 + $0xa2c] sm:$0xf0]  ;;  %v4970_v6 = vld [vmem:[#allocation5 + $0x130] sm:$0xf0] }
 0x20a   :  { %v6376_v11 = vld [vmem:[#allocation5 + $0xc10] sm:$0xf]  ;;  %v6121_v30 = vor.u32 %v7484_v10, %v6120_v9  ;;  %3725 = vmatpush.bf16.msrb.mxu0 %v5865_v25  ;;  %v5226_v9 = vld [vmem:[#allocation5 + $0x330] sm:$0xf0] }
 0x20b   :  { %v7548_v14 = vld [vmem:[#allocation5 + $0xc2c] sm:$0xf0]  ;;  %v7320_v10 = vld [vmem:[#allocation5 + $0x514] sm:$0xf] }
 0x20c   :  { %v6632_v15 = vld [vmem:[#allocation5 + $0xe10] sm:$0xf]  ;;  %v6377_v31 = vor.u32 %v7548_v14, %v6376_v11  ;;  %3738 = vmatpush.bf16.msrb.mxu1 %v6121_v30  ;;  %v5482_v11 = vld [vmem:[#allocation5 + $0x530] sm:$0xf0]  ;;  %v4973_v14 = vor.u32 %v7192_v5, %v4970_v6 }
 0x20d   :  { %v7612_v16 = vld [vmem:[#allocation5 + $0xe2c] sm:$0xf0]  ;;  %3726 = vmatmul.bf16.vlgmr.msrb.gmra.mxu0 %v8048_v41  ;;  %v5738_v13 = vld [vmem:[#allocation5 + $0x730] sm:$0xf0]  ;;  %v5485_v17 = vor.u32 %v7320_v10, %v5482_v11 }
 0x20e   :  { %v6633_v34 = vor.u32 %v7612_v16, %v6632_v15  ;;  %3751 = vmatpush.bf16.msrb.mxu2 %v6377_v31  ;;  %3770 = vmatpush.bf16.msra.mxu0 %v5069_v35  ;;  %v3519_v15 = vpop.f32.mrf.mxu0  ;;  %v5229_v16 = vor.u32 %v7256_v7, %v5226_v9  ;;  %v5741_v28 = vor.u32 %v7384_v12, %v5738_v13  ;;  %v5194_v29 = vld [vmem:[#allocation5 + $0x2f0] sm:$0xf0] }
 0x20f   :  { %3739 = vmatmul.bf16.vlgmr.msrb.gmra.mxu1 %v8052_v44  ;;  %v3520_v25 = vadd.f32 %v3519_v15, %v8103_v53  ;;  %v7312_v30 = vld [vmem:[#allocation5 + $0x4d4] sm:$0xf]  ;;  %v4941_v35 = vor.u32 %v7184_v21, %v4938_v23 }
 0x210   :  { %3764 = vmatpush.bf16.msrb.mxu3 %v6633_v34  ;;  %3783 = vmatpush.bf16.msra.mxu1 %v5325_v36  ;;  %v5450_v31 = vld [vmem:[#allocation5 + $0x4f0] sm:$0xf0]  ;;  %v5197_v36 = vor.u32 %v7248_v26, %v5194_v29  ;;  %v3560_v26 = vpop.f32.mrf.mxu3 }
 0x211   :  { %3752 = vmatmul.bf16.vlgmr.msrb.gmra.mxu2 %v8046_v38  ;;  %v7376_v32 = vld [vmem:[#allocation5 + $0x6d4] sm:$0xf]  ;;  %v3533_v34 = vadd.f32 %v3532_v27, %v3520_v25 }
 0x212   :  { %3796 = vmatpush.bf16.msra.mxu2 %v5581_v37  ;;  %3771 = vmatpush.bf16.msra.mxu0 %v5037_v50  ;;  %v5706_v33 = vld [vmem:[#allocation5 + $0x6f0] sm:$0xf0]  ;;  %v5453_v37 = vor.u32 %v7312_v30, %v5450_v31 }
 0x213   :  { %3765 = vmatmul.bf16.vlgmr.msrb.gmra.mxu3 %v8050_v42  ;;  %v7176_v51 = vld [vmem:[#allocation5 + $0x94] sm:$0xf]  ;;  %v5709_v53 = vor.u32 %v7376_v32, %v5706_v33 }
 0x214   :  { %3809 = vmatpush.bf16.msra.mxu3 %v5837_v24  ;;  %3784 = vmatpush.bf16.msra.mxu1 %v5293_v54  ;;  %v4906_v39 = vld [vmem:[#allocation5 + $0xb0] sm:$0xf0]  ;;  %v3545_v24 = vpop.f32.mrf.mxu2 }
 0x215   :  { %v7240_v40 = vld [vmem:[#allocation5 + $0x294] sm:$0xf]  ;;  %v3546_v47 = vadd.f32 %v3545_v24, %v3533_v34 }
 0x216   :  { %3797 = vmatpush.bf16.msra.mxu2 %v5549_v55  ;;  %3772 = vmatpush.bf16.msra.mxu0 %v5005_v1  ;;  %v5162_v43 = vld [vmem:[#allocation5 + $0x2b0] sm:$0xf0]  ;;  %v4909_v55 = vor.u32 %v7176_v51, %v4906_v39  ;;  %v3521_v57 = vpop.f32.mrf.mxu0 }
 0x217   :  { %v7304_v45 = vld [vmem:[#allocation5 + $0x494] sm:$0xf]  ;;  %v8110_v56 = vadd.f32 %v3558_v48, %v3546_v47  ;;  %v5165_v58 = vor.u32 %v7240_v40, %v5162_v43 }
 0x218   :  { %3810 = vmatpush.bf16.msra.mxu3 %v5805_v59  ;;  %3785 = vmatpush.bf16.msra.mxu1 %v5261_v2  ;;  %v5418_v46 = vld [vmem:[#allocation5 + $0x4b0] sm:$0xf0] }
 0x219   :  { %v7368_v50 = vld [vmem:[#allocation5 + $0x694] sm:$0xf]  ;;  %v5421_v59 = vor.u32 %v7304_v45, %v5418_v46 }
 0x21a   :  { %3798 = vmatpush.bf16.msra.mxu2 %v5517_v4  ;;  %3773 = vmatpush.bf16.msra.mxu0 %v4973_v14  ;;  %v5674_v54 = vld [vmem:[#allocation5 + $0x6b0] sm:$0xf0] }
 0x21b   :  { %v7168_v60 = vld [vmem:[#allocation5 + $0x54] sm:$0xf]  ;;  %v5677_v0 = vor.u32 %v7368_v50, %v5674_v54 }
 0x21c   :  { %3811 = vmatpush.bf16.msra.mxu3 %v5773_v8  ;;  %3786 = vmatpush.bf16.msra.mxu1 %v5229_v16  ;;  %v4874_v61 = vld [vmem:[#allocation5 + $0x70] sm:$0xf0]  ;;  %v3547_v15 = vpop.f32.mrf.mxu2 }
 0x21d   :  { %v7232_v62 = vld [vmem:[#allocation5 + $0x254] sm:$0xf]  ;;  %v4877_v7 = vor.u32 %v7168_v60, %v4874_v61 }
 0x21e   :  { %3799 = vmatpush.bf16.msra.mxu2 %v5485_v17  ;;  %3774 = vmatpush.bf16.msra.mxu0 %v4941_v35  ;;  %v5130_v1 = vld [vmem:[#allocation5 + $0x270] sm:$0xf0] }
 0x21f   :  { %v7296_v2 = vld [vmem:[#allocation5 + $0x454] sm:$0xf]  ;;  %v5133_v10 = vor.u32 %v7232_v62, %v5130_v1 }
 0x220   :  { %3812 = vmatpush.bf16.msra.mxu3 %v5741_v28  ;;  %3787 = vmatpush.bf16.msra.mxu1 %v5197_v36  ;;  %v5386_v4 = vld [vmem:[#allocation5 + $0x470] sm:$0xf0] }
 0x221   :  { %v7360_v5 = vld [vmem:[#allocation5 + $0x654] sm:$0xf]  ;;  %v5389_v11 = vor.u32 %v7296_v2, %v5386_v4 }
 0x222   :  { %3800 = vmatpush.bf16.msra.mxu2 %v5453_v37  ;;  %v5642_v6 = vld [vmem:[#allocation5 + $0x670] sm:$0xf0]  ;;  %3775 = vmatpush.bf16.msra.mxu0 %v4909_v55 }
 0x223   :  { %v7160_v8 = vld [vmem:[#allocation5 + $0x14] sm:$0xf]  ;;  %v5645_v16 = vor.u32 %v7360_v5, %v5642_v6 }
 0x224   :  { %3813 = vmatpush.bf16.msra.mxu3 %v5709_v53  ;;  %v4842_v9 = vld [vmem:[#allocation5 + $0x30] sm:$0xf0]  ;;  %3788 = vmatpush.bf16.msra.mxu1 %v5165_v58 }
 0x225   :  { %v7224_v12 = vld [vmem:[#allocation5 + $0x214] sm:$0xf]  ;;  %v4845_v29 = vor.u32 %v7160_v8, %v4842_v9 }
 0x226   :  { %3801 = vmatpush.bf16.msra.mxu2 %v5421_v59  ;;  %v5098_v13 = vld [vmem:[#allocation5 + $0x230] sm:$0xf0]  ;;  %3776 = vmatpush.bf16.msra.mxu0 %v4877_v7 }
 0x227   :  { %v7288_v14 = vld [vmem:[#allocation5 + $0x414] sm:$0xf]  ;;  %v5101_v33 = vor.u32 %v7224_v12, %v5098_v13 }
 0x228   :  { %3814 = vmatpush.bf16.msra.mxu3 %v5677_v0  ;;  %v5354_v17 = vld [vmem:[#allocation5 + $0x430] sm:$0xf0]  ;;  %3789 = vmatpush.bf16.msra.mxu1 %v5133_v10 }
 0x229   :  { %v7352_v21 = vld [vmem:[#allocation5 + $0x614] sm:$0xf]  ;;  %v5357_v34 = vor.u32 %v7288_v14, %v5354_v17 }
 0x22a   :  { %v5610_v23 = vld [vmem:[#allocation5 + $0x630] sm:$0xf0]  ;;  %3802 = vmatpush.bf16.msra.mxu2 %v5389_v11  ;;  %3777 = vmatpush.bf16.msra.mxu0 %v4845_v29  ;;  %v649_v11 = vperm.slane %v8100_v3, 3 }
 0x22b   :  { %v7472_v25 = vld [vmem:[#allocation5 + $0x9d4] sm:$0xf]  ;;  %v5613_v37 = vor.u32 %v7352_v21, %v5610_v23  ;;  %v3571_v23 = vpop.f32.mrf.mxu0 }
 0x22c   :  { %v6090_v27 = vld [vmem:[#allocation5 + $0x9f0] sm:$0xf0]  ;;  %3815 = vmatpush.bf16.msra.mxu3 %v5645_v16  ;;  %3790 = vmatpush.bf16.msra.mxu1 %v5101_v33 }
 0x22d   :  { %v7536_v28 = vld [vmem:[#allocation5 + $0xbd4] sm:$0xf]  ;;  %v6093_v51 = vor.u32 %v7472_v25, %v6090_v27  ;;  %3778 = vmatmul.bf16.vlgmr.msra.gmra.mxu0 %v8036_v19 }
 0x22e   :  { %v6346_v30 = vld [vmem:[#allocation5 + $0xbf0] sm:$0xf0]  ;;  %3803 = vmatpush.bf16.msra.mxu2 %v5357_v34 }
 0x22f   :  { %v7600_v31 = vld [vmem:[#allocation5 + $0xdd4] sm:$0xf]  ;;  %v6349_v39 = vor.u32 %v7536_v28, %v6346_v30  ;;  %3822 = vmatpush.bf16.msrb.mxu0 %v6093_v51  ;;  %3791 = vmatmul.bf16.vlgmr.msra.gmra.mxu1 %v8040_v22  ;;  %v3572_v30 = vadd.f32 %v3571_v23, %v649_v11 }
 0x230   :  { %v6602_v32 = vld [vmem:[#allocation5 + $0xdf0] sm:$0xf0]  ;;  %3816 = vmatpush.bf16.msra.mxu3 %v5613_v37 }
 0x231   :  { %v7664_v35 = vld [vmem:[#allocation5 + $0xfd4] sm:$0xf]  ;;  %v6605_v40 = vor.u32 %v7600_v31, %v6602_v32  ;;  %3835 = vmatpush.bf16.msrb.mxu1 %v6349_v39  ;;  %3804 = vmatmul.bf16.vlgmr.msra.gmra.mxu2 %v8034_v18  ;;  %v3584_v31 = vpop.f32.mrf.mxu1 }
 0x232   :  { %v6858_v36 = vld [vmem:[#allocation5 + $0xff0] sm:$0xf0]  ;;  %v3585_v37 = vadd.f32 %v3584_v31, %v3572_v30  ;;  %v5072_v30 = vld [vmem:[#allocation5 + $0x1d8] sm:$0xf] }
 0x233   :  { %v7464_v24 = vld [vmem:[#allocation5 + $0x994] sm:$0xf]  ;;  %v6861_v45 = vor.u32 %v7664_v35, %v6858_v36  ;;  %3848 = vmatpush.bf16.msrb.mxu2 %v6605_v40  ;;  %3817 = vmatmul.bf16.vlgmr.msra.gmra.mxu3 %v8038_v20  ;;  %v7221_v31 = vld [vmem:[#allocation5 + $0x1f4] sm:$0xf0] }
 0x234   :  { %v6058_v53 = vld [vmem:[#allocation5 + $0x9b0] sm:$0xf0] }
 0x235   :  { %v7528_v43 = vld [vmem:[#allocation5 + $0xb94] sm:$0xf]  ;;  %v6061_v55 = vor.u32 %v7464_v24, %v6058_v53  ;;  %3861 = vmatpush.bf16.msrb.mxu3 %v6861_v45  ;;  %v3597_v45 = vpop.f32.mrf.mxu2 }
 0x236   :  { %v6314_v46 = vld [vmem:[#allocation5 + $0xbb0] sm:$0xf0] }
 0x237   :  { %v7592_v47 = vld [vmem:[#allocation5 + $0xd94] sm:$0xf]  ;;  %v6317_v57 = vor.u32 %v7528_v43, %v6314_v46  ;;  %3823 = vmatpush.bf16.msrb.mxu0 %v6061_v55  ;;  %v3610_v55 = vpop.f32.mrf.mxu3 }
 0x238   :  { %v6570_v48 = vld [vmem:[#allocation5 + $0xdb0] sm:$0xf0] }
 0x239   :  { %v7656_v50 = vld [vmem:[#allocation5 + $0xf94] sm:$0xf]  ;;  %v6573_v58 = vor.u32 %v7592_v47, %v6570_v48  ;;  %3836 = vmatpush.bf16.msrb.mxu1 %v6317_v57 }
 0x23a   :  { %v6826_v54 = vld [vmem:[#allocation5 + $0xfb0] sm:$0xf0] }
 0x23b   :  { %v7456_v59 = vld [vmem:[#allocation5 + $0x954] sm:$0xf]  ;;  %v6829_v62 = vor.u32 %v7656_v50, %v6826_v54  ;;  %3849 = vmatpush.bf16.msrb.mxu2 %v6573_v58  ;;  %v3598_v54 = vadd.f32 %v3597_v45, %v3585_v37  ;;  %v5040_v45 = vld [vmem:[#allocation5 + $0x198] sm:$0xf] }
 0x23c   :  { %v6026_v60 = vld [vmem:[#allocation5 + $0x970] sm:$0xf0] }
 0x23d   :  { %v7520_v61 = vld [vmem:[#allocation5 + $0xb54] sm:$0xf]  ;;  %v6029_v5 = vor.u32 %v7456_v59, %v6026_v60  ;;  %3862 = vmatpush.bf16.msrb.mxu3 %v6829_v62  ;;  %v8117_v60 = vadd.f32 %v3610_v55, %v3598_v54  ;;  %v3599_v23 = vpop.f32.mrf.mxu2  ;;  %v5552_v54 = vld [vmem:[#allocation5 + $0x598] sm:$0xf] }
 0x23e   :  { %v6282_v63 = vld [vmem:[#allocation5 + $0xb70] sm:$0xf0]  ;;  %v7341_v55 = vld [vmem:[#allocation5 + $0x5b4] sm:$0xf0] }
 0x23f   :  { %v7584_v0 = vld [vmem:[#allocation5 + $0xd54] sm:$0xf]  ;;  %v6285_v7 = vor.u32 %v7520_v61, %v6282_v63  ;;  %3824 = vmatpush.bf16.msrb.mxu0 %v6029_v5  ;;  %v3573_v61 = vpop.f32.mrf.mxu0  ;;  %v5744_v23 = vld [vmem:[#allocation5 + $0x718] sm:$0xf] }
 0x240   :  { %v6538_v1 = vld [vmem:[#allocation5 + $0xd70] sm:$0xf0] }
 0x241   :  { %v7648_v2 = vld [vmem:[#allocation5 + $0xf54] sm:$0xf]  ;;  %v6541_v8 = vor.u32 %v7584_v0, %v6538_v1  ;;  %3837 = vmatpush.bf16.msrb.mxu1 %v6285_v7 }
 0x242   :  { %v6794_v4 = vld [vmem:[#allocation5 + $0xf70] sm:$0xf0] }
 0x243   :  { %v7448_v6 = vld [vmem:[#allocation5 + $0x914] sm:$0xf]  ;;  %v6797_v12 = vor.u32 %v7648_v2, %v6794_v4  ;;  %3850 = vmatpush.bf16.msrb.mxu2 %v6541_v8  ;;  %v3586_v4 = vpop.f32.mrf.mxu1 }
 0x244   :  { %v5994_v9 = vld [vmem:[#allocation5 + $0x930] sm:$0xf0]  ;;  %v7269_v4 = vld [vmem:[#allocation5 + $0x374] sm:$0xf0] }
 0x245   :  { %v7512_v10 = vld [vmem:[#allocation5 + $0xb14] sm:$0xf]  ;;  %v5997_v21 = vor.u32 %v7448_v6, %v5994_v9  ;;  %3863 = vmatpush.bf16.msrb.mxu3 %v6797_v12 }
 0x246   :  { %v6250_v13 = vld [vmem:[#allocation5 + $0xb30] sm:$0xf0] }
 0x247   :  { %v7576_v14 = vld [vmem:[#allocation5 + $0xd14] sm:$0xf]  ;;  %v6253_v26 = vor.u32 %v7512_v10, %v6250_v13  ;;  %3825 = vmatpush.bf16.msrb.mxu0 %v5997_v21 }
 0x248   :  { %v6506_v15 = vld [vmem:[#allocation5 + $0xd30] sm:$0xf0] }
 0x249   :  { %v7640_v16 = vld [vmem:[#allocation5 + $0xf14] sm:$0xf]  ;;  %v6509_v25 = vor.u32 %v7576_v14, %v6506_v15  ;;  %3838 = vmatpush.bf16.msrb.mxu1 %v6253_v26 }
 0x24a   :  { %v6762_v17 = vld [vmem:[#allocation5 + $0xf30] sm:$0xf0] }
 0x24b   :  { %v7440_v27 = vld [vmem:[#allocation5 + $0x8d4] sm:$0xf]  ;;  %v6765_v3 = vor.u32 %v7640_v16, %v6762_v17  ;;  %3851 = vmatpush.bf16.msrb.mxu2 %v6509_v25 }
 0x24c   :  { %v5962_v28 = vld [vmem:[#allocation5 + $0x8f0] sm:$0xf0] }
 0x24d   :  { %v7504_v29 = vld [vmem:[#allocation5 + $0xad4] sm:$0xf]  ;;  %v5965_v51 = vor.u32 %v7440_v27, %v5962_v28  ;;  %3864 = vmatpush.bf16.msrb.mxu3 %v6765_v3  ;;  %v5328_v3 = vld [vmem:[#allocation5 + $0x3d8] sm:$0xf] }
 0x24e   :  { %v6218_v32 = vld [vmem:[#allocation5 + $0xaf0] sm:$0xf0] }
 0x24f   :  { %v7568_v33 = vld [vmem:[#allocation5 + $0xcd4] sm:$0xf]  ;;  %v6221_v39 = vor.u32 %v7504_v29, %v6218_v32  ;;  %3826 = vmatpush.bf16.msrb.mxu0 %v5965_v51  ;;  %v3612_v29 = vpop.f32.mrf.mxu3  ;;  %v5840_v51 = vld [vmem:[#allocation5 + $0x7d8] sm:$0xf] }
 0x250   :  { %v6474_v34 = vld [vmem:[#allocation5 + $0xcf0] sm:$0xf0] }
 0x251   :  { %v7632_v35 = vld [vmem:[#allocation5 + $0xed4] sm:$0xf]  ;;  %v6477_v40 = vor.u32 %v7568_v33, %v6474_v34  ;;  %3839 = vmatpush.bf16.msrb.mxu1 %v6221_v39  ;;  %v7285_v33 = vld [vmem:[#allocation5 + $0x3f4] sm:$0xf0] }
 0x252   :  { %v6730_v36 = vld [vmem:[#allocation5 + $0xef0] sm:$0xf0]  ;;  %v5584_v34 = vld [vmem:[#allocation5 + $0x5d8] sm:$0xf] }
 0x253   :  { %v7432_v24 = vld [vmem:[#allocation5 + $0x894] sm:$0xf]  ;;  %v6733_v46 = vor.u32 %v7632_v35, %v6730_v36  ;;  %3852 = vmatpush.bf16.msrb.mxu2 %v6477_v40  ;;  %v7349_v35 = vld [vmem:[#allocation5 + $0x5f4] sm:$0xf0] }
 0x254   :  { %v5930_v53 = vld [vmem:[#allocation5 + $0x8b0] sm:$0xf0]  ;;  %v7413_v39 = vld [vmem:[#allocation5 + $0x7f4] sm:$0xf0] }
 0x255   :  { %v7496_v43 = vld [vmem:[#allocation5 + $0xa94] sm:$0xf]  ;;  %v5933_v59 = vor.u32 %v7432_v24, %v5930_v53  ;;  %3865 = vmatpush.bf16.msrb.mxu3 %v6733_v46  ;;  %v5073_v24 = vor.u32 %v7221_v31, %v5072_v30  ;;  %v5329_v53 = vor.u32 %v7285_v33, %v5328_v3  ;;  %v7213_v46 = vld [vmem:[#allocation5 + $0x1b4] sm:$0xf0]  ;;  %v3636_v33 = vpop.f32.mrf.mxu1 }
 0x256   :  { %v6186_v47 = vld [vmem:[#allocation5 + $0xab0] sm:$0xf0]  ;;  %v4944_v30 = vld [vmem:[#allocation5 + $0xd8] sm:$0xf] }
 0x257   :  { %v7560_v48 = vld [vmem:[#allocation5 + $0xc94] sm:$0xf]  ;;  %v6189_v62 = vor.u32 %v7496_v43, %v6186_v47  ;;  %3827 = vmatpush.bf16.msrb.mxu0 %v5933_v59  ;;  %v5585_v43 = vor.u32 %v7349_v35, %v5584_v34  ;;  %v5296_v47 = vld [vmem:[#allocation5 + $0x398] sm:$0xf]  ;;  %v5041_v59 = vor.u32 %v7213_v46, %v5040_v45 }
 0x258   :  { %v6442_v50 = vld [vmem:[#allocation5 + $0xcb0] sm:$0xf0]  ;;  %v7189_v31 = vld [vmem:[#allocation5 + $0xf4] sm:$0xf0] }
 0x259   :  { %v7624_v57 = vld [vmem:[#allocation5 + $0xe94] sm:$0xf]  ;;  %v6445_v63 = vor.u32 %v7560_v48, %v6442_v50  ;;  %3840 = vmatpush.bf16.msrb.mxu1 %v6189_v62  ;;  %v5841_v48 = vor.u32 %v7413_v39, %v5840_v51  ;;  %v7277_v50 = vld [vmem:[#allocation5 + $0x3b4] sm:$0xf0]  ;;  %v5553_v62 = vor.u32 %v7341_v55, %v5552_v54 }
 0x25a   :  { %v6698_v58 = vld [vmem:[#allocation5 + $0xeb0] sm:$0xf0]  ;;  %v5297_v61 = vor.u32 %v7277_v50, %v5296_v47  ;;  %v5200_v3 = vld [vmem:[#allocation5 + $0x2d8] sm:$0xf] }
 0x25b   :  { %v7424_v0 = vld [vmem:[#allocation5 + $0x854] sm:$0xf]  ;;  %v6701_v5 = vor.u32 %v7624_v57, %v6698_v58  ;;  %3853 = vmatpush.bf16.msrb.mxu2 %v6445_v63  ;;  %v5808_v57 = vld [vmem:[#allocation5 + $0x798] sm:$0xf] }
 0x25c   :  { %v5898_v1 = vld [vmem:[#allocation5 + $0x870] sm:$0xf0]  ;;  %v7405_v58 = vld [vmem:[#allocation5 + $0x7b4] sm:$0xf0] }
 0x25d   :  { %v7488_v2 = vld [vmem:[#allocation5 + $0xa54] sm:$0xf]  ;;  %v5901_v11 = vor.u32 %v7424_v0, %v5898_v1  ;;  %3866 = vmatpush.bf16.msrb.mxu3 %v6701_v5  ;;  %v5008_v63 = vld [vmem:[#allocation5 + $0x158] sm:$0xf] }
 0x25e   :  { %v6154_v6 = vld [vmem:[#allocation5 + $0xa70] sm:$0xf0]  ;;  %v7205_v0 = vld [vmem:[#allocation5 + $0x174] sm:$0xf0] }
 0x25f   :  { %v7552_v7 = vld [vmem:[#allocation5 + $0xc54] sm:$0xf]  ;;  %v6157_v14 = vor.u32 %v7488_v2, %v6154_v6  ;;  %3828 = vmatpush.bf16.msrb.mxu0 %v5901_v11  ;;  %v5264_v1 = vld [vmem:[#allocation5 + $0x358] sm:$0xf]  ;;  %v5809_v2 = vor.u32 %v7405_v58, %v5808_v57  ;;  %v3662_v58 = vpop.f32.mrf.mxu3 }
 0x260   :  { %v6410_v8 = vld [vmem:[#allocation5 + $0xc70] sm:$0xf0]  ;;  %v5520_v5 = vld [vmem:[#allocation5 + $0x558] sm:$0xf] }
 0x261   :  { %v7616_v9 = vld [vmem:[#allocation5 + $0xe54] sm:$0xf]  ;;  %v6413_v15 = vor.u32 %v7552_v7, %v6410_v8  ;;  %3841 = vmatpush.bf16.msrb.mxu1 %v6157_v14  ;;  %v7333_v6 = vld [vmem:[#allocation5 + $0x574] sm:$0xf0] }
 0x262   :  { %v6666_v10 = vld [vmem:[#allocation5 + $0xe70] sm:$0xf0]  ;;  %v5776_v7 = vld [vmem:[#allocation5 + $0x758] sm:$0xf]  ;;  %v5521_v11 = vor.u32 %v7333_v6, %v5520_v5 }
 0x263   :  { %v7416_v12 = vld [vmem:[#allocation5 + $0x814] sm:$0xf]  ;;  %v6669_v26 = vor.u32 %v7616_v9, %v6666_v10  ;;  %3854 = vmatpush.bf16.msrb.mxu2 %v6413_v15  ;;  %v7397_v8 = vld [vmem:[#allocation5 + $0x774] sm:$0xf0]  ;;  %v5009_v9 = vor.u32 %v7205_v0, %v5008_v63  ;;  %v5265_v10 = vor.u32 %v7269_v4, %v5264_v1 }
 0x264   :  { %v5866_v13 = vld [vmem:[#allocation5 + $0x830] sm:$0xf0]  ;;  %v5232_v14 = vld [vmem:[#allocation5 + $0x318] sm:$0xf]  ;;  %v5777_v15 = vor.u32 %v7397_v8, %v5776_v7  ;;  %v3638_v7 = vpop.f32.mrf.mxu1 }
 0x265   :  { %v7480_v16 = vld [vmem:[#allocation5 + $0xa14] sm:$0xf]  ;;  %v5869_v32 = vor.u32 %v7416_v12, %v5866_v13  ;;  %3867 = vmatpush.bf16.msrb.mxu3 %v6669_v26  ;;  %v4976_v12 = vld [vmem:[#allocation5 + $0x118] sm:$0xf] }
 0x266   :  { %v6122_v17 = vld [vmem:[#allocation5 + $0xa30] sm:$0xf0]  ;;  %v7197_v13 = vld [vmem:[#allocation5 + $0x134] sm:$0xf0] }
 0x267   :  { %v7544_v21 = vld [vmem:[#allocation5 + $0xc14] sm:$0xf]  ;;  %v6125_v36 = vor.u32 %v7480_v16, %v6122_v17  ;;  %3829 = vmatpush.bf16.msrb.mxu0 %v5869_v32  ;;  %v7261_v16 = vld [vmem:[#allocation5 + $0x334] sm:$0xf0] }
 0x268   :  { %v6378_v25 = vld [vmem:[#allocation5 + $0xc30] sm:$0xf0]  ;;  %v5488_v17 = vld [vmem:[#allocation5 + $0x518] sm:$0xf] }
 0x269   :  { %v7608_v27 = vld [vmem:[#allocation5 + $0xe14] sm:$0xf]  ;;  %v6381_v37 = vor.u32 %v7544_v21, %v6378_v25  ;;  %3842 = vmatpush.bf16.msrb.mxu1 %v6125_v36  ;;  %v7325_v21 = vld [vmem:[#allocation5 + $0x534] sm:$0xf0]  ;;  %v4977_v25 = vor.u32 %v7197_v13, %v4976_v12 }
 0x26a   :  { %v6634_v28 = vld [vmem:[#allocation5 + $0xe30] sm:$0xf0]  ;;  %3830 = vmatmul.bf16.vlgmr.msrb.gmra.mxu0 %v8048_v41  ;;  %v7389_v26 = vld [vmem:[#allocation5 + $0x734] sm:$0xf0]  ;;  %v5489_v29 = vor.u32 %v7325_v21, %v5488_v17 }
 0x26b   :  { %v6637_v40 = vor.u32 %v7608_v27, %v6634_v28  ;;  %3855 = vmatpush.bf16.msrb.mxu2 %v6381_v37  ;;  %3874 = vmatpush.bf16.msra.mxu0 %v5073_v24  ;;  %v3623_v27 = vpop.f32.mrf.mxu0  ;;  %v5233_v28 = vor.u32 %v7261_v16, %v5232_v14  ;;  %v5745_v34 = vor.u32 %v7389_v26, %v5744_v23  ;;  %v7253_v35 = vld [vmem:[#allocation5 + $0x2f4] sm:$0xf0] }
 0x26c   :  { %3843 = vmatmul.bf16.vlgmr.msrb.gmra.mxu1 %v8052_v44  ;;  %v3624_v32 = vadd.f32 %v3623_v27, %v8117_v60  ;;  %v5456_v36 = vld [vmem:[#allocation5 + $0x4d8] sm:$0xf]  ;;  %v4945_v24 = vor.u32 %v7189_v31, %v4944_v30 }
 0x26d   :  { %3868 = vmatpush.bf16.msrb.mxu3 %v6637_v40  ;;  %3887 = vmatpush.bf16.msra.mxu1 %v5329_v53  ;;  %v7317_v37 = vld [vmem:[#allocation5 + $0x4f4] sm:$0xf0]  ;;  %v5201_v53 = vor.u32 %v7253_v35, %v5200_v3  ;;  %v3664_v3 = vpop.f32.mrf.mxu3 }
 0x26e   :  { %3856 = vmatmul.bf16.vlgmr.msrb.gmra.mxu2 %v8046_v38  ;;  %v5712_v51 = vld [vmem:[#allocation5 + $0x6d8] sm:$0xf]  ;;  %v3637_v40 = vadd.f32 %v3636_v33, %v3624_v32 }
 0x26f   :  { %3900 = vmatpush.bf16.msra.mxu2 %v5585_v43  ;;  %3875 = vmatpush.bf16.msra.mxu0 %v5041_v59  ;;  %v7381_v39 = vld [vmem:[#allocation5 + $0x6f4] sm:$0xf0]  ;;  %v5457_v43 = vor.u32 %v7317_v37, %v5456_v36 }
 0x270   :  { %3869 = vmatmul.bf16.vlgmr.msrb.gmra.mxu3 %v8050_v42  ;;  %v4912_v45 = vld [vmem:[#allocation5 + $0x98] sm:$0xf]  ;;  %v5713_v60 = vor.u32 %v7381_v39, %v5712_v51 }
 0x271   :  { %3913 = vmatpush.bf16.msra.mxu3 %v5841_v48  ;;  %3888 = vmatpush.bf16.msra.mxu1 %v5297_v61  ;;  %v7181_v46 = vld [vmem:[#allocation5 + $0xb4] sm:$0xf0]  ;;  %v3649_v48 = vpop.f32.mrf.mxu2 }
 0x272   :  { %v5168_v47 = vld [vmem:[#allocation5 + $0x298] sm:$0xf]  ;;  %v3650_v57 = vadd.f32 %v3649_v48, %v3637_v40 }
 0x273   :  { %3901 = vmatpush.bf16.msra.mxu2 %v5553_v62  ;;  %3876 = vmatpush.bf16.msra.mxu0 %v5009_v9  ;;  %v7245_v50 = vld [vmem:[#allocation5 + $0x2b4] sm:$0xf0]  ;;  %v4913_v62 = vor.u32 %v7181_v46, %v4912_v45  ;;  %v3625_v0 = vpop.f32.mrf.mxu0 }
 0x274   :  { %v5424_v54 = vld [vmem:[#allocation5 + $0x498] sm:$0xf]  ;;  %v8124_v63 = vadd.f32 %v3662_v58, %v3650_v57  ;;  %v5169_v1 = vor.u32 %v7245_v50, %v5168_v47 }
 0x275   :  { %3914 = vmatpush.bf16.msra.mxu3 %v5809_v2  ;;  %3889 = vmatpush.bf16.msra.mxu1 %v5265_v10  ;;  %v7309_v55 = vld [vmem:[#allocation5 + $0x4b4] sm:$0xf0] }
 0x276   :  { %v5680_v59 = vld [vmem:[#allocation5 + $0x698] sm:$0xf]  ;;  %v5425_v2 = vor.u32 %v7309_v55, %v5424_v54 }
 0x277   :  { %3902 = vmatpush.bf16.msra.mxu2 %v5521_v11  ;;  %3877 = vmatpush.bf16.msra.mxu0 %v4977_v25  ;;  %v7373_v61 = vld [vmem:[#allocation5 + $0x6b4] sm:$0xf0] }
 0x278   :  { %v4880_v4 = vld [vmem:[#allocation5 + $0x58] sm:$0xf]  ;;  %v5681_v8 = vor.u32 %v7373_v61, %v5680_v59 }
 0x279   :  { %3915 = vmatpush.bf16.msra.mxu3 %v5777_v15  ;;  %3890 = vmatpush.bf16.msra.mxu1 %v5233_v28  ;;  %v7173_v5 = vld [vmem:[#allocation5 + $0x74] sm:$0xf0]  ;;  %v3651_v27 = vpop.f32.mrf.mxu2 }
 0x27a   :  { %v5136_v6 = vld [vmem:[#allocation5 + $0x258] sm:$0xf]  ;;  %v4881_v14 = vor.u32 %v7173_v5, %v4880_v4 }
 0x27b   :  { %3903 = vmatpush.bf16.msra.mxu2 %v5489_v29  ;;  %3878 = vmatpush.bf16.msra.mxu0 %v4945_v24  ;;  %v7237_v9 = vld [vmem:[#allocation5 + $0x274] sm:$0xf0]  ;;  %v3675_v3 = vpop.f32.mrf.mxu0 }
 0x27c   :  { %v5392_v10 = vld [vmem:[#allocation5 + $0x458] sm:$0xf]  ;;  %v5137_v17 = vor.u32 %v7237_v9, %v5136_v6 }
 0x27d   :  { %3916 = vmatpush.bf16.msra.mxu3 %v5745_v34  ;;  %3891 = vmatpush.bf16.msra.mxu1 %v5201_v53  ;;  %v7301_v11 = vld [vmem:[#allocation5 + $0x474] sm:$0xf0] }
 0x27e   :  { %v5648_v12 = vld [vmem:[#allocation5 + $0x658] sm:$0xf]  ;;  %v5393_v21 = vor.u32 %v7301_v11, %v5392_v10 }
 0x27f   :  { %3904 = vmatpush.bf16.msra.mxu2 %v5457_v43  ;;  %v7365_v13 = vld [vmem:[#allocation5 + $0x674] sm:$0xf0]  ;;  %3879 = vmatpush.bf16.msra.mxu0 %v4913_v62 }
 0x280   :  { %v4848_v15 = vld [vmem:[#allocation5 + $0x18] sm:$0xf]  ;;  %v5649_v28 = vor.u32 %v7365_v13, %v5648_v12 }
 0x281   :  { %3917 = vmatpush.bf16.msra.mxu3 %v5713_v60  ;;  %v7165_v16 = vld [vmem:[#allocation5 + $0x34] sm:$0xf0]  ;;  %3892 = vmatpush.bf16.msra.mxu1 %v5169_v1 }
 0x282   :  { %v5104_v23 = vld [vmem:[#allocation5 + $0x218] sm:$0xf]  ;;  %v4849_v35 = vor.u32 %v7165_v16, %v4848_v15 }
 0x283   :  { %3905 = vmatpush.bf16.msra.mxu2 %v5425_v2  ;;  %v7229_v26 = vld [vmem:[#allocation5 + $0x234] sm:$0xf0]  ;;  %3880 = vmatpush.bf16.msra.mxu0 %v4881_v14 }
 0x284   :  { %v5360_v25 = vld [vmem:[#allocation5 + $0x418] sm:$0xf]  ;;  %v5105_v39 = vor.u32 %v7229_v26, %v5104_v23 }
 0x285   :  { %3918 = vmatpush.bf16.msra.mxu3 %v5681_v8  ;;  %v7293_v29 = vld [vmem:[#allocation5 + $0x434] sm:$0xf0]  ;;  %3893 = vmatpush.bf16.msra.mxu1 %v5137_v17 }
 0x286   :  { %v5616_v30 = vld [vmem:[#allocation5 + $0x618] sm:$0xf]  ;;  %v5361_v40 = vor.u32 %v7293_v29, %v5360_v25 }
 0x287   :  { %v7357_v31 = vld [vmem:[#allocation5 + $0x634] sm:$0xf0]  ;;  %3906 = vmatpush.bf16.msra.mxu2 %v5393_v21  ;;  %3881 = vmatpush.bf16.msra.mxu0 %v4849_v35  ;;  %v8130_v21 = vld [vmem:[#allocation7] sm:$0xff] }
 0x288   :  { %v6096_v32 = vld [vmem:[#allocation5 + $0x9d8] sm:$0xf]  ;;  %v5617_v43 = vor.u32 %v7357_v31, %v5616_v30  ;;  %v650_v23 = vperm.slane %v8130_v21, 4 }
 0x289   :  { %v7477_v33 = vld [vmem:[#allocation5 + $0x9f4] sm:$0xf0]  ;;  %3919 = vmatpush.bf16.msra.mxu3 %v5649_v28  ;;  %3894 = vmatpush.bf16.msra.mxu1 %v5105_v39 }
 0x28a   :  { %v6352_v34 = vld [vmem:[#allocation5 + $0xbd8] sm:$0xf]  ;;  %v6097_v45 = vor.u32 %v7477_v33, %v6096_v32  ;;  %3882 = vmatmul.bf16.vlgmr.msra.gmra.mxu0 %v8036_v19 }
 0x28b   :  { %v7541_v36 = vld [vmem:[#allocation5 + $0xbf4] sm:$0xf0]  ;;  %3907 = vmatpush.bf16.msra.mxu2 %v5361_v40 }
 0x28c   :  { %v6608_v37 = vld [vmem:[#allocation5 + $0xdd8] sm:$0xf]  ;;  %v6353_v46 = vor.u32 %v7541_v36, %v6352_v34  ;;  %3926 = vmatpush.bf16.msrb.mxu0 %v6097_v45  ;;  %3895 = vmatmul.bf16.vlgmr.msra.gmra.mxu1 %v8040_v22 }
 0x28d   :  { %v7605_v51 = vld [vmem:[#allocation5 + $0xdf4] sm:$0xf0]  ;;  %3920 = vmatpush.bf16.msra.mxu3 %v5617_v43 }
 0x28e   :  { %v6864_v24 = vld [vmem:[#allocation5 + $0xfd8] sm:$0xf]  ;;  %v6609_v47 = vor.u32 %v7605_v51, %v6608_v37  ;;  %3939 = vmatpush.bf16.msrb.mxu1 %v6353_v46  ;;  %3908 = vmatmul.bf16.vlgmr.msra.gmra.mxu2 %v8034_v18  ;;  %v3676_v37 = vadd.f32 %v3675_v3, %v650_v23  ;;  %v3688_v51 = vpop.f32.mrf.mxu1 }
 0x28f   :  { %v7669_v53 = vld [vmem:[#allocation5 + $0xff4] sm:$0xf0] }
 0x290   :  { %v6064_v48 = vld [vmem:[#allocation5 + $0x998] sm:$0xf]  ;;  %v6865_v54 = vor.u32 %v7669_v53, %v6864_v24  ;;  %3952 = vmatpush.bf16.msrb.mxu2 %v6609_v47  ;;  %3921 = vmatmul.bf16.vlgmr.msra.gmra.mxu3 %v8038_v20  ;;  %v3689_v46 = vadd.f32 %v3688_v51, %v3676_v37 }
 0x291   :  { %v7469_v60 = vld [vmem:[#allocation5 + $0x9b4] sm:$0xf0] }
 0x292   :  { %v6320_v50 = vld [vmem:[#allocation5 + $0xb98] sm:$0xf]  ;;  %v6065_v62 = vor.u32 %v7469_v60, %v6064_v48  ;;  %3965 = vmatpush.bf16.msrb.mxu3 %v6865_v54 }
 0x293   :  { %v7533_v55 = vld [vmem:[#allocation5 + $0xbb4] sm:$0xf0] }
 0x294   :  { %v6576_v57 = vld [vmem:[#allocation5 + $0xd98] sm:$0xf]  ;;  %v6321_v0 = vor.u32 %v7533_v55, %v6320_v50  ;;  %3927 = vmatpush.bf16.msrb.mxu0 %v6065_v62 }
 0x295   :  { %v7597_v58 = vld [vmem:[#allocation5 + $0xdb4] sm:$0xf0] }
 0x296   :  { %v6832_v59 = vld [vmem:[#allocation5 + $0xf98] sm:$0xf]  ;;  %v6577_v1 = vor.u32 %v7597_v58, %v6576_v57  ;;  %3940 = vmatpush.bf16.msrb.mxu1 %v6321_v0  ;;  %v3701_v57 = vpop.f32.mrf.mxu2 }
 0x297   :  { %v7661_v61 = vld [vmem:[#allocation5 + $0xfb4] sm:$0xf0]  ;;  %v3702_v0 = vadd.f32 %v3701_v57, %v3689_v46  ;;  %v5586_v46 = vld [vmem:[#allocation5 + $0x5f8] sm:$0xf0] }
 0x298   :  { %v6032_v2 = vld [vmem:[#allocation5 + $0x958] sm:$0xf]  ;;  %v6833_v6 = vor.u32 %v7661_v61, %v6832_v59  ;;  %3953 = vmatpush.bf16.msrb.mxu2 %v6577_v1  ;;  %v3714_v1 = vpop.f32.mrf.mxu3 }
 0x299   :  { %v7461_v4 = vld [vmem:[#allocation5 + $0x974] sm:$0xf0] }
 0x29a   :  { %v6288_v5 = vld [vmem:[#allocation5 + $0xb58] sm:$0xf]  ;;  %v6033_v12 = vor.u32 %v7461_v4, %v6032_v2  ;;  %3966 = vmatpush.bf16.msrb.mxu3 %v6833_v6  ;;  %v8133_v6 = vadd.f32 %v3714_v1, %v3702_v0  ;;  %v5298_v1 = vld [vmem:[#allocation5 + $0x3b8] sm:$0xf0] }
 0x29b   :  { %v7525_v7 = vld [vmem:[#allocation5 + $0xb74] sm:$0xf0] }
 0x29c   :  { %v6544_v8 = vld [vmem:[#allocation5 + $0xd58] sm:$0xf]  ;;  %v6289_v14 = vor.u32 %v7525_v7, %v6288_v5  ;;  %3928 = vmatpush.bf16.msrb.mxu0 %v6033_v12  ;;  %v3677_v7 = vpop.f32.mrf.mxu0 }
 0x29d   :  { %v7589_v9 = vld [vmem:[#allocation5 + $0xd74] sm:$0xf0]  ;;  %v5810_v7 = vld [vmem:[#allocation5 + $0x7b8] sm:$0xf0] }
 0x29e   :  { %v6800_v10 = vld [vmem:[#allocation5 + $0xf58] sm:$0xf]  ;;  %v6545_v15 = vor.u32 %v7589_v9, %v6544_v8  ;;  %3941 = vmatpush.bf16.msrb.mxu1 %v6289_v14 }
 0x29f   :  { %v7653_v11 = vld [vmem:[#allocation5 + $0xf74] sm:$0xf0] }
 0x2a0   :  { %v6000_v13 = vld [vmem:[#allocation5 + $0x918] sm:$0xf]  ;;  %v6801_v26 = vor.u32 %v7653_v11, %v6800_v10  ;;  %3954 = vmatpush.bf16.msrb.mxu2 %v6545_v15  ;;  %v3716_v51 = vpop.f32.mrf.mxu3 }
 0x2a1   :  { %v7453_v16 = vld [vmem:[#allocation5 + $0x934] sm:$0xf0] }
 0x2a2   :  { %v6256_v17 = vld [vmem:[#allocation5 + $0xb18] sm:$0xf]  ;;  %v6001_v31 = vor.u32 %v7453_v16, %v6000_v13  ;;  %3967 = vmatpush.bf16.msrb.mxu3 %v6801_v26  ;;  %v3690_v13 = vpop.f32.mrf.mxu1 }
 0x2a3   :  { %v7517_v25 = vld [vmem:[#allocation5 + $0xb34] sm:$0xf0]  ;;  %v7265_v13 = vld [vmem:[#allocation5 + $0x35c] sm:$0xf] }
 0x2a4   :  { %v6512_v27 = vld [vmem:[#allocation5 + $0xd18] sm:$0xf]  ;;  %v6257_v32 = vor.u32 %v7517_v25, %v6256_v17  ;;  %3929 = vmatpush.bf16.msrb.mxu0 %v6001_v31  ;;  %v3727_v51 = vpop.f32.mrf.mxu0 }
 0x2a5   :  { %v7581_v28 = vld [vmem:[#allocation5 + $0xd34] sm:$0xf0] }
 0x2a6   :  { %v6768_v29 = vld [vmem:[#allocation5 + $0xf18] sm:$0xf]  ;;  %v6513_v33 = vor.u32 %v7581_v28, %v6512_v27  ;;  %3942 = vmatpush.bf16.msrb.mxu1 %v6257_v32 }
 0x2a7   :  { %v7645_v30 = vld [vmem:[#allocation5 + $0xf34] sm:$0xf0] }
 0x2a8   :  { %v5968_v34 = vld [vmem:[#allocation5 + $0x8d8] sm:$0xf]  ;;  %v6769_v39 = vor.u32 %v7645_v30, %v6768_v29  ;;  %3955 = vmatpush.bf16.msrb.mxu2 %v6513_v33  ;;  %v3703_v33 = vpop.f32.mrf.mxu2 }
 0x2a9   :  { %v7445_v35 = vld [vmem:[#allocation5 + $0x8f4] sm:$0xf0]  ;;  %v7321_v33 = vld [vmem:[#allocation5 + $0x51c] sm:$0xf] }
 0x2aa   :  { %v6224_v36 = vld [vmem:[#allocation5 + $0xad8] sm:$0xf]  ;;  %v5969_v47 = vor.u32 %v7445_v35, %v5968_v34  ;;  %3968 = vmatpush.bf16.msrb.mxu3 %v6769_v39  ;;  %v7217_v39 = vld [vmem:[#allocation5 + $0x1dc] sm:$0xf] }
 0x2ab   :  { %v7509_v40 = vld [vmem:[#allocation5 + $0xaf4] sm:$0xf0] }
 0x2ac   :  { %v6480_v24 = vld [vmem:[#allocation5 + $0xcd8] sm:$0xf]  ;;  %v6225_v48 = vor.u32 %v7509_v40, %v6224_v36  ;;  %3930 = vmatpush.bf16.msrb.mxu0 %v5969_v47  ;;  %v5074_v40 = vld [vmem:[#allocation5 + $0x1f8] sm:$0xf0] }
 0x2ad   :  { %v7573_v53 = vld [vmem:[#allocation5 + $0xcf4] sm:$0xf0] }
 0x2ae   :  { %v6736_v43 = vld [vmem:[#allocation5 + $0xed8] sm:$0xf]  ;;  %v6481_v60 = vor.u32 %v7573_v53, %v6480_v24  ;;  %3943 = vmatpush.bf16.msrb.mxu1 %v6225_v48  ;;  %v7281_v24 = vld [vmem:[#allocation5 + $0x3dc] sm:$0xf] }
 0x2af   :  { %v7637_v45 = vld [vmem:[#allocation5 + $0xef4] sm:$0xf0] }
 0x2b0   :  { %v5936_v50 = vld [vmem:[#allocation5 + $0x898] sm:$0xf]  ;;  %v6737_v58 = vor.u32 %v7637_v45, %v6736_v43  ;;  %3956 = vmatpush.bf16.msrb.mxu2 %v6481_v60  ;;  %v5330_v43 = vld [vmem:[#allocation5 + $0x3f8] sm:$0xf0] }
 0x2b1   :  { %v7437_v54 = vld [vmem:[#allocation5 + $0x8b4] sm:$0xf0]  ;;  %v7345_v45 = vld [vmem:[#allocation5 + $0x5dc] sm:$0xf]  ;;  %v5333_v57 = vor.u32 %v7281_v24, %v5330_v43 }
 0x2b2   :  { %v6192_v55 = vld [vmem:[#allocation5 + $0xa98] sm:$0xf]  ;;  %v5937_v5 = vor.u32 %v7437_v54, %v5936_v50  ;;  %3969 = vmatpush.bf16.msrb.mxu3 %v6737_v58  ;;  %v7409_v60 = vld [vmem:[#allocation5 + $0x7dc] sm:$0xf]  ;;  %v5589_v58 = vor.u32 %v7345_v45, %v5586_v46  ;;  %v3728_v45 = vadd.f32 %v3727_v51, %v8133_v6  ;;  %v3740_v46 = vpop.f32.mrf.mxu1 }
 0x2b3   :  { %v7501_v59 = vld [vmem:[#allocation5 + $0xab4] sm:$0xf0]  ;;  %v5842_v50 = vld [vmem:[#allocation5 + $0x7f8] sm:$0xf0] }
 0x2b4   :  { %v6448_v61 = vld [vmem:[#allocation5 + $0xc98] sm:$0xf]  ;;  %v6193_v8 = vor.u32 %v7501_v59, %v6192_v55  ;;  %3931 = vmatpush.bf16.msrb.mxu0 %v5937_v5  ;;  %v5077_v55 = vor.u32 %v7217_v39, %v5074_v40  ;;  %v7209_v59 = vld [vmem:[#allocation5 + $0x19c] sm:$0xf]  ;;  %v5845_v0 = vor.u32 %v7409_v60, %v5842_v50 }
 0x2b5   :  { %v7565_v62 = vld [vmem:[#allocation5 + $0xcb4] sm:$0xf0]  ;;  %v7401_v5 = vld [vmem:[#allocation5 + $0x79c] sm:$0xf] }
 0x2b6   :  { %v6704_v2 = vld [vmem:[#allocation5 + $0xe98] sm:$0xf]  ;;  %v6449_v9 = vor.u32 %v7565_v62, %v6448_v61  ;;  %3944 = vmatpush.bf16.msrb.mxu1 %v6193_v8  ;;  %v5042_v61 = vld [vmem:[#allocation5 + $0x1b8] sm:$0xf0] }
 0x2b7   :  { %v7629_v4 = vld [vmem:[#allocation5 + $0xeb4] sm:$0xf0]  ;;  %v7273_v62 = vld [vmem:[#allocation5 + $0x39c] sm:$0xf]  ;;  %v5045_v8 = vor.u32 %v7209_v59, %v5042_v61 }
 0x2b8   :  { %v5904_v10 = vld [vmem:[#allocation5 + $0x858] sm:$0xf]  ;;  %v6705_v14 = vor.u32 %v7629_v4, %v6704_v2  ;;  %3957 = vmatpush.bf16.msrb.mxu2 %v6449_v9  ;;  %v7337_v2 = vld [vmem:[#allocation5 + $0x59c] sm:$0xf]  ;;  %v5301_v9 = vor.u32 %v7273_v62, %v5298_v1 }
 0x2b9   :  { %v7429_v11 = vld [vmem:[#allocation5 + $0x874] sm:$0xf0]  ;;  %v5554_v4 = vld [vmem:[#allocation5 + $0x5b8] sm:$0xf0] }
 0x2ba   :  { %v6160_v12 = vld [vmem:[#allocation5 + $0xa58] sm:$0xf]  ;;  %v5905_v25 = vor.u32 %v7429_v11, %v5904_v10  ;;  %3970 = vmatpush.bf16.msrb.mxu3 %v6705_v14  ;;  %v5557_v10 = vor.u32 %v7337_v2, %v5554_v4  ;;  %v7201_v11 = vld [vmem:[#allocation5 + $0x15c] sm:$0xf]  ;;  %v5813_v14 = vor.u32 %v7401_v5, %v5810_v7  ;;  %v3753_v2 = vpop.f32.mrf.mxu2 }
 0x2bb   :  { %v7493_v15 = vld [vmem:[#allocation5 + $0xa74] sm:$0xf0]  ;;  %v7185_v24 = vld [vmem:[#allocation5 + $0xdc] sm:$0xf] }
 0x2bc   :  { %v6416_v16 = vld [vmem:[#allocation5 + $0xc58] sm:$0xf]  ;;  %v6161_v29 = vor.u32 %v7493_v15, %v6160_v12  ;;  %3932 = vmatpush.bf16.msrb.mxu0 %v5905_v25  ;;  %v5010_v12 = vld [vmem:[#allocation5 + $0x178] sm:$0xf0] }
 0x2bd   :  { %v7557_v17 = vld [vmem:[#allocation5 + $0xc74] sm:$0xf0]  ;;  %v5266_v15 = vld [vmem:[#allocation5 + $0x378] sm:$0xf0]  ;;  %v5013_v25 = vor.u32 %v7201_v11, %v5010_v12 }
 0x2be   :  { %v6672_v23 = vld [vmem:[#allocation5 + $0xe58] sm:$0xf]  ;;  %v6417_v30 = vor.u32 %v7557_v17, %v6416_v16  ;;  %3945 = vmatpush.bf16.msrb.mxu1 %v6161_v29  ;;  %v7329_v16 = vld [vmem:[#allocation5 + $0x55c] sm:$0xf] }
 0x2bf   :  { %v7621_v26 = vld [vmem:[#allocation5 + $0xe74] sm:$0xf0]  ;;  %v5522_v17 = vld [vmem:[#allocation5 + $0x578] sm:$0xf0] }
 0x2c0   :  { %v5872_v27 = vld [vmem:[#allocation5 + $0x818] sm:$0xf]  ;;  %v6673_v34 = vor.u32 %v7621_v26, %v6672_v23  ;;  %3958 = vmatpush.bf16.msrb.mxu2 %v6417_v30  ;;  %v7393_v23 = vld [vmem:[#allocation5 + $0x75c] sm:$0xf] }
 0x2c1   :  { %v7421_v28 = vld [vmem:[#allocation5 + $0x834] sm:$0xf0]  ;;  %v5778_v26 = vld [vmem:[#allocation5 + $0x778] sm:$0xf0] }
 0x2c2   :  { %v6128_v31 = vld [vmem:[#allocation5 + $0xa18] sm:$0xf]  ;;  %v5873_v53 = vor.u32 %v7421_v28, %v5872_v27  ;;  %3971 = vmatpush.bf16.msrb.mxu3 %v6673_v34  ;;  %v5269_v27 = vor.u32 %v7265_v13, %v5266_v15  ;;  %v5525_v28 = vor.u32 %v7329_v16, %v5522_v17  ;;  %v7193_v29 = vld [vmem:[#allocation5 + $0x11c] sm:$0xf] }
 0x2c3   :  { %v7485_v3 = vld [vmem:[#allocation5 + $0xa34] sm:$0xf0]  ;;  %v4978_v30 = vld [vmem:[#allocation5 + $0x138] sm:$0xf0] }
 0x2c4   :  { %v6384_v32 = vld [vmem:[#allocation5 + $0xc18] sm:$0xf]  ;;  %v6129_v47 = vor.u32 %v7485_v3, %v6128_v31  ;;  %3933 = vmatpush.bf16.msrb.mxu0 %v5873_v53  ;;  %v7257_v31 = vld [vmem:[#allocation5 + $0x31c] sm:$0xf]  ;;  %v5781_v3 = vor.u32 %v7393_v23, %v5778_v26 }
 0x2c5   :  { %v7549_v35 = vld [vmem:[#allocation5 + $0xc34] sm:$0xf0]  ;;  %v5490_v34 = vld [vmem:[#allocation5 + $0x538] sm:$0xf0] }
 0x2c6   :  { %v6640_v36 = vld [vmem:[#allocation5 + $0xe18] sm:$0xf]  ;;  %v6385_v48 = vor.u32 %v7549_v35, %v6384_v32  ;;  %3946 = vmatpush.bf16.msrb.mxu1 %v6129_v47  ;;  %v5234_v32 = vld [vmem:[#allocation5 + $0x338] sm:$0xf0]  ;;  %v5493_v40 = vor.u32 %v7321_v33, %v5490_v34 }
 0x2c7   :  { %v7613_v37 = vld [vmem:[#allocation5 + $0xe34] sm:$0xf0]  ;;  %3934 = vmatmul.bf16.vlgmr.msrb.gmra.mxu0 %v8048_v41  ;;  %v7385_v35 = vld [vmem:[#allocation5 + $0x71c] sm:$0xf]  ;;  %v5237_v39 = vor.u32 %v7257_v31, %v5234_v32 }
 0x2c8   :  { %v6641_v54 = vor.u32 %v7613_v37, %v6640_v36  ;;  %3959 = vmatpush.bf16.msrb.mxu2 %v6385_v48  ;;  %3978 = vmatpush.bf16.msra.mxu0 %v5077_v55  ;;  %v5746_v36 = vld [vmem:[#allocation5 + $0x738] sm:$0xf0]  ;;  %v4981_v37 = vor.u32 %v7193_v29, %v4978_v30 }
 0x2c9   :  { %3947 = vmatmul.bf16.vlgmr.msrb.gmra.mxu1 %v8052_v44  ;;  %v4946_v53 = vld [vmem:[#allocation5 + $0xf8] sm:$0xf0]  ;;  %v5749_v47 = vor.u32 %v7385_v35, %v5746_v36 }
 0x2ca   :  { %3972 = vmatpush.bf16.msrb.mxu3 %v6641_v54  ;;  %3991 = vmatpush.bf16.msra.mxu1 %v5333_v57  ;;  %v7249_v43 = vld [vmem:[#allocation5 + $0x2dc] sm:$0xf]  ;;  %v3741_v57 = vadd.f32 %v3740_v46, %v3728_v45 }
 0x2cb   :  { %3960 = vmatmul.bf16.vlgmr.msrb.gmra.mxu2 %v8046_v38  ;;  %v5202_v48 = vld [vmem:[#allocation5 + $0x2f8] sm:$0xf0] }
 0x2cc   :  { %4004 = vmatpush.bf16.msra.mxu2 %v5589_v58  ;;  %3979 = vmatpush.bf16.msra.mxu0 %v5045_v8  ;;  %v7313_v60 = vld [vmem:[#allocation5 + $0x4dc] sm:$0xf]  ;;  %v4949_v58 = vor.u32 %v7185_v24, %v4946_v53  ;;  %v5205_v59 = vor.u32 %v7249_v43, %v5202_v48  ;;  %v3754_v8 = vadd.f32 %v3753_v2, %v3741_v57 }
 0x2cd   :  { %3973 = vmatmul.bf16.vlgmr.msrb.gmra.mxu3 %v8050_v42  ;;  %v5458_v50 = vld [vmem:[#allocation5 + $0x4f8] sm:$0xf0] }
 0x2ce   :  { %4017 = vmatpush.bf16.msra.mxu3 %v5845_v0  ;;  %3992 = vmatpush.bf16.msra.mxu1 %v5301_v9  ;;  %v7377_v54 = vld [vmem:[#allocation5 + $0x6dc] sm:$0xf]  ;;  %v5461_v61 = vor.u32 %v7313_v60, %v5458_v50  ;;  %v3766_v9 = vpop.f32.mrf.mxu3 }
 0x2cf   :  { %v5714_v55 = vld [vmem:[#allocation5 + $0x6f8] sm:$0xf0]  ;;  %v8140_v13 = vadd.f32 %v3766_v9, %v3754_v8 }
 0x2d0   :  { %4005 = vmatpush.bf16.msra.mxu2 %v5557_v10  ;;  %3980 = vmatpush.bf16.msra.mxu0 %v5013_v25  ;;  %v7177_v62 = vld [vmem:[#allocation5 + $0x9c] sm:$0xf]  ;;  %v5717_v6 = vor.u32 %v7377_v54, %v5714_v55  ;;  %v3742_v25 = vpop.f32.mrf.mxu1 }
 0x2d1   :  { %v4914_v0 = vld [vmem:[#allocation5 + $0xb8] sm:$0xf0] }
 0x2d2   :  { %4018 = vmatpush.bf16.msra.mxu3 %v5813_v14  ;;  %3993 = vmatpush.bf16.msra.mxu1 %v5269_v27  ;;  %v7241_v1 = vld [vmem:[#allocation5 + $0x29c] sm:$0xf]  ;;  %v4917_v12 = vor.u32 %v7177_v62, %v4914_v0  ;;  %v3729_v14 = vpop.f32.mrf.mxu0 }
 0x2d3   :  { %v5170_v4 = vld [vmem:[#allocation5 + $0x2b8] sm:$0xf0] }
 0x2d4   :  { %4006 = vmatpush.bf16.msra.mxu2 %v5525_v28  ;;  %3981 = vmatpush.bf16.msra.mxu0 %v4981_v37  ;;  %v7305_v5 = vld [vmem:[#allocation5 + $0x49c] sm:$0xf]  ;;  %v5173_v15 = vor.u32 %v7241_v1, %v5170_v4 }
 0x2d5   :  { %v5426_v7 = vld [vmem:[#allocation5 + $0x4b8] sm:$0xf0] }
 0x2d6   :  { %4019 = vmatpush.bf16.msra.mxu3 %v5781_v3  ;;  %3994 = vmatpush.bf16.msra.mxu1 %v5237_v39  ;;  %v7369_v10 = vld [vmem:[#allocation5 + $0x69c] sm:$0xf]  ;;  %v5429_v16 = vor.u32 %v7305_v5, %v5426_v7  ;;  %v3768_v46 = vpop.f32.mrf.mxu3 }
 0x2d7   :  { %v5682_v11 = vld [vmem:[#allocation5 + $0x6b8] sm:$0xf0] }
 0x2d8   :  { %4007 = vmatpush.bf16.msra.mxu2 %v5493_v40  ;;  %3982 = vmatpush.bf16.msra.mxu0 %v4949_v58  ;;  %v7169_v17 = vld [vmem:[#allocation5 + $0x5c] sm:$0xf]  ;;  %v5685_v27 = vor.u32 %v7369_v10, %v5682_v11  ;;  %v3755_v40 = vpop.f32.mrf.mxu2 }
 0x2d9   :  { %v4882_v23 = vld [vmem:[#allocation5 + $0x78] sm:$0xf0] }
 0x2da   :  { %4020 = vmatpush.bf16.msra.mxu3 %v5749_v47  ;;  %3995 = vmatpush.bf16.msra.mxu1 %v5205_v59  ;;  %v7233_v26 = vld [vmem:[#allocation5 + $0x25c] sm:$0xf]  ;;  %v4885_v32 = vor.u32 %v7169_v17, %v4882_v23 }
 0x2db   :  { %v5138_v28 = vld [vmem:[#allocation5 + $0x278] sm:$0xf0] }
 0x2dc   :  { %4008 = vmatpush.bf16.msra.mxu2 %v5461_v61  ;;  %v7297_v29 = vld [vmem:[#allocation5 + $0x45c] sm:$0xf]  ;;  %3983 = vmatpush.bf16.msra.mxu0 %v4917_v12  ;;  %v5141_v35 = vor.u32 %v7233_v26, %v5138_v28 }
 0x2dd   :  { %v5394_v30 = vld [vmem:[#allocation5 + $0x478] sm:$0xf0] }
 0x2de   :  { %4021 = vmatpush.bf16.msra.mxu3 %v5717_v6  ;;  %v7361_v31 = vld [vmem:[#allocation5 + $0x65c] sm:$0xf]  ;;  %3996 = vmatpush.bf16.msra.mxu1 %v5173_v15  ;;  %v5397_v36 = vor.u32 %v7297_v29, %v5394_v30 }
 0x2df   :  { %v5650_v3 = vld [vmem:[#allocation5 + $0x678] sm:$0xf0] }
 0x2e0   :  { %v7161_v33 = vld [vmem:[#allocation5 + $0x1c] sm:$0xf]  ;;  %4009 = vmatpush.bf16.msra.mxu2 %v5429_v16  ;;  %v5653_v24 = vor.u32 %v7361_v31, %v5650_v3  ;;  %3984 = vmatpush.bf16.msra.mxu0 %v4885_v32 }
 0x2e1   :  { %v4850_v34 = vld [vmem:[#allocation5 + $0x38] sm:$0xf0] }
 0x2e2   :  { %v7225_v37 = vld [vmem:[#allocation5 + $0x21c] sm:$0xf]  ;;  %4022 = vmatpush.bf16.msra.mxu3 %v5685_v27  ;;  %v4853_v50 = vor.u32 %v7161_v33, %v4850_v34  ;;  %3997 = vmatpush.bf16.msra.mxu1 %v5141_v35 }
 0x2e3   :  { %v5106_v51 = vld [vmem:[#allocation5 + $0x238] sm:$0xf0] }
 0x2e4   :  { %v7289_v39 = vld [vmem:[#allocation5 + $0x41c] sm:$0xf]  ;;  %4010 = vmatpush.bf16.msra.mxu2 %v5397_v36  ;;  %v5109_v58 = vor.u32 %v7225_v37, %v5106_v51  ;;  %3985 = vmatpush.bf16.msra.mxu0 %v4853_v50 }
 0x2e5   :  { %v5362_v53 = vld [vmem:[#allocation5 + $0x438] sm:$0xf0] }
 0x2e6   :  { %v7353_v43 = vld [vmem:[#allocation5 + $0x61c] sm:$0xf]  ;;  %v5365_v59 = vor.u32 %v7289_v39, %v5362_v53  ;;  %4023 = vmatpush.bf16.msra.mxu3 %v5653_v24  ;;  %3998 = vmatpush.bf16.msra.mxu1 %v5109_v58  ;;  %v8146_v53 = vpop.f32.mrf.mxu0 }
 0x2e7   :  { %v5618_v45 = vld [vmem:[#allocation5 + $0x638] sm:$0xf0]  ;;  %3986 = vmatmul.bf16.vlgmr.msra.gmra.mxu0 %v8036_v19 }
 0x2e8   :  { %v7473_v47 = vld [vmem:[#allocation5 + $0x9dc] sm:$0xf]  ;;  %v5621_v0 = vor.u32 %v7353_v43, %v5618_v45  ;;  %4011 = vmatpush.bf16.msra.mxu2 %v5365_v59 }
 0x2e9   :  { %v6098_v48 = vld [vmem:[#allocation5 + $0x9f8] sm:$0xf0]  ;;  %3999 = vmatmul.bf16.vlgmr.msra.gmra.mxu1 %v8040_v22 }
 0x2ea   :  { %v7537_v60 = vld [vmem:[#allocation5 + $0xbdc] sm:$0xf]  ;;  %v6101_v1 = vor.u32 %v7473_v47, %v6098_v48  ;;  %4024 = vmatpush.bf16.msra.mxu3 %v5621_v0  ;;  %v8148_v48 = vpop.f32.mrf.mxu1 }
 0x2eb   :  { %v6354_v54 = vld [vmem:[#allocation5 + $0xbf8] sm:$0xf0]  ;;  %4012 = vmatmul.bf16.vlgmr.msra.gmra.mxu2 %v8034_v18 }
 0x2ec   :  { %v7601_v55 = vld [vmem:[#allocation5 + $0xddc] sm:$0xf]  ;;  %v6357_v2 = vor.u32 %v7537_v60, %v6354_v54  ;;  %4030 = vmatpush.bf16.msrb.mxu0 %v6101_v1 }
 0x2ed   :  { %v6610_v57 = vld [vmem:[#allocation5 + $0xdf8] sm:$0xf0]  ;;  %4025 = vmatmul.bf16.vlgmr.msra.gmra.mxu3 %v8038_v20 }
 0x2ee   :  { %v7665_v61 = vld [vmem:[#allocation5 + $0xfdc] sm:$0xf]  ;;  %v6613_v6 = vor.u32 %v7601_v55, %v6610_v57  ;;  %4043 = vmatpush.bf16.msrb.mxu1 %v6357_v2 }
 0x2ef   :  { %v6866_v62 = vld [vmem:[#allocation5 + $0xff8] sm:$0xf0] }
 0x2f0   :  { %v7465_v4 = vld [vmem:[#allocation5 + $0x99c] sm:$0xf]  ;;  %v6869_v8 = vor.u32 %v7665_v61, %v6866_v62  ;;  %4056 = vmatpush.bf16.msrb.mxu2 %v6613_v6  ;;  %v8150_v6 = vpop.f32.mrf.mxu2 }
 0x2f1   :  { %v6066_v5 = vld [vmem:[#allocation5 + $0x9b8] sm:$0xf0] }
 0x2f2   :  { %v7529_v7 = vld [vmem:[#allocation5 + $0xb9c] sm:$0xf]  ;;  %v6069_v15 = vor.u32 %v7465_v4, %v6066_v5  ;;  %4069 = vmatpush.bf16.msrb.mxu3 %v6869_v8 }
 0x2f3   :  { %v6322_v9 = vld [vmem:[#allocation5 + $0xbb8] sm:$0xf0] }
 0x2f4   :  { %v7593_v10 = vld [vmem:[#allocation5 + $0xd9c] sm:$0xf]  ;;  %v6325_v16 = vor.u32 %v7529_v7, %v6322_v9  ;;  %4031 = vmatpush.bf16.msrb.mxu0 %v6069_v15  ;;  %v8152_v9 = vpop.f32.mrf.mxu3 }
 0x2f5   :  { %v6578_v11 = vld [vmem:[#allocation5 + $0xdb8] sm:$0xf0] }
 0x2f6   :  { %v7657_v12 = vld [vmem:[#allocation5 + $0xf9c] sm:$0xf]  ;;  %v6581_v17 = vor.u32 %v7593_v10, %v6578_v11  ;;  %4044 = vmatpush.bf16.msrb.mxu1 %v6325_v16 }
 0x2f7   :  { %v6834_v14 = vld [vmem:[#allocation5 + $0xfb8] sm:$0xf0] }
 0x2f8   :  { %v7457_v23 = vld [vmem:[#allocation5 + $0x95c] sm:$0xf]  ;;  %v6837_v27 = vor.u32 %v7657_v12, %v6834_v14  ;;  %4057 = vmatpush.bf16.msrb.mxu2 %v6581_v17  ;;  %v3781_v14 = vpop.f32.mrf.mxu0 }
 0x2f9   :  { %v6034_v26 = vld [vmem:[#allocation5 + $0x978] sm:$0xf0] }
 0x2fa   :  { %v7521_v25 = vld [vmem:[#allocation5 + $0xb5c] sm:$0xf]  ;;  %v6037_v32 = vor.u32 %v7457_v23, %v6034_v26  ;;  %4070 = vmatpush.bf16.msrb.mxu3 %v6837_v27 }
 0x2fb   :  { %v6290_v28 = vld [vmem:[#allocation5 + $0xb78] sm:$0xf0] }
 0x2fc   :  { %v7585_v29 = vld [vmem:[#allocation5 + $0xd5c] sm:$0xf]  ;;  %v6293_v33 = vor.u32 %v7521_v25, %v6290_v28  ;;  %4032 = vmatpush.bf16.msrb.mxu0 %v6037_v32  ;;  %v3794_v25 = vpop.f32.mrf.mxu1 }
 0x2fd   :  { %v6546_v30 = vld [vmem:[#allocation5 + $0xd78] sm:$0xf0] }
 0x2fe   :  { %v7649_v31 = vld [vmem:[#allocation5 + $0xf5c] sm:$0xf]  ;;  %v6549_v34 = vor.u32 %v7585_v29, %v6546_v30  ;;  %4045 = vmatpush.bf16.msrb.mxu1 %v6293_v33 }
 0x2ff   :  { %v6802_v3 = vld [vmem:[#allocation5 + $0xf78] sm:$0xf0] }
 0x300   :  { %v7449_v35 = vld [vmem:[#allocation5 + $0x91c] sm:$0xf]  ;;  %v6805_v37 = vor.u32 %v7649_v31, %v6802_v3  ;;  %4058 = vmatpush.bf16.msrb.mxu2 %v6549_v34 }
 0x301   :  { %v6002_v36 = vld [vmem:[#allocation5 + $0x938] sm:$0xf0] }
 0x302   :  { %v7513_v18 = vld [vmem:[#allocation5 + $0xb1c] sm:$0xf]  ;;  %v6005_v20 = vor.u32 %v7449_v35, %v6002_v36  ;;  %4071 = vmatpush.bf16.msrb.mxu3 %v6805_v37  ;;  %v3807_v37 = vpop.f32.mrf.mxu2 }
 0x303   :  { %v6258_v51 = vld [vmem:[#allocation5 + $0xb38] sm:$0xf0]  ;;  %v4084_v37 = vmax.f32 %v8110_v56, 0.0 }
 0x304   :  { %v7577_v39 = vld [vmem:[#allocation5 + $0xd1c] sm:$0xf]  ;;  %v6261_v22 = vor.u32 %v7513_v18, %v6258_v51  ;;  %4033 = vmatpush.bf16.msrb.mxu0 %v6005_v20 }
 0x305   :  { %v6514_v40 = vld [vmem:[#allocation5 + $0xd38] sm:$0xf0] }
 0x306   :  { %v7641_v24 = vld [vmem:[#allocation5 + $0xf1c] sm:$0xf]  ;;  %v6517_v43 = vor.u32 %v7577_v39, %v6514_v40  ;;  %4046 = vmatpush.bf16.msrb.mxu1 %v6261_v22 }
 0x307   :  { %v6770_v19 = vld [vmem:[#allocation5 + $0xf38] sm:$0xf0] }
 0x308   :  { %v7441_v45 = vld [vmem:[#allocation5 + $0x8dc] sm:$0xf]  ;;  %v6773_v60 = vor.u32 %v7641_v24, %v6770_v19  ;;  %4059 = vmatpush.bf16.msrb.mxu2 %v6517_v43  ;;  %v3820_v19 = vpop.f32.mrf.mxu3 }
 0x309   :  { %v5970_v46 = vld [vmem:[#allocation5 + $0x8f8] sm:$0xf0] }
 0x30a   :  { %v7505_v47 = vld [vmem:[#allocation5 + $0xadc] sm:$0xf]  ;;  %v5973_v59 = vor.u32 %v7441_v45, %v5970_v46  ;;  %4072 = vmatpush.bf16.msrb.mxu3 %v6773_v60  ;;  %v7677_v60 = vld [vmem:[#allocation8 + $0x38] sm:$0xff] }
 0x30b   :  { %v6226_v50 = vld [vmem:[#allocation5 + $0xaf8] sm:$0xf0] }
 0x30c   :  { %v7569_v54 = vld [vmem:[#allocation5 + $0xcdc] sm:$0xf]  ;;  %v6229_v61 = vor.u32 %v7505_v47, %v6226_v50  ;;  %4034 = vmatpush.bf16.msrb.mxu0 %v5973_v59  ;;  %v7685_v50 = vld [vmem:[#allocation8 + $0x78] sm:$0xff] }
 0x30d   :  { %v6482_v55 = vld [vmem:[#allocation5 + $0xcf8] sm:$0xf0] }
 0x30e   :  { %v7633_v57 = vld [vmem:[#allocation5 + $0xedc] sm:$0xf]  ;;  %v6485_v62 = vor.u32 %v7569_v54, %v6482_v55  ;;  %4047 = vmatpush.bf16.msrb.mxu1 %v6229_v61  ;;  %v7693_v54 = vld [vmem:[#allocation8 + $0xb8] sm:$0xff] }
 0x30f   :  { %v6738_v58 = vld [vmem:[#allocation5 + $0xef8] sm:$0xf0]  ;;  %v7701_v55 = vld [vmem:[#allocation8 + $0xf8] sm:$0xff] }
 0x310   :  { %v7433_v0 = vld [vmem:[#allocation5 + $0x89c] sm:$0xf]  ;;  %v6741_v4 = vor.u32 %v7633_v57, %v6738_v58  ;;  %4060 = vmatpush.bf16.msrb.mxu2 %v6485_v62  ;;  %v7675_v62 = vld [vmem:[#allocation8 + $0x28] sm:$0xff]  ;;  %v8164_v14 = vpop.f32.mrf.mxu3 }
 0x311   :  { %v5938_v1 = vld [vmem:[#allocation5 + $0x8b8] sm:$0xf0] }
 0x312   :  { %v7497_v2 = vld [vmem:[#allocation5 + $0xa9c] sm:$0xf]  ;;  %v5941_v12 = vor.u32 %v7433_v0, %v5938_v1  ;;  %4073 = vmatpush.bf16.msrb.mxu3 %v6741_v4  ;;  %v7683_v0 = vld [vmem:[#allocation8 + $0x68] sm:$0xff]  ;;  %v7674_v4 = vld [vmem:[#allocation8 + $0x20] sm:$0xff] }
 0x313   :  { %v6194_v5 = vld [vmem:[#allocation5 + $0xab8] sm:$0xf0]  ;;  %v7691_v1 = vld [vmem:[#allocation8 + $0xa8] sm:$0xff] }
 0x314   :  { %v7561_v7 = vld [vmem:[#allocation5 + $0xc9c] sm:$0xf]  ;;  %v6197_v15 = vor.u32 %v7497_v2, %v6194_v5  ;;  %4035 = vmatpush.bf16.msrb.mxu0 %v5941_v12  ;;  %v7699_v2 = vld [vmem:[#allocation8 + $0xe8] sm:$0xff]  ;;  %v8158_v5 = vpop.f32.mrf.mxu0  ;;  %v7697_v12 = vld [vmem:[#allocation8 + $0xd8] sm:$0xff] }
 0x315   :  { %v6450_v8 = vld [vmem:[#allocation5 + $0xcb8] sm:$0xf0] }
 0x316   :  { %v7625_v10 = vld [vmem:[#allocation5 + $0xe9c] sm:$0xf]  ;;  %v6453_v16 = vor.u32 %v7561_v7, %v6450_v8  ;;  %4048 = vmatpush.bf16.msrb.mxu1 %v6197_v15  ;;  %v8160_v7 = vpop.f32.mrf.mxu1  ;;  %v7681_v8 = vld [vmem:[#allocation8 + $0x58] sm:$0xff] }
 0x317   :  { %v6706_v11 = vld [vmem:[#allocation5 + $0xeb8] sm:$0xf0] }
 0x318   :  { %v7425_v17 = vld [vmem:[#allocation5 + $0x85c] sm:$0xf]  ;;  %v6709_v27 = vor.u32 %v7625_v10, %v6706_v11  ;;  %4061 = vmatpush.bf16.msrb.mxu2 %v6453_v16  ;;  %v7689_v10 = vld [vmem:[#allocation8 + $0x98] sm:$0xff]  ;;  %v8162_v11 = vpop.f32.mrf.mxu2 }
 0x319   :  { %v5906_v23 = vld [vmem:[#allocation5 + $0x878] sm:$0xf0] }
 0x31a   :  { %v7489_v26 = vld [vmem:[#allocation5 + $0xa5c] sm:$0xf]  ;;  %v5909_v32 = vor.u32 %v7425_v17, %v5906_v23  ;;  %4074 = vmatpush.bf16.msrb.mxu3 %v6709_v27  ;;  %v651_v27 = vperm.slane %v8130_v21, 5  ;;  %v7686_v21 = vld [vmem:[#allocation8 + $0x80] sm:$0xff] }
 0x31b   :  { %v6162_v28 = vld [vmem:[#allocation5 + $0xa78] sm:$0xf0] }
 0x31c   :  { %v7553_v29 = vld [vmem:[#allocation5 + $0xc5c] sm:$0xf]  ;;  %v6165_v33 = vor.u32 %v7489_v26, %v6162_v28  ;;  %4036 = vmatpush.bf16.msrb.mxu0 %v5909_v32  ;;  %v3833_v16 = vpop.f32.mrf.mxu0  ;;  %v7671_v28 = vld [vmem:[#allocation8 + $0x8] sm:$0xff]  ;;  %v3872_v32 = vpop.f32.mrf.mxu3 }
 0x31d   :  { %v6418_v30 = vld [vmem:[#allocation5 + $0xc78] sm:$0xf0] }
 0x31e   :  { %v7617_v31 = vld [vmem:[#allocation5 + $0xe5c] sm:$0xf]  ;;  %v6421_v34 = vor.u32 %v7553_v29, %v6418_v30  ;;  %4049 = vmatpush.bf16.msrb.mxu1 %v6165_v33  ;;  %v3846_v26 = vpop.f32.mrf.mxu1  ;;  %v7679_v29 = vld [vmem:[#allocation8 + $0x48] sm:$0xff]  ;;  %v3780_v33 = vadd.f32 %v8146_v53, %v651_v27 }
 0x31f   :  { %v6674_v3 = vld [vmem:[#allocation5 + $0xe78] sm:$0xf0]  ;;  %v7687_v30 = vld [vmem:[#allocation8 + $0x88] sm:$0xff]  ;;  %v7702_v26 = vld [vmem:[#allocation8 + $0x100] sm:$0xff] }
 0x320   :  { %v7417_v35 = vld [vmem:[#allocation5 + $0x81c] sm:$0xf]  ;;  %v6677_v51 = vor.u32 %v7617_v31, %v6674_v3  ;;  %4062 = vmatpush.bf16.msrb.mxu2 %v6421_v34  ;;  %v3859_v31 = vpop.f32.mrf.mxu2  ;;  %v7695_v3 = vld [vmem:[#allocation8 + $0xc8] sm:$0xff]  ;;  %v7670_v34 = vld [vmem:[#allocation8] sm:$0xff]  ;;  %v3793_v53 = vadd.f32 %v8148_v48, %v3780_v33 }
 0x321   :  { %v5874_v36 = vld [vmem:[#allocation5 + $0x838] sm:$0xf0]  ;;  %v7707_v48 = vld [vmem:[#allocation8 + $0x128] sm:$0xff] }
 0x322   :  { %v7481_v18 = vld [vmem:[#allocation5 + $0xa1c] sm:$0xf]  ;;  %v5877_v43 = vor.u32 %v7417_v35, %v5874_v36  ;;  %4075 = vmatpush.bf16.msrb.mxu3 %v6677_v51  ;;  %v4082_v35 = vmax.f32 %v8080_v52, 0.0  ;;  %v7678_v36 = vld [vmem:[#allocation8 + $0x40] sm:$0xff]  ;;  %v7725_v52 = vld [vmem:[#allocation8 + $0x1b8] sm:$0xff] }
 0x323   :  { %v6130_v39 = vld [vmem:[#allocation5 + $0xa38] sm:$0xf0]  ;;  %v7694_v51 = vld [vmem:[#allocation8 + $0xc0] sm:$0xff] }
 0x324   :  { %v7545_v40 = vld [vmem:[#allocation5 + $0xc1c] sm:$0xf]  ;;  %v6133_v45 = vor.u32 %v7481_v18, %v6130_v39  ;;  %4037 = vmatpush.bf16.msrb.mxu0 %v5877_v43  ;;  %v4083_v18 = vmax.f32 %v8094_v49, 0.0  ;;  %v7709_v39 = vld [vmem:[#allocation8 + $0x138] sm:$0xff]  ;;  %v4090_v19 = vpack.c.bf16 %v4082_v35, %v4082_v35 }
 0x325   :  { %v6386_v24 = vld [vmem:[#allocation5 + $0xc38] sm:$0xf0] }
 0x326   :  { %v7609_v20 = vld [vmem:[#allocation5 + $0xe1c] sm:$0xf]  ;;  %v6389_v46 = vor.u32 %v7545_v40, %v6386_v24  ;;  %4050 = vmatpush.bf16.msrb.mxu1 %v6133_v45  ;;  %v4085_v40 = vmax.f32 %v8124_v63, 0.0  ;;  %v7717_v24 = vld [vmem:[#allocation8 + $0x178] sm:$0xff]  ;;  %v3806_v45 = vadd.f32 %v8150_v6, %v3793_v53 }
 0x327   :  { %v6642_v22 = vld [vmem:[#allocation5 + $0xe38] sm:$0xf0]  ;;  %4038 = vmatmul.bf16.vlgmr.msrb.gmra.mxu0 %v8048_v41  ;;  %v7682_v41 = vld [vmem:[#allocation8 + $0x60] sm:$0xff] }
 0x328   :  { %v6645_v47 = vor.u32 %v7609_v20, %v6642_v22  ;;  %4063 = vmatpush.bf16.msrb.mxu2 %v6389_v46  ;;  %4614 = vmatpush.bf16.msra.mxu0 %v7677_v60  ;;  %v7676_v57 = vld [vmem:[#allocation8 + $0x30] sm:$0xff]  ;;  %v4091_v20 = vpack.c.bf16 %v4083_v18, %v4083_v18  ;;  %v4092_v22 = vpack.c.bf16 %v4084_v37, %v4084_v37  ;;  %v7715_v46 = vld [vmem:[#allocation8 + $0x168] sm:$0xff]  ;;  %v7733_v18 = vld [vmem:[#allocation8 + $0x1f8] sm:$0xff] }
 0x329   :  { %v7684_v58 = vld [vmem:[#allocation8 + $0x70] sm:$0xff]  ;;  %4051 = vmatmul.bf16.vlgmr.msrb.gmra.mxu1 %v8052_v44  ;;  %v7690_v44 = vld [vmem:[#allocation8 + $0xa0] sm:$0xff]  ;;  %v4093_v43 = vpack.c.bf16 %v4085_v40, %v4085_v40  ;;  %v7723_v60 = vld [vmem:[#allocation8 + $0x1a8] sm:$0xff] }
 0x32a   :  { %4076 = vmatpush.bf16.msrb.mxu3 %v6645_v47  ;;  %4627 = vmatpush.bf16.msra.mxu1 %v7685_v50  ;;  %v7692_v59 = vld [vmem:[#allocation8 + $0xb0] sm:$0xff]  ;;  %v3819_v47 = vadd.f32 %v8152_v9, %v3806_v45  ;;  %v7706_v50 = vld [vmem:[#allocation8 + $0x120] sm:$0xff]  ;;  %v3922_v9 = vpop.f32.mrf.mxu3 }
 0x32b   :  { %v7700_v61 = vld [vmem:[#allocation8 + $0xf0] sm:$0xff]  ;;  %4064 = vmatmul.bf16.vlgmr.msrb.gmra.mxu2 %v8046_v38  ;;  %v7698_v38 = vld [vmem:[#allocation8 + $0xe0] sm:$0xff] }
 0x32c   :  { %4640 = vmatpush.bf16.msra.mxu2 %v7693_v54  ;;  %4615 = vmatpush.bf16.msra.mxu0 %v7676_v57  ;;  %v7672_v15 = vld [vmem:[#allocation8 + $0x10] sm:$0xff]  ;;  %v3883_v54 = vpop.f32.mrf.mxu0  ;;  %v3896_v57 = vpop.f32.mrf.mxu1  ;;  %v3832_v6 = vadd.f32 %v8158_v5, %v3819_v47 }
 0x32d   :  { %4077 = vmatmul.bf16.vlgmr.msrb.gmra.mxu3 %v8050_v42  ;;  %v7673_v42 = vld [vmem:[#allocation8 + $0x18] sm:$0xff]  ;;  %v7680_v17 = vld [vmem:[#allocation8 + $0x50] sm:$0xff] }
 0x32e   :  { %4653 = vmatpush.bf16.msra.mxu3 %v7701_v55  ;;  %4628 = vmatpush.bf16.msra.mxu1 %v7684_v58  ;;  %v7688_v23 = vld [vmem:[#allocation8 + $0x90] sm:$0xff]  ;;  %v7714_v55 = vld [vmem:[#allocation8 + $0x160] sm:$0xff] }
 0x32f   :  { %v7696_v25 = vld [vmem:[#allocation8 + $0xd0] sm:$0xff]  ;;  %v7722_v58 = vld [vmem:[#allocation8 + $0x1a0] sm:$0xff] }
 0x330   :  { %4641 = vmatpush.bf16.msra.mxu2 %v7692_v59  ;;  %4616 = vmatpush.bf16.msra.mxu0 %v7675_v62  ;;  %v7708_v49 = vld [vmem:[#allocation8 + $0x130] sm:$0xff]  ;;  %v7705_v59 = vld [vmem:[#allocation8 + $0x118] sm:$0xff]  ;;  %v3909_v62 = vpop.f32.mrf.mxu2 }
 0x331   :  { %v7716_v56 = vld [vmem:[#allocation8 + $0x170] sm:$0xff] }
 0x332   :  { %4654 = vmatpush.bf16.msra.mxu3 %v7700_v61  ;;  %4629 = vmatpush.bf16.msra.mxu1 %v7683_v0  ;;  %v7724_v63 = vld [vmem:[#allocation8 + $0x1b0] sm:$0xff]  ;;  %v7713_v61 = vld [vmem:[#allocation8 + $0x158] sm:$0xff]  ;;  %v3845_v0 = vadd.f32 %v8160_v7, %v3832_v6  ;;  %v7711_v7 = vld [vmem:[#allocation8 + $0x148] sm:$0xff]  ;;  %v3924_v16 = vpop.f32.mrf.mxu3 }
 0x334   :  { %4642 = vmatpush.bf16.msra.mxu2 %v7691_v1  ;;  %4617 = vmatpush.bf16.msra.mxu0 %v7674_v4  ;;  %v7721_v1 = vld [vmem:[#allocation8 + $0x198] sm:$0xff]  ;;  %v3885_v4 = vpop.f32.mrf.mxu0  ;;  %v3858_v5 = vadd.f32 %v8162_v11, %v3845_v0  ;;  %v4086_v11 = vmax.f32 %v8140_v13, 0.0 }
 0x336   :  { %4655 = vmatpush.bf16.msra.mxu3 %v7699_v2  ;;  %4630 = vmatpush.bf16.msra.mxu1 %v7682_v41  ;;  %v7704_v2 = vld [vmem:[#allocation8 + $0x110] sm:$0xff] }
 0x337   :  { %v7712_v41 = vld [vmem:[#allocation8 + $0x150] sm:$0xff] }
 0x338   :  { %4643 = vmatpush.bf16.msra.mxu2 %v7690_v44  ;;  %4618 = vmatpush.bf16.msra.mxu0 %v7673_v42  ;;  %v3898_v44 = vpop.f32.mrf.mxu1 }
 0x33a   :  { %4656 = vmatpush.bf16.msra.mxu3 %v7698_v38  ;;  %4631 = vmatpush.bf16.msra.mxu1 %v7681_v8  ;;  %v8178_v38 = vld [vmem:[#allocation7] sm:$0xff]  ;;  %v7720_v8 = vld [vmem:[#allocation8 + $0x190] sm:$0xff] }
 0x33b   :  { %v652_v42 = vperm.slane %v8178_v38, 6 }
 0x33c   :  { %4644 = vmatpush.bf16.msra.mxu2 %v7689_v10  ;;  %4619 = vmatpush.bf16.msra.mxu0 %v7672_v15  ;;  %v7703_v10 = vld [vmem:[#allocation8 + $0x108] sm:$0xff]  ;;  %v3871_v15 = vadd.f32 %v8164_v14, %v3858_v5 }
 0x33e   :  { %4657 = vmatpush.bf16.msra.mxu3 %v7697_v12  ;;  %4632 = vmatpush.bf16.msra.mxu1 %v7680_v17  ;;  %v3911_v12 = vpop.f32.mrf.mxu2  ;;  %v3884_v17 = vadd.f32 %v3883_v54, %v652_v42  ;;  %v4087_v27 = vmax.f32 %v3871_v15, 0.0  ;;  %v653_v54 = vperm.slane %v8178_v38, 7 }
 0x33f   :  { %v7754_v12 = vld [vmem:[#allocation10] ss:$0 sm:$0xff] }
 0x340   :  { %4645 = vmatpush.bf16.msra.mxu2 %v7688_v23  ;;  %4620 = vmatpush.bf16.msra.mxu0 %v7671_v28  ;;  %v7719_v23 = vld [vmem:[#allocation8 + $0x188] sm:$0xff]  ;;  %v3897_v28 = vadd.f32 %v3896_v57, %v3884_v17  ;;  %v4095_v31 = vpack.c.bf16 %v4087_v27, %v4087_v27 }
 0x342   :  { %4658 = vmatpush.bf16.msra.mxu3 %v7696_v25  ;;  %4633 = vmatpush.bf16.msra.mxu1 %v7679_v29  ;;  %v7710_v25 = vld [vmem:[#allocation8 + $0x140] sm:$0xff] }
 0x343   :  { %v7718_v29 = vld [vmem:[#allocation8 + $0x180] sm:$0xff] }
 0x344   :  { %4646 = vmatpush.bf16.msra.mxu2 %v7687_v30  ;;  %4621 = vmatpush.bf16.msra.mxu0 %v7670_v34  ;;  %v4094_v30 = vpack.c.bf16 %v4086_v11, %v4086_v11  ;;  %v3935_v32 = vpop.f32.mrf.mxu0 }
 0x346   :  { %4659 = vmatpush.bf16.msra.mxu3 %v7695_v3  ;;  %4634 = vmatpush.bf16.msra.mxu1 %v7678_v36  ;;  %v3910_v3 = vadd.f32 %v3909_v62, %v3897_v28  ;;  %v3948_v34 = vpop.f32.mrf.mxu1 }
 0x347   :  { %4622 = vmatmul.bf16.vlgmr.msra.gmra.mxu0 %v4090_v19  ;;  %v7731_v19 = vld [vmem:[#allocation8 + $0x1e8] sm:$0xff] }
 0x348   :  { %4647 = vmatpush.bf16.msra.mxu2 %v7686_v21  ;;  %4666 = vmatpush.bf16.msrb.mxu0 %v7709_v39  ;;  %v3923_v14 = vadd.f32 %v3922_v9, %v3910_v3  ;;  %v7732_v39 = vld [vmem:[#allocation8 + $0x1f0] sm:$0xff] }
 0x349   :  { %4635 = vmatmul.bf16.vlgmr.msra.gmra.mxu1 %v4091_v20 }
 0x34a   :  { %4660 = vmatpush.bf16.msra.mxu3 %v7694_v51  ;;  %4679 = vmatpush.bf16.msrb.mxu1 %v7717_v24  ;;  %v3936_v33 = vadd.f32 %v3935_v32, %v3923_v14 }
 0x34b   :  { %4648 = vmatmul.bf16.vlgmr.msra.gmra.mxu2 %v4092_v22  ;;  %v7730_v22 = vld [vmem:[#allocation8 + $0x1e0] sm:$0xff] }
 0x34c   :  { %4692 = vmatpush.bf16.msrb.mxu2 %v7725_v52  ;;  %4667 = vmatpush.bf16.msrb.mxu0 %v7708_v49  ;;  %v3949_v35 = vadd.f32 %v3948_v34, %v3936_v33  ;;  %v3937_v51 = vpop.f32.mrf.mxu0  ;;  %v7729_v49 = vld [vmem:[#allocation8 + $0x1d8] sm:$0xff] }
 0x34d   :  { %4661 = vmatmul.bf16.vlgmr.msra.gmra.mxu3 %v4093_v43  ;;  %v7741_v34 = vld [vmem:[#allocation11 + $0x38] sm:$0xff]  ;;  %v7736_v51 = vld [vmem:[#allocation11 + $0x10] sm:$0xff] }
 0x34e   :  { %4680 = vmatpush.bf16.msrb.mxu1 %v7716_v56  ;;  %v3961_v13 = vpop.f32.mrf.mxu2  ;;  %4705 = vmatpush.bf16.msrb.mxu3 %v7733_v18  ;;  %v3950_v40 = vpop.f32.mrf.mxu1  ;;  %v7728_v56 = vld [vmem:[#allocation8 + $0x1d0] sm:$0xff]  ;;  %v7738_v18 = vld [vmem:[#allocation11 + $0x20] sm:$0xff] }
 0x34f   :  { %v3962_v36 = vadd.f32 %v3961_v13, %v3949_v35  ;;  %v7740_v35 = vld [vmem:[#allocation11 + $0x30] sm:$0xff] }
 0x350   :  { %4693 = vmatpush.bf16.msrb.mxu2 %v7724_v63  ;;  %4668 = vmatpush.bf16.msrb.mxu0 %v7707_v48  ;;  %v3974_v21 = vpop.f32.mrf.mxu3  ;;  %v7727_v48 = vld [vmem:[#allocation8 + $0x1c8] sm:$0xff] }
 0x351   :  { %v3975_v37 = vadd.f32 %v3974_v21, %v3962_v36  ;;  %v7739_v21 = vld [vmem:[#allocation11 + $0x28] sm:$0xff] }
 0x352   :  { %4681 = vmatpush.bf16.msrb.mxu1 %v7715_v46  ;;  %4706 = vmatpush.bf16.msrb.mxu3 %v7732_v39 }
 0x353   :  { %v4088_v24 = vmax.f32 %v3975_v37, 0.0  ;;  %v7737_v37 = vld [vmem:[#allocation11 + $0x18] sm:$0xff] }
 0x354   :  { %4694 = vmatpush.bf16.msrb.mxu2 %v7723_v60  ;;  %4669 = vmatpush.bf16.msrb.mxu0 %v7706_v50  ;;  %v7726_v50 = vld [vmem:[#allocation8 + $0x1c0] sm:$0xff] }
 0x355   :  { %v4096_v53 = vpack.c.bf16 %v4088_v24, %v4088_v24  ;;  %v7735_v24 = vld [vmem:[#allocation11 + $0x8] sm:$0xff] }
 0x356   :  { %4682 = vmatpush.bf16.msrb.mxu1 %v7714_v55  ;;  %v3963_v52 = vpop.f32.mrf.mxu2  ;;  %4707 = vmatpush.bf16.msrb.mxu3 %v7731_v19 }
 0x358   :  { %4695 = vmatpush.bf16.msrb.mxu2 %v7722_v58  ;;  %4670 = vmatpush.bf16.msrb.mxu0 %v7705_v59  ;;  %v3976_v20 = vpop.f32.mrf.mxu3 }
 0x35a   :  { %4683 = vmatpush.bf16.msrb.mxu1 %v7713_v61  ;;  %4708 = vmatpush.bf16.msrb.mxu3 %v7730_v22 }
 0x35c   :  { %4696 = vmatpush.bf16.msrb.mxu2 %v7721_v1  ;;  %4671 = vmatpush.bf16.msrb.mxu0 %v7704_v2 }
 0x35e   :  { %4684 = vmatpush.bf16.msrb.mxu1 %v7712_v41  ;;  %4709 = vmatpush.bf16.msrb.mxu3 %v7729_v49 }
 0x360   :  { %4697 = vmatpush.bf16.msrb.mxu2 %v7720_v8  ;;  %4672 = vmatpush.bf16.msrb.mxu0 %v7703_v10 }
 0x362   :  { %4685 = vmatpush.bf16.msrb.mxu1 %v7711_v7  ;;  %4710 = vmatpush.bf16.msrb.mxu3 %v7728_v56  ;;  %v7755_v56 = vld [vmem:[#allocation13] ss:$0 sm:$0xff] }
 0x364   :  { %4698 = vmatpush.bf16.msrb.mxu2 %v7719_v23  ;;  %4673 = vmatpush.bf16.msrb.mxu0 %v7702_v26  ;;  %v3987_v43 = vpop.f32.mrf.mxu0 }
 0x365   :  { %v3988_v6 = vadd.f32 %v3987_v43, %v653_v54 }
 0x366   :  { %4686 = vmatpush.bf16.msrb.mxu1 %v7710_v25  ;;  %v4000_v45 = vpop.f32.mrf.mxu1  ;;  %4711 = vmatpush.bf16.msrb.mxu3 %v7727_v48 }
 0x367   :  { %4674 = vmatmul.bf16.vlgmr.msrb.gmra.mxu0 %v4094_v30  ;;  %v4001_v58 = vadd.f32 %v4000_v45, %v3988_v6 }
 0x368   :  { %4699 = vmatpush.bf16.msrb.mxu2 %v7718_v29  ;;  %4788 = vmatpush.bf16.msra.mxu0 %v7741_v34 }
 0x369   :  { %4687 = vmatmul.bf16.vlgmr.msrb.gmra.mxu1 %v4095_v31 }
 0x36a   :  { %4712 = vmatpush.bf16.msrb.mxu3 %v7726_v50 }
 0x36b   :  { %4700 = vmatmul.bf16.vlgmr.msrb.gmra.mxu2 %v4096_v53  ;;  %v7734_v53 = vld [vmem:[#allocation11] sm:$0xff] }
 0x36c   :  { %v3989_v47 = vpop.f32.mrf.mxu0  ;;  %4789 = vmatpush.bf16.msra.mxu0 %v7740_v35 }
 0x36e   :  { %v4013_v63 = vpop.f32.mrf.mxu2  ;;  %v4002_v60 = vpop.f32.mrf.mxu1 }
 0x36f   :  { %v4014_v59 = vadd.f32 %v4013_v63, %v4001_v58 }
 0x370   :  { %v4026_v46 = vpop.f32.mrf.mxu3  ;;  %4790 = vmatpush.bf16.msra.mxu0 %v7739_v21 }
 0x371   :  { %v4027_v61 = vadd.f32 %v4026_v46, %v4014_v59 }
 0x374   :  { %4791 = vmatpush.bf16.msra.mxu0 %v7738_v18 }
 0x376   :  { %v4015_v55 = vpop.f32.mrf.mxu2 }
 0x378   :  { %v4028_v57 = vpop.f32.mrf.mxu3  ;;  %4792 = vmatpush.bf16.msra.mxu0 %v7737_v37 }
 0x37c   :  { %4793 = vmatpush.bf16.msra.mxu0 %v7736_v51 }
 0x380   :  { %4794 = vmatpush.bf16.msra.mxu0 %v7735_v24 }
 0x384   :  { %4795 = vmatpush.bf16.msra.mxu0 %v7734_v53 }
 0x3a4   :  { %v4039_v62 = vpop.f32.mrf.mxu0 }
 0x3a5   :  { %v4040_v9 = vadd.f32 %v4039_v62, %v4027_v61 }
 0x3a6   :  { %v4052_v0 = vpop.f32.mrf.mxu1 }
 0x3a7   :  { %v4053_v1 = vadd.f32 %v4052_v0, %v4040_v9 }
 0x3ac   :  { %v4041_v44 = vpop.f32.mrf.mxu0 }
 0x3ae   :  { %v4065_v2 = vpop.f32.mrf.mxu2  ;;  %v4054_v5 = vpop.f32.mrf.mxu1 }
 0x3af   :  { %v4066_v4 = vadd.f32 %v4065_v2, %v4053_v1 }
 0x3b0   :  { %v4078_v41 = vpop.f32.mrf.mxu3 }
 0x3b1   :  { %v4079_v42 = vadd.f32 %v4078_v41, %v4066_v4 }
 0x3b3   :  { %v4089_v8 = vmax.f32 %v4079_v42, 0.0 }
 0x3b5   :  { %v4097_v10 = vpack.c.bf16 %v4089_v8, %v4089_v8 }
 0x3b6   :  { %v4067_v7 = vpop.f32.mrf.mxu2 }
 0x3b7   :  { %4713 = vmatmul.bf16.vlgmr.msrb.gmra.mxu3 %v4097_v10 }
 0x3b8   :  { %v4080_v38 = vpop.f32.mrf.mxu3 }
 0x3c4   :  { %v4623_v15 = vpop.f32.mrf.mxu0 }
 0x3c5   :  { %v4624_v16 = vadd.f32 %v7754_v12, %v4623_v15 }
 0x3c6   :  { %v4636_v17 = vpop.f32.mrf.mxu1 }
 0x3c7   :  { %v4637_v23 = vadd.f32 %v4636_v17, %v4624_v16 }
 0x3cc   :  { %v4625_v27 = vpop.f32.mrf.mxu0 }
 0x3ce   :  { %v4649_v26 = vpop.f32.mrf.mxu2  ;;  %v4638_v28 = vpop.f32.mrf.mxu1 }
 0x3cf   :  { %v4650_v11 = vadd.f32 %v4649_v26, %v4637_v23 }
 0x3d0   :  { %v4662_v25 = vpop.f32.mrf.mxu3 }
 0x3d1   :  { %v4663_v29 = vadd.f32 %v4662_v25, %v4650_v11 }
 0x3d6   :  { %v4651_v30 = vpop.f32.mrf.mxu2 }
 0x3d8   :  { %v4664_v31 = vpop.f32.mrf.mxu3 }
 0x3e4   :  { %v4675_v3 = vpop.f32.mrf.mxu0 }
 0x3e5   :  { %v4676_v14 = vadd.f32 %v4675_v3, %v4663_v29 }
 0x3e6   :  { %v4688_v32 = vpop.f32.mrf.mxu1 }
 0x3e7   :  { %v4689_v33 = vadd.f32 %v4688_v32, %v4676_v14 }
 0x3ec   :  { %v4677_v13 = vpop.f32.mrf.mxu0 }
 0x3ee   :  { %v4690_v36 = vpop.f32.mrf.mxu1  ;;  %v4701_v39 = vpop.f32.mrf.mxu2 }
 0x3ef   :  { %v4702_v19 = vadd.f32 %v4701_v39, %v4689_v33 }
 0x3f6   :  { %v4703_v40 = vpop.f32.mrf.mxu2 }
 0x43a   :  { %v4714_v52 = vpop.f32.mrf.mxu3 }
 0x43b   :  { %v4715_v20 = vadd.f32 %v4714_v52, %v4702_v19 }
 0x43d   :  { %v4718_v22 = vmax.f32 %v4715_v20, 0.0 }
 0x43f   :  { %v4719_v49 = vpack.c.bf16 %v4718_v22, %v4718_v22 }
 0x441   :  { %4796 = vmatmul.bf16.vlgmr.msra.gmra.mxu0 %v4719_v49 }
 0x442   :  { %v4716_v43 = vpop.f32.mrf.mxu3 }
 0x4be   :  { %v4797_v45 = vpop.f32.mrf.mxu0 }
 0x4bf   :  { %v4798_v63 = vadd.f32 %v7755_v56, %v4797_v45 }
 0x4c1   :  { %4801 = vst [vmem:[#allocation14] sm:$0xff] %v4798_v63 }
 0x4c2   :  { %4812 = dma.vmem_to_hbm [thread:$0]  %s4808_s6, 128, %s4810_s14, [#allocation4]  }
 0x4c6   :  { %v4799_v48 = vpop.f32.mrf.mxu0 }
 0x4c7   :  { %7959 = dma.done.wait [#allocation4], 128  }
 0x4c8   :  { %7960 = vsyncadd [#allocation4], 4294967168 }
 0x4c9   :  { %4817 = vsyncpa [#allocation3], 1 }
 0x4ca   :  { %4818 = vsyncpa [#allocation6], 1 }
 0x4cb   :  { %4819 = vsyncpa [#allocation9], 1 }
 0x4cc   :  { %4820 = vsyncpa [#allocation12], 1 }
 0x4cd   :  { %4821 = vsyncpa [#allocation4], 1 }

</bundles_post_ra>
